<compile_context>
chip_gen: v7x
topology: tpu7x:2x2x1
jax: 0.10.0
libtpu: 0.0.40
codegen_flags: <defaults>
</compile_context>

<pallas_src>
import functools
import math

import jax
import jax.numpy as jnp
from jax import lax
from jax.experimental import pallas as pl
from jax.experimental.pallas import tpu as pltpu


# ----------------------------- small matmul kernel --------------------------

def _matmul_bias_kernel(x_ref, w_ref, b_ref, o_ref):
    o_ref[...] = (
        jnp.dot(x_ref[...], w_ref[...], preferred_element_type=jnp.float32)
        + b_ref[...]
    )


def matmul_bias(x, w, b):
    """(M,K) @ (K,N) + bias.  Whole-array block (patch-embed / head only)."""
    M, _ = x.shape
    N = w.shape[1]
    return pl.pallas_call(
        _matmul_bias_kernel,
        out_shape=jax.ShapeDtypeStruct((M, N), jnp.float32),
    )(x.astype(jnp.float32), w.astype(jnp.float32),
      b.reshape(1, N).astype(jnp.float32))


# ------------------------ fused VisionMamba block kernel ---------------------

def _fused_block_kernel(eps, has_residual, *args):
    """One Block (Add -> LayerNorm -> Mamba mixer) for one batch element."""
    if has_residual:
        (h_ref, r_ref, nw_ref, nb_ref, inx_ref, inz_ref, convw_ref, convb_ref,
         xpb_ref, xpc_ref, wdt_ref, dtb_ref, a_ref, dpar_ref, outw_ref,
         o_ref, res_ref,
         u_scr, dt_scr, z_scr, b_scr, c_scr, y_scr) = args
    else:
        (h_ref, nw_ref, nb_ref, inx_ref, inz_ref, convw_ref, convb_ref,
         xpb_ref, xpc_ref, wdt_ref, dtb_ref, a_ref, dpar_ref, outw_ref,
         o_ref, res_ref,
         u_scr, dt_scr, z_scr, b_scr, c_scr, y_scr) = args
        r_ref = None

    Lp = h_ref.shape[1]
    Din = inx_ref.shape[1]
    K = convw_ref.shape[0]
    N = a_ref.shape[0]

    # ---- Add + LayerNorm (pre-norm; residual stream carried alongside) ----
    res = h_ref[0] + r_ref[0] if has_residual else h_ref[0]     # (Lp, D)
    res_ref[0] = res
    mean = jnp.mean(res, axis=-1, keepdims=True)
    var = jnp.mean(jnp.square(res - mean), axis=-1, keepdims=True)
    normed = (res - mean) * lax.rsqrt(var + eps) * nw_ref[...] + nb_ref[...]
    normed_bf = normed.astype(jnp.bfloat16)                     # MXU operands bf16

    # ---- in_proj (weights pre-split: no lane-offset slicing of fused xz) ----
    xc = jnp.dot(normed_bf, inx_ref[...], preferred_element_type=jnp.float32)
    z = jnp.dot(normed_bf, inz_ref[...], preferred_element_type=jnp.float32)
    z_scr[...] = z                                              # gate read per-chunk

    # ---- depthwise causal conv1d + SiLU (in-register zero pad, no matmuls) --
    xpad = jnp.concatenate(
        [jnp.zeros((K - 1, Din), jnp.float32), xc], axis=0)     # (Lp+K-1, Din)
    conv_acc = jnp.zeros((Lp, Din), jnp.float32)
    for k in range(K):                      # tap k multiplies x[t - (K-1-k)]
        conv_acc = conv_acc + xpad[k:k + Lp, :] * convw_ref[k:k + 1, :]
    conv_acc = conv_acc + convb_ref[...]
    u = conv_acc * jax.nn.sigmoid(conv_acc)                     # SiLU
    u_scr[...] = u
    u_bf = u.astype(jnp.bfloat16)

    # ---- x_proj (B, C) and fused dt = softplus(u @ W_dt + b) ----
    b_scr[...] = jnp.dot(u_bf, xpb_ref[...], preferred_element_type=jnp.float32)
    c_scr[...] = jnp.dot(u_bf, xpc_ref[...], preferred_element_type=jnp.float32)
    dt_scr[...] = jax.nn.softplus(
        jnp.dot(u_bf, wdt_ref[...], preferred_element_type=jnp.float32)
        + dtb_ref[...])

    # ---- selective scan ----
    # state is (N, Din): d_inner on lanes, d_state on sublanes.  Time is
    # processed as a lax.fori_loop over 8-token chunks (one sublane tile); the
    # 8 inner steps are unrolled, only the (N, Din) state is carried and each
    # gated y chunk is written straight to VMEM scratch.
    a_t = a_ref[...]                               # (N, Din) == -exp(A_log)^T
    dp = dpar_ref[...]                             # (1, Din)

    def chunk_body(c, h_state):
        base = pl.multiple_of(c * 8, 8)
        ub = u_scr[pl.ds(base, 8), :]              # (8, Din)
        dtc = dt_scr[pl.ds(base, 8), :]            # (8, Din)
        bb = b_scr[pl.ds(base, 8), :]              # (8, N)
        cb = c_scr[pl.ds(base, 8), :]              # (8, N)
        zb = z_scr[pl.ds(base, 8), :]              # (8, Din)
        dtu = dtc * ub
        # hoisted: one EUP exp and one set of relayouts per chunk (not per step)
        da_blk = jnp.exp(dtc[:, None, :] * a_t[None, :, :])     # (8, N, Din)
        db_blk = bb[:, :, None] * dtu[:, None, :]               # (8, N, Din)
        cc_blk = cb[:, :, None]                                 # (8, N, 1)
        rows = []
        for i in range(8):                         # unrolled serial recurrence
            h_state = da_blk[i] * h_state + db_blk[i]
            rows.append(jnp.sum(h_state * cc_blk[i], axis=0, keepdims=True))
        y_blk = jnp.concatenate(rows, axis=0) + ub * dp          # (8, Din)
        y_blk = y_blk * (zb * jax.nn.sigmoid(zb))                # SiLU(z) gate
        y_scr[pl.ds(base, 8), :] = y_blk
        return h_state

    lax.fori_loop(0, Lp // 8, chunk_body, jnp.zeros((N, Din), jnp.float32))

    # ---- out_proj (single (Lp,Din)@(Din,D) matmul) ----
    o_ref[0] = jnp.dot(y_scr[...].astype(jnp.bfloat16), outw_ref[...],
                       preferred_element_type=jnp.float32)


def fused_mamba_block(hidden, residual, lp, eps):
    B, Lp, D = hidden.shape
    Din = lp["in_proj_wx"].shape[1]
    N = lp["A_neg_t"].shape[0]

    def seq_spec():
        return pl.BlockSpec((1, Lp, D), lambda b: (b, 0, 0))

    def w_spec(shape):
        n = len(shape)
        return pl.BlockSpec(shape, lambda b, _n=n: (0,) * _n)

    has_residual = residual is not None
    seq_inputs = [hidden] + ([residual] if has_residual else [])
    weight_inputs = [
        lp["norm_w"].reshape(1, D), lp["norm_b"].reshape(1, D),
        lp["in_proj_wx"], lp["in_proj_wz"],
        lp["conv_w"], lp["conv_b"].reshape(1, Din),
        lp["x_proj_B"], lp["x_proj_C"],
        lp["W_dt"], lp["dt_proj_b"].reshape(1, Din),
        lp["A_neg_t"], lp["D"].reshape(1, Din), lp["out_proj_w"],
    ]

    return pl.pallas_call(
        functools.partial(_fused_block_kernel, eps, has_residual),
        out_shape=(jax.ShapeDtypeStruct((B, Lp, D), jnp.float32),
                   jax.ShapeDtypeStruct((B, Lp, D), jnp.float32)),
        grid=(B,),
        in_specs=[seq_spec() for _ in seq_inputs]
                 + [w_spec(w.shape) for w in weight_inputs],
        out_specs=(seq_spec(), seq_spec()),
        scratch_shapes=[
            pltpu.VMEM((Lp, Din), jnp.float32),   # u   (post conv+SiLU)
            pltpu.VMEM((Lp, Din), jnp.float32),   # dt
            pltpu.VMEM((Lp, Din), jnp.float32),   # z   (gate)
            pltpu.VMEM((Lp, N), jnp.float32),     # B
            pltpu.VMEM((Lp, N), jnp.float32),     # C
            pltpu.VMEM((Lp, Din), jnp.float32),   # gated y
        ],
        compiler_params=pltpu.CompilerParams(
            dimension_semantics=("parallel",),     # v7x: shard batch over 2 TCs
            vmem_limit_bytes=32 * 1024 * 1024),
    )(*seq_inputs, *weight_inputs)


# ------------------- final add + norm (last real token only) ----------------

def _final_ln_kernel(eps, row, h_ref, r_ref, w_ref, b_ref, o_ref):
    res = h_ref[0] + r_ref[0]                       # (8, D) sublane tile only
    xl = res[row:row + 1, :]                        # last real token
    mean = jnp.mean(xl, axis=-1, keepdims=True)
    var = jnp.mean(jnp.square(xl - mean), axis=-1, keepdims=True)
    o_ref[0] = ((xl - mean) * lax.rsqrt(var + eps)) * w_ref[...] + b_ref[...]


def final_add_norm_last(hidden, residual, w, b, eps, idx):
    B, Lp, D = hidden.shape
    tile, row = idx // 8, idx % 8                   # only DMA one sublane tile
    out = pl.pallas_call(
        functools.partial(_final_ln_kernel, eps, row),
        out_shape=jax.ShapeDtypeStruct((B, 1, D), jnp.float32),
        grid=(B,),
        in_specs=[pl.BlockSpec((1, 8, D), lambda bb: (bb, tile, 0)),
                  pl.BlockSpec((1, 8, D), lambda bb: (bb, tile, 0)),
                  pl.BlockSpec((1, D), lambda bb: (0, 0)),
                  pl.BlockSpec((1, D), lambda bb: (0, 0))],
        out_specs=pl.BlockSpec((1, 1, D), lambda bb: (bb, 0, 0)),
        compiler_params=pltpu.CompilerParams(
            dimension_semantics=("parallel",)),
    )(hidden, residual, w.reshape(1, D), b.reshape(1, D))
    return out.reshape(B, D)


# ----------------------------- model (glue) ---------------------------------

def vision_mamba_forward(x_nchw, params):
    B, C, H, W = x_nchw.shape
    p = params["patch_size"]
    D = params["embed_dim"]
    Hp, Wp = H // p, W // p
    L = Hp * Wp

    # PatchEmbed: Conv2d(kernel=stride=p)  ==  patch-extract + matmul
    patches = x_nchw.reshape(B, C, Hp, p, Wp, p)
    patches = patches.transpose(0, 2, 4, 1, 3, 5).reshape(B * L, C * p * p)
    hidden = matmul_bias(patches, params["patch_w"], params["patch_b"])
    hidden = hidden.reshape(B, L, D)

    # pad the token axis to a multiple of 8 (one sublane tile); every per-token
    # op is causal / pointwise so pad tokens never influence real tokens.
    Lp = ((L + 7) // 8) * 8
    if Lp != L:
        hidden = jnp.pad(hidden, ((0, 0), (0, Lp - L), (0, 0)))

    residual = None                      # first block handled without a zeros DMA
    for lp_ in params["layers"]:
        hidden, residual = fused_mamba_block(hidden, residual, lp_, params["eps"])

    # final: residual = residual + hidden ; feats = norm_f(residual)[:, L-1, :]
    feats = final_add_norm_last(hidden, residual,
                                params["norm_f_w"], params["norm_f_b"],
                                params["eps"], L - 1)
    logits = matmul_bias(feats, params["head_w"], params["head_b"])
    return logits


# ----------------------------- init ------------------------------------------

def init_params(key, *, patch_size=4, in_chans=3, embed_dim=32, depth=2,
                num_classes=10, d_state=8, d_conv=4, expand=2, eps=1e-5):
    d_inner = expand * embed_dim
    dt_rank = max(1, math.ceil(embed_dim / 16))

    def nrm(k, shape, std=0.02):
        return std * jax.random.normal(k, shape, dtype=jnp.float32)

    keys = jax.random.split(key, 3 + depth)
    params = dict(
        patch_size=patch_size,
        embed_dim=embed_dim,
        eps=eps,
        patch_w=nrm(keys[0], (in_chans * patch_size * patch_size, embed_dim)),
        patch_b=jnp.zeros((embed_dim,), jnp.float32),
        norm_f_w=jnp.ones((embed_dim,), jnp.float32),
        norm_f_b=jnp.zeros((embed_dim,), jnp.float32),
        head_w=nrm(keys[1], (embed_dim, num_classes)),
        head_b=jnp.zeros((num_classes,), jnp.float32),
        layers=[],
    )

    for i in range(depth):
        lk = jax.random.split(keys[3 + i], 8)
        dt_init = jax.random.uniform(lk[6], (d_inner,), jnp.float32,
                                     minval=1e-3, maxval=1e-1)
        in_proj_w = nrm(lk[0], (embed_dim, 2 * d_inner))
        x_proj_w = nrm(lk[2], (d_inner, dt_rank + 2 * d_state))
        dt_proj_w = nrm(lk[3], (dt_rank, d_inner))
        A_log = jnp.log(jnp.tile(
            jnp.arange(1, d_state + 1, dtype=jnp.float32)[None, :],
            (d_inner, 1)))
        # x_proj(dt-part) composed with dt_proj offline -> one (Din, Din)
        # weight; the lane-sparse (Lp, dt_rank) intermediate never exists.
        W_dt = x_proj_w[:, :dt_rank] @ dt_proj_w
        layer = dict(
            norm_w=jnp.ones((embed_dim,), jnp.float32),
            norm_b=jnp.zeros((embed_dim,), jnp.float32),
            # in_proj / x_proj stored pre-split (no lane-offset slicing) and in
            # bf16 (MXU-native on v6e/v7x, halves weight DMA everywhere).
            in_proj_wx=in_proj_w[:, :d_inner].astype(jnp.bfloat16),
            in_proj_wz=in_proj_w[:, d_inner:].astype(jnp.bfloat16),
            conv_w=nrm(lk[1], (d_conv, d_inner)),
            conv_b=jnp.zeros((d_inner,), jnp.float32),
            x_proj_B=x_proj_w[:, dt_rank:dt_rank + d_state].astype(jnp.bfloat16),
            x_proj_C=x_proj_w[:, dt_rank + d_state:].astype(jnp.bfloat16),
            W_dt=W_dt.astype(jnp.bfloat16),
            dt_proj_b=jnp.log(jnp.expm1(dt_init)),          # inv-softplus init
            # A = -exp(A_log) precomputed ONCE, stored transposed (N, d_inner)
            # so the scan state keeps d_inner on lanes.  Kept f32 (recurrence
            # precision).
            A_neg_t=(-jnp.exp(A_log)).T,
            D=jnp.ones((d_inner,), jnp.float32),
            # _init_weights rescale of out_proj by sqrt(n_layer)
            out_proj_w=(nrm(lk[4], (d_inner, embed_dim))
                        / math.sqrt(depth)).astype(jnp.bfloat16),
        )
        params["layers"].append(layer)
    return params


# ----------------------------- main ------------------------------------------

if __name__ == "__main__":
    key = jax.random.PRNGKey(0)
    pkey, xkey = jax.random.split(key)

    params = init_params(pkey, patch_size=4, in_chans=3, embed_dim=32,
                         depth=2, num_classes=10, d_state=8, d_conv=4)

    # small image: B=2, C=3, 16x16 -> 4x4 grid of 4x4 patches -> L=16 tokens
    x = jax.random.normal(xkey, (2, 3, 16, 16), dtype=jnp.float32)

    fwd = jax.jit(lambda inp: vision_mamba_forward(inp, params))
    out = fwd(x)
    jax.block_until_ready(out)

    assert out.shape == (2, 10), out.shape
    assert bool(jnp.all(jnp.isfinite(out)))
    print("KERNEL_OK")
</pallas_src>

<mosaic_0001>
module attributes {stable_mosaic.version = 11 : i64} {
  func.func @_matmul_bias_kernel(%arg0: memref<32x48xf32, #tpu.memory_space<vmem>>, %arg1: memref<48x32xf32, #tpu.memory_space<vmem>>, %arg2: memref<1x32xf32, #tpu.memory_space<vmem>>, %arg3: memref<32x32xf32, #tpu.memory_space<vmem>>) attributes {dimension_semantics = [], scalar_prefetch = 0 : i64, scratch_operands = 0 : i64, tpu.core_type = #tpu.core_type<tc>} {
    %c0 = arith.constant 0 : index
    %c0_0 = arith.constant 0 : index
    %0 = vector.load %arg0[%c0, %c0_0] : memref<32x48xf32, #tpu.memory_space<vmem>>, vector<32x48xf32>
    %c0_1 = arith.constant 0 : index
    %c0_2 = arith.constant 0 : index
    %1 = vector.load %arg1[%c0_1, %c0_2] : memref<48x32xf32, #tpu.memory_space<vmem>>, vector<48x32xf32>
    %cst = arith.constant dense<0.000000e+00> : vector<32x32xf32>
    %2 = tpu.matmul %0, %1, %cst {dimension_numbers = #tpu.dot_dimension_numbers<[1], [0], [0], [1], [0, 0, 1, 1], [], []>} : vector<32x48xf32>, vector<48x32xf32>, vector<32x32xf32> -> vector<32x32xf32>
    %c0_3 = arith.constant 0 : index
    %c0_4 = arith.constant 0 : index
    %3 = vector.load %arg2[%c0_3, %c0_4] : memref<1x32xf32, #tpu.memory_space<vmem>>, vector<1x32xf32>
    %4 = vector.broadcast %3 : vector<1x32xf32> to vector<32x32xf32>
    %5 = arith.addf %2, %4 : vector<32x32xf32>
    %c0_5 = arith.constant 0 : index
    %c0_6 = arith.constant 0 : index
    %6 = vector.load %arg3[%c0_5, %c0_6] : memref<32x32xf32, #tpu.memory_space<vmem>>, vector<32x32xf32>
    tpu.vector_store %arg3[%c0_5, %c0_6], %5 {strides = array<i32>} : memref<32x32xf32, #tpu.memory_space<vmem>>, vector<32x32xf32>,
    return
  }
}

module attributes {stable_mosaic.version = 11 : i64} {
  func.func @_final_ln_kernel(%arg0: i32, %arg1: memref<1x8x32xf32, #tpu.memory_space<vmem>>, %arg2: memref<1x8x32xf32, #tpu.memory_space<vmem>>, %arg3: memref<1x32xf32, #tpu.memory_space<vmem>>, %arg4: memref<1x32xf32, #tpu.memory_space<vmem>>, %arg5: memref<1x1x32xf32, #tpu.memory_space<vmem>>) attributes {dimension_semantics = [#tpu.dimension_semantics<parallel>], iteration_bounds = array<i64: 2>, scalar_prefetch = 0 : i64, scratch_operands = 0 : i64, tpu.core_type = #tpu.core_type<tc>, window_params = [{transform_indices = @transform_0, window_bounds = array<i64: 1, 8, 32>}, {transform_indices = @transform_1, window_bounds = array<i64: 1, 8, 32>}, {pipeline_mode = #tpu.pipeline_mode<synchronous>, transform_indices = @transform_2, window_bounds = array<i64: 1, 32>}, {pipeline_mode = #tpu.pipeline_mode<synchronous>, transform_indices = @transform_3, window_bounds = array<i64: 1, 32>}, {transform_indices = @transform_4, window_bounds = array<i64: 1, 1, 32>}]} {
    %c0 = arith.constant 0 : index
    %c0_0 = arith.constant 0 : index
    %c0_1 = arith.constant 0 : index
    %0 = vector.load %arg1[%c0, %c0_0, %c0_1] : memref<1x8x32xf32, #tpu.memory_space<vmem>>, vector<1x8x32xf32>
    %1 = vector.shape_cast %0 : vector<1x8x32xf32> to vector<8x32xf32>
    %c0_2 = arith.constant 0 : index
    %c0_3 = arith.constant 0 : index
    %c0_4 = arith.constant 0 : index
    %2 = vector.load %arg2[%c0_2, %c0_3, %c0_4] : memref<1x8x32xf32, #tpu.memory_space<vmem>>, vector<1x8x32xf32>
    %3 = vector.shape_cast %2 : vector<1x8x32xf32> to vector<8x32xf32>
    %4 = arith.addf %1, %3 : vector<8x32xf32>
    %5 = vector.extract_strided_slice %4 {offsets = [7, 0], sizes = [1, 32], strides = [1, 1]} : vector<8x32xf32> to vector<1x32xf32>
    %cst = arith.constant dense<0.000000e+00> : vector<1xf32>
    %6 = vector.multi_reduction <add>, %5, %cst [1] : vector<1x32xf32> to vector<1xf32>
    %7 = vector.shape_cast %6 : vector<1xf32> to vector<1x1xf32>
    %cst_5 = arith.constant 3.200000e+01 : f32
    %8 = vector.broadcast %cst_5 : f32 to vector<1x1xf32>
    %9 = arith.divf %7, %8 : vector<1x1xf32>
    %10 = vector.broadcast %9 : vector<1x1xf32> to vector<1x32xf32>
    %11 = arith.subf %5, %10 : vector<1x32xf32>
    %12 = arith.mulf %11, %11 : vector<1x32xf32>
    %cst_6 = arith.constant dense<0.000000e+00> : vector<1xf32>
    %13 = vector.multi_reduction <add>, %12, %cst_6 [1] : vector<1x32xf32> to vector<1xf32>
    %14 = vector.shape_cast %13 : vector<1xf32> to vector<1x1xf32>
    %cst_7 = arith.constant 3.200000e+01 : f32
    %15 = vector.broadcast %cst_7 : f32 to vector<1x1xf32>
    %16 = arith.divf %14, %15 : vector<1x1xf32>
    %17 = vector.broadcast %9 : vector<1x1xf32> to vector<1x32xf32>
    %18 = arith.subf %5, %17 : vector<1x32xf32>
    %cst_8 = arith.constant 9.99999974E-6 : f32
    %19 = vector.broadcast %cst_8 : f32 to vector<1x1xf32>
    %20 = arith.addf %16, %19 : vector<1x1xf32>
    %21 = math.rsqrt %20 : vector<1x1xf32>
    %22 = vector.broadcast %21 : vector<1x1xf32> to vector<1x32xf32>
    %23 = arith.mulf %18, %22 : vector<1x32xf32>
    %c0_9 = arith.constant 0 : index
    %c0_10 = arith.constant 0 : index
    %24 = vector.load %arg3[%c0_9, %c0_10] : memref<1x32xf32, #tpu.memory_space<vmem>>, vector<1x32xf32>
    %25 = arith.mulf %23, %24 : vector<1x32xf32>
    %c0_11 = arith.constant 0 : index
    %c0_12 = arith.constant 0 : index
    %26 = vector.load %arg4[%c0_11, %c0_12] : memref<1x32xf32, #tpu.memory_space<vmem>>, vector<1x32xf32>
    %27 = arith.addf %25, %26 : vector<1x32xf32>
    %c0_13 = arith.constant 0 : index
    %c0_14 = arith.constant 0 : index
    %c0_15 = arith.constant 0 : index
    %28 = vector.load %arg5[%c0_13, %c0_14, %c0_15] : memref<1x1x32xf32, #tpu.memory_space<vmem>>, vector<1x1x32xf32>
    %29 = vector.shape_cast %28 : vector<1x1x32xf32> to vector<1x32xf32>
    %30 = vector.shape_cast %27 : vector<1x32xf32> to vector<1x1x32xf32>
    tpu.vector_store %arg5[%c0_13, %c0_14, %c0_15], %30 {strides = array<i32>} : memref<1x1x32xf32, #tpu.memory_space<vmem>>, vector<1x1x32xf32>,
    return
  }
  func.func @transform_0(%arg0: i32) -> (i32, i32, i32) {
    %c1_i32 = arith.constant 1 : i32
    %c0_i32 = arith.constant 0 : i32
    %c0_i32_0 = arith.constant 0 : i32
    return %arg0, %c1_i32, %c0_i32 : i32, i32, i32
  }
  func.func @transform_1(%arg0: i32) -> (i32, i32, i32) {
    %c1_i32 = arith.constant 1 : i32
    %c0_i32 = arith.constant 0 : i32
    %c0_i32_0 = arith.constant 0 : i32
    return %arg0, %c1_i32, %c0_i32 : i32, i32, i32
  }
  func.func @transform_2(%arg0: i32) -> (i32, i32) {
    %c0_i32 = arith.constant 0 : i32
    %c0_i32_0 = arith.constant 0 : i32
    %c0_i32_1 = arith.constant 0 : i32
    return %c0_i32, %c0_i32_0 : i32, i32
  }
  func.func @transform_3(%arg0: i32) -> (i32, i32) {
    %c0_i32 = arith.constant 0 : i32
    %c0_i32_0 = arith.constant 0 : i32
    %c0_i32_1 = arith.constant 0 : i32
    return %c0_i32, %c0_i32_0 : i32, i32
  }
  func.func @transform_4(%arg0: i32) -> (i32, i32, i32) {
    %c0_i32 = arith.constant 0 : i32
    %c0_i32_0 = arith.constant 0 : i32
    %c0_i32_1 = arith.constant 0 : i32
    return %arg0, %c0_i32, %c0_i32_0 : i32, i32, i32
  }
}

module attributes {stable_mosaic.version = 11 : i64} {
  func.func @_fused_block_kernel(%arg0: i32, %arg1: memref<1x16x32xf32, #tpu.memory_space<vmem>>, %arg2: memref<1x32xf32, #tpu.memory_space<vmem>>, %arg3: memref<1x32xf32, #tpu.memory_space<vmem>>, %arg4: memref<32x64xbf16, #tpu.memory_space<vmem>>, %arg5: memref<32x64xbf16, #tpu.memory_space<vmem>>, %arg6: memref<4x64xf32, #tpu.memory_space<vmem>>, %arg7: memref<1x64xf32, #tpu.memory_space<vmem>>, %arg8: memref<64x8xbf16, #tpu.memory_space<vmem>>, %arg9: memref<64x8xbf16, #tpu.memory_space<vmem>>, %arg10: memref<64x64xbf16, #tpu.memory_space<vmem>>, %arg11: memref<1x64xf32, #tpu.memory_space<vmem>>, %arg12: memref<8x64xf32, #tpu.memory_space<vmem>>, %arg13: memref<1x64xf32, #tpu.memory_space<vmem>>, %arg14: memref<64x32xbf16, #tpu.memory_space<vmem>>, %arg15: memref<1x16x32xf32, #tpu.memory_space<vmem>>, %arg16: memref<1x16x32xf32, #tpu.memory_space<vmem>>, %arg17: memref<16x64xf32, #tpu.memory_space<vmem>>, %arg18: memref<16x64xf32, #tpu.memory_space<vmem>>, %arg19: memref<16x64xf32, #tpu.memory_space<vmem>>, %arg20: memref<16x8xf32, #tpu.memory_space<vmem>>, %arg21: memref<16x8xf32, #tpu.memory_space<vmem>>, %arg22: memref<16x64xf32, #tpu.memory_space<vmem>>) attributes {dimension_semantics = [#tpu.dimension_semantics<parallel>], iteration_bounds = array<i64: 2>, scalar_prefetch = 0 : i64, scratch_operands = 6 : i64, tpu.core_type = #tpu.core_type<tc>, window_params = [{transform_indices = @transform_0, window_bounds = array<i64: 1, 16, 32>}, {pipeline_mode = #tpu.pipeline_mode<synchronous>, transform_indices = @transform_1, window_bounds = array<i64: 1, 32>}, {pipeline_mode = #tpu.pipeline_mode<synchronous>, transform_indices = @transform_2, window_bounds = array<i64: 1, 32>}, {pipeline_mode = #tpu.pipeline_mode<synchronous>, transform_indices = @transform_3, window_bounds = array<i64: 32, 64>}, {pipeline_mode = #tpu.pipeline_mode<synchronous>, transform_indices = @transform_4, window_bounds = array<i64: 32, 64>}, {pipeline_mode = #tpu.pipeline_mode<synchronous>, transform_indices = @transform_5, window_bounds = array<i64: 4, 64>}, {pipeline_mode = #tpu.pipeline_mode<synchronous>, transform_indices = @transform_6, window_bounds = array<i64: 1, 64>}, {pipeline_mode = #tpu.pipeline_mode<synchronous>, transform_indices = @transform_7, window_bounds = array<i64: 64, 8>}, {pipeline_mode = #tpu.pipeline_mode<synchronous>, transform_indices = @transform_8, window_bounds = array<i64: 64, 8>}, {pipeline_mode = #tpu.pipeline_mode<synchronous>, transform_indices = @transform_9, window_bounds = array<i64: 64, 64>}, {pipeline_mode = #tpu.pipeline_mode<synchronous>, transform_indices = @transform_10, window_bounds = array<i64: 1, 64>}, {pipeline_mode = #tpu.pipeline_mode<synchronous>, transform_indices = @transform_11, window_bounds = array<i64: 8, 64>}, {pipeline_mode = #tpu.pipeline_mode<synchronous>, transform_indices = @transform_12, window_bounds = array<i64: 1, 64>}, {pipeline_mode = #tpu.pipeline_mode<synchronous>, transform_indices = @transform_13, window_bounds = array<i64: 64, 32>}, {transform_indices = @transform_14, window_bounds = array<i64: 1, 16, 32>}, {transform_indices = @transform_15, window_bounds = array<i64: 1, 16, 32>}]} {
    %c0 = arith.constant 0 : index
    %c0_0 = arith.constant 0 : index
    %c0_1 = arith.constant 0 : index
    %0 = vector.load %arg1[%c0, %c0_0, %c0_1] : memref<1x16x32xf32, #tpu.memory_space<vmem>>, vector<1x16x32xf32>
    %1 = vector.shape_cast %0 : vector<1x16x32xf32> to vector<16x32xf32>
    %c0_2 = arith.constant 0 : index
    %c0_3 = arith.constant 0 : index
    %c0_4 = arith.constant 0 : index
    %2 = vector.load %arg16[%c0_2, %c0_3, %c0_4] : memref<1x16x32xf32, #tpu.memory_space<vmem>>, vector<1x16x32xf32>
    %3 = vector.shape_cast %2 : vector<1x16x32xf32> to vector<16x32xf32>
    %4 = vector.shape_cast %1 : vector<16x32xf32> to vector<1x16x32xf32>
    tpu.vector_store %arg16[%c0_2, %c0_3, %c0_4], %4 {strides = array<i32>} : memref<1x16x32xf32, #tpu.memory_space<vmem>>, vector<1x16x32xf32>,
    %cst = arith.constant dense<0.000000e+00> : vector<16xf32>
    %5 = vector.multi_reduction <add>, %1, %cst [1] : vector<16x32xf32> to vector<16xf32>
    %6 = vector.shape_cast %5 : vector<16xf32> to vector<16x1xf32>
    %cst_5 = arith.constant 3.200000e+01 : f32
    %7 = vector.broadcast %cst_5 : f32 to vector<16x1xf32>
    %8 = arith.divf %6, %7 : vector<16x1xf32>
    %9 = vector.broadcast %8 : vector<16x1xf32> to vector<16x32xf32>
    %10 = arith.subf %1, %9 : vector<16x32xf32>
    %11 = arith.mulf %10, %10 : vector<16x32xf32>
    %cst_6 = arith.constant dense<0.000000e+00> : vector<16xf32>
    %12 = vector.multi_reduction <add>, %11, %cst_6 [1] : vector<16x32xf32> to vector<16xf32>
    %13 = vector.shape_cast %12 : vector<16xf32> to vector<16x1xf32>
    %cst_7 = arith.constant 3.200000e+01 : f32
    %14 = vector.broadcast %cst_7 : f32 to vector<16x1xf32>
    %15 = arith.divf %13, %14 : vector<16x1xf32>
    %16 = vector.broadcast %8 : vector<16x1xf32> to vector<16x32xf32>
    %17 = arith.subf %1, %16 : vector<16x32xf32>
    %cst_8 = arith.constant 9.99999974E-6 : f32
    %18 = vector.broadcast %cst_8 : f32 to vector<16x1xf32>
    %19 = arith.addf %15, %18 : vector<16x1xf32>
    %20 = math.rsqrt %19 : vector<16x1xf32>
    %21 = vector.broadcast %20 : vector<16x1xf32> to vector<16x32xf32>
    %22 = arith.mulf %17, %21 : vector<16x32xf32>
    %c0_9 = arith.constant 0 : index
    %c0_10 = arith.constant 0 : index
    %23 = vector.load %arg2[%c0_9, %c0_10] : memref<1x32xf32, #tpu.memory_space<vmem>>, vector<1x32xf32>
    %24 = vector.broadcast %23 : vector<1x32xf32> to vector<16x32xf32>
    %25 = arith.mulf %22, %24 : vector<16x32xf32>
    %c0_11 = arith.constant 0 : index
    %c0_12 = arith.constant 0 : index
    %26 = vector.load %arg3[%c0_11, %c0_12] : memref<1x32xf32, #tpu.memory_space<vmem>>, vector<1x32xf32>
    %27 = vector.broadcast %26 : vector<1x32xf32> to vector<16x32xf32>
    %28 = arith.addf %25, %27 : vector<16x32xf32>
    %29 = arith.truncf %28 : vector<16x32xf32> to vector<16x32xbf16>
    %c0_13 = arith.constant 0 : index
    %c0_14 = arith.constant 0 : index
    %30 = vector.load %arg4[%c0_13, %c0_14] : memref<32x64xbf16, #tpu.memory_space<vmem>>, vector<32x64xbf16>
    %cst_15 = arith.constant dense<0.000000e+00> : vector<16x64xf32>
    %31 = tpu.matmul %29, %30, %cst_15 {dimension_numbers = #tpu.dot_dimension_numbers<[1], [0], [0], [1], [0, 0, 1, 1], [], []>} : vector<16x32xbf16>, vector<32x64xbf16>, vector<16x64xf32> -> vector<16x64xf32>
    %c0_16 = arith.constant 0 : index
    %c0_17 = arith.constant 0 : index
    %32 = vector.load %arg5[%c0_16, %c0_17] : memref<32x64xbf16, #tpu.memory_space<vmem>>, vector<32x64xbf16>
    %cst_18 = arith.constant dense<0.000000e+00> : vector<16x64xf32>
    %33 = tpu.matmul %29, %32, %cst_18 {dimension_numbers = #tpu.dot_dimension_numbers<[1], [0], [0], [1], [0, 0, 1, 1], [], []>} : vector<16x32xbf16>, vector<32x64xbf16>, vector<16x64xf32> -> vector<16x64xf32>
    %c0_19 = arith.constant 0 : index
    %c0_20 = arith.constant 0 : index
    %34 = vector.load %arg19[%c0_19, %c0_20] : memref<16x64xf32, #tpu.memory_space<vmem>>, vector<16x64xf32>
    tpu.vector_store %arg19[%c0_19, %c0_20], %33 {strides = array<i32>} : memref<16x64xf32, #tpu.memory_space<vmem>>, vector<16x64xf32>,
    %cst_21 = arith.constant 0.000000e+00 : f32
    %35 = vector.broadcast %cst_21 : f32 to vector<3x64xf32>
    %36 = tpu.concatenate %35, %31 in 0 : vector<3x64xf32>, vector<16x64xf32> -> vector<19x64xf32>
    %cst_22 = arith.constant 0.000000e+00 : f32
    %37 = vector.broadcast %cst_22 : f32 to vector<16x64xf32>
    %38 = vector.extract_strided_slice %36 {offsets = [0, 0], sizes = [16, 64], strides = [1, 1]} : vector<19x64xf32> to vector<16x64xf32>
    %c0_23 = arith.constant 0 : index
    %c0_24 = arith.constant 0 : index
    %39 = vector.load %arg6[%c0_23, %c0_24] : memref<4x64xf32, #tpu.memory_space<vmem>>, vector<1x64xf32>
    %40 = vector.broadcast %39 : vector<1x64xf32> to vector<16x64xf32>
    %41 = arith.mulf %38, %40 : vector<16x64xf32>
    %42 = arith.addf %37, %41 : vector<16x64xf32>
    %43 = vector.extract_strided_slice %36 {offsets = [1, 0], sizes = [16, 64], strides = [1, 1]} : vector<19x64xf32> to vector<16x64xf32>
    %c1 = arith.constant 1 : index
    %c0_25 = arith.constant 0 : index
    %44 = vector.load %arg6[%c1, %c0_25] : memref<4x64xf32, #tpu.memory_space<vmem>>, vector<1x64xf32>
    %45 = vector.broadcast %44 : vector<1x64xf32> to vector<16x64xf32>
    %46 = arith.mulf %43, %45 : vector<16x64xf32>
    %47 = arith.addf %42, %46 : vector<16x64xf32>
    %48 = vector.extract_strided_slice %36 {offsets = [2, 0], sizes = [16, 64], strides = [1, 1]} : vector<19x64xf32> to vector<16x64xf32>
    %c2 = arith.constant 2 : index
    %c0_26 = arith.constant 0 : index
    %49 = vector.load %arg6[%c2, %c0_26] : memref<4x64xf32, #tpu.memory_space<vmem>>, vector<1x64xf32>
    %50 = vector.broadcast %49 : vector<1x64xf32> to vector<16x64xf32>
    %51 = arith.mulf %48, %50 : vector<16x64xf32>
    %52 = arith.addf %47, %51 : vector<16x64xf32>
    %53 = vector.extract_strided_slice %36 {offsets = [3, 0], sizes = [16, 64], strides = [1, 1]} : vector<19x64xf32> to vector<16x64xf32>
    %c3 = arith.constant 3 : index
    %c0_27 = arith.constant 0 : index
    %54 = vector.load %arg6[%c3, %c0_27] : memref<4x64xf32, #tpu.memory_space<vmem>>, vector<1x64xf32>
    %55 = vector.broadcast %54 : vector<1x64xf32> to vector<16x64xf32>
    %56 = arith.mulf %53, %55 : vector<16x64xf32>
    %57 = arith.addf %52, %56 : vector<16x64xf32>
    %c0_28 = arith.constant 0 : index
    %c0_29 = arith.constant 0 : index
    %58 = vector.load %arg7[%c0_28, %c0_29] : memref<1x64xf32, #tpu.memory_space<vmem>>, vector<1x64xf32>
    %59 = vector.broadcast %58 : vector<1x64xf32> to vector<16x64xf32>
    %60 = arith.addf %57, %59 : vector<16x64xf32>
    %61 = arith.negf %60 : vector<16x64xf32>
    %62 = math.exp %61 : vector<16x64xf32>
    %cst_30 = arith.constant 1.000000e+00 : f32
    %63 = vector.broadcast %cst_30 : f32 to vector<16x64xf32>
    %64 = arith.addf %63, %62 : vector<16x64xf32>
    %65 = arith.divf %63, %64 : vector<16x64xf32>
    %66 = arith.mulf %60, %65 : vector<16x64xf32>
    %c0_31 = arith.constant 0 : index
    %c0_32 = arith.constant 0 : index
    %67 = vector.load %arg17[%c0_31, %c0_32] : memref<16x64xf32, #tpu.memory_space<vmem>>, vector<16x64xf32>
    tpu.vector_store %arg17[%c0_31, %c0_32], %66 {strides = array<i32>} : memref<16x64xf32, #tpu.memory_space<vmem>>, vector<16x64xf32>,
    %68 = arith.truncf %66 : vector<16x64xf32> to vector<16x64xbf16>
    %c0_33 = arith.constant 0 : index
    %c0_34 = arith.constant 0 : index
    %69 = vector.load %arg8[%c0_33, %c0_34] : memref<64x8xbf16, #tpu.memory_space<vmem>>, vector<64x8xbf16>
    %cst_35 = arith.constant dense<0.000000e+00> : vector<16x8xf32>
    %70 = tpu.matmul %68, %69, %cst_35 {dimension_numbers = #tpu.dot_dimension_numbers<[1], [0], [0], [1], [0, 0, 1, 1], [], []>} : vector<16x64xbf16>, vector<64x8xbf16>, vector<16x8xf32> -> vector<16x8xf32>
    %c0_36 = arith.constant 0 : index
    %c0_37 = arith.constant 0 : index
    %71 = vector.load %arg20[%c0_36, %c0_37] : memref<16x8xf32, #tpu.memory_space<vmem>>, vector<16x8xf32>
    tpu.vector_store %arg20[%c0_36, %c0_37], %70 {strides = array<i32>} : memref<16x8xf32, #tpu.memory_space<vmem>>, vector<16x8xf32>,
    %c0_38 = arith.constant 0 : index
    %c0_39 = arith.constant 0 : index
    %72 = vector.load %arg9[%c0_38, %c0_39] : memref<64x8xbf16, #tpu.memory_space<vmem>>, vector<64x8xbf16>
    %cst_40 = arith.constant dense<0.000000e+00> : vector<16x8xf32>
    %73 = tpu.matmul %68, %72, %cst_40 {dimension_numbers = #tpu.dot_dimension_numbers<[1], [0], [0], [1], [0, 0, 1, 1], [], []>} : vector<16x64xbf16>, vector<64x8xbf16>, vector<16x8xf32> -> vector<16x8xf32>
    %c0_41 = arith.constant 0 : index
    %c0_42 = arith.constant 0 : index
    %74 = vector.load %arg21[%c0_41, %c0_42] : memref<16x8xf32, #tpu.memory_space<vmem>>, vector<16x8xf32>
    tpu.vector_store %arg21[%c0_41, %c0_42], %73 {strides = array<i32>} : memref<16x8xf32, #tpu.memory_space<vmem>>, vector<16x8xf32>,
    %c0_43 = arith.constant 0 : index
    %c0_44 = arith.constant 0 : index
    %75 = vector.load %arg10[%c0_43, %c0_44] : memref<64x64xbf16, #tpu.memory_space<vmem>>, vector<64x64xbf16>
    %cst_45 = arith.constant dense<0.000000e+00> : vector<16x64xf32>
    %76 = tpu.matmul %68, %75, %cst_45 {dimension_numbers = #tpu.dot_dimension_numbers<[1], [0], [0], [1], [0, 0, 1, 1], [], []>} : vector<16x64xbf16>, vector<64x64xbf16>, vector<16x64xf32> -> vector<16x64xf32>
    %c0_46 = arith.constant 0 : index
    %c0_47 = arith.constant 0 : index
    %77 = vector.load %arg11[%c0_46, %c0_47] : memref<1x64xf32, #tpu.memory_space<vmem>>, vector<1x64xf32>
    %78 = vector.broadcast %77 : vector<1x64xf32> to vector<16x64xf32>
    %79 = arith.addf %76, %78 : vector<16x64xf32>
    %cst_48 = arith.constant 0.000000e+00 : f32
    %80 = vector.broadcast %cst_48 : f32 to vector<16x64xf32>
    %81 = arith.maximumf %79, %80 : vector<16x64xf32>
    %82 = vector.broadcast %cst_48 : f32 to vector<16x64xf32>
    %83 = arith.subf %79, %82 : vector<16x64xf32>
    %84 = arith.cmpf one, %83, %83 : vector<16x64xf32>
    %85 = vector.broadcast %cst_48 : f32 to vector<16x64xf32>
    %86 = arith.addf %79, %85 : vector<16x64xf32>
    %87 = math.absf %83 : vector<16x64xf32>
    %cst_49 = arith.constant 0.000000e+00 : f32
    %88 = vector.broadcast %cst_49 : f32 to vector<16x64xf32>
    %89 = arith.subf %88, %87 : vector<16x64xf32>
    %90 = math.exp %89 : vector<16x64xf32>
    %91 = math.log1p %90 : vector<16x64xf32>
    %92 = arith.addf %81, %91 : vector<16x64xf32>
    %93 = arith.select %84, %86, %92 : vector<16x64xi1>, vector<16x64xf32>
    %c0_50 = arith.constant 0 : index
    %c0_51 = arith.constant 0 : index
    %94 = vector.load %arg18[%c0_50, %c0_51] : memref<16x64xf32, #tpu.memory_space<vmem>>, vector<16x64xf32>
    tpu.vector_store %arg18[%c0_50, %c0_51], %93 {strides = array<i32>} : memref<16x64xf32, #tpu.memory_space<vmem>>, vector<16x64xf32>,
    %c0_52 = arith.constant 0 : index
    %c0_53 = arith.constant 0 : index
    %95 = vector.load %arg12[%c0_52, %c0_53] : memref<8x64xf32, #tpu.memory_space<vmem>>, vector<8x64xf32>
    %c0_54 = arith.constant 0 : index
    %c0_55 = arith.constant 0 : index
    %96 = vector.load %arg13[%c0_54, %c0_55] : memref<1x64xf32, #tpu.memory_space<vmem>>, vector<1x64xf32>
    %cst_56 = arith.constant 0.000000e+00 : f32
    %97 = vector.broadcast %cst_56 : f32 to vector<8x64xf32>
    %c0_i32 = arith.constant 0 : i32
    %c2_i32 = arith.constant 2 : i32
    %98 = arith.addi %c0_i32, %c2_i32 : i32
    %c1_i32 = arith.constant 1 : i32
    %99 = scf.for %arg23 = %c0_i32 to %98 step %c1_i32 iter_args(%arg24 = %97) -> (vector<8x64xf32>)  : i32 {
      %c8_i32 = arith.constant 8 : i32
      %107 = arith.muli %arg23, %c8_i32 : i32
      %108 = tpu.assume_multiple %107, 8 : i32
      %109 = arith.index_cast %108 : i32 to index
      %c0_66 = arith.constant 0 : index
      %110 = vector.load %arg17[%109, %c0_66] : memref<16x64xf32, #tpu.memory_space<vmem>>, vector<8x64xf32>
      %111 = arith.index_cast %108 : i32 to index
      %c0_67 = arith.constant 0 : index
      %112 = vector.load %arg18[%111, %c0_67] : memref<16x64xf32, #tpu.memory_space<vmem>>, vector<8x64xf32>
      %113 = arith.index_cast %108 : i32 to index
      %c0_68 = arith.constant 0 : index
      %114 = vector.load %arg20[%113, %c0_68] : memref<16x8xf32, #tpu.memory_space<vmem>>, vector<8x8xf32>
      %115 = arith.index_cast %108 : i32 to index
      %c0_69 = arith.constant 0 : index
      %116 = vector.load %arg21[%115, %c0_69] : memref<16x8xf32, #tpu.memory_space<vmem>>, vector<8x8xf32>
      %117 = arith.index_cast %108 : i32 to index
      %c0_70 = arith.constant 0 : index
      %118 = vector.load %arg19[%117, %c0_70] : memref<16x64xf32, #tpu.memory_space<vmem>>, vector<8x64xf32>
      %119 = arith.mulf %112, %110 : vector<8x64xf32>
      %120 = vector.shape_cast %112 : vector<8x64xf32> to vector<8x1x64xf32>
      %121 = vector.shape_cast %95 : vector<8x64xf32> to vector<1x8x64xf32>
      %122 = vector.broadcast %120 : vector<8x1x64xf32> to vector<8x8x64xf32>
      %123 = vector.broadcast %121 : vector<1x8x64xf32> to vector<8x8x64xf32>
      %124 = arith.mulf %122, %123 : vector<8x8x64xf32>
      %125 = math.exp %124 : vector<8x8x64xf32>
      %126 = vector.shape_cast %114 : vector<8x8xf32> to vector<8x8x1xf32>
      %127 = vector.shape_cast %119 : vector<8x64xf32> to vector<8x1x64xf32>
      %128 = vector.broadcast %126 : vector<8x8x1xf32> to vector<8x8x64xf32>
      %129 = vector.broadcast %127 : vector<8x1x64xf32> to vector<8x8x64xf32>
      %130 = arith.mulf %128, %129 : vector<8x8x64xf32>
      %131 = vector.shape_cast %116 : vector<8x8xf32> to vector<8x8x1xf32>
      %132 = vector.extract_strided_slice %125 {offsets = [0, 0, 0], sizes = [1, 8, 64], strides = [1, 1, 1]} : vector<8x8x64xf32> to vector<1x8x64xf32>
      %133 = vector.shape_cast %132 : vector<1x8x64xf32> to vector<8x64xf32>
      %134 = arith.mulf %133, %arg24 : vector<8x64xf32>
      %135 = vector.extract_strided_slice %130 {offsets = [0, 0, 0], sizes = [1, 8, 64], strides = [1, 1, 1]} : vector<8x8x64xf32> to vector<1x8x64xf32>
      %136 = vector.shape_cast %135 : vector<1x8x64xf32> to vector<8x64xf32>
      %137 = arith.addf %134, %136 : vector<8x64xf32>
      %138 = vector.extract_strided_slice %131 {offsets = [0, 0, 0], sizes = [1, 8, 1], strides = [1, 1, 1]} : vector<8x8x1xf32> to vector<1x8x1xf32>
      %139 = vector.shape_cast %138 : vector<1x8x1xf32> to vector<8x1xf32>
      %140 = vector.broadcast %139 : vector<8x1xf32> to vector<8x64xf32>
      %141 = arith.mulf %137, %140 : vector<8x64xf32>
      %cst_71 = arith.constant dense<0.000000e+00> : vector<64xf32>
      %142 = vector.multi_reduction <add>, %141, %cst_71 [0] : vector<8x64xf32> to vector<64xf32>
      %143 = vector.shape_cast %142 : vector<64xf32> to vector<1x64xf32>
      %144 = vector.extract_strided_slice %125 {offsets = [1, 0, 0], sizes = [1, 8, 64], strides = [1, 1, 1]} : vector<8x8x64xf32> to vector<1x8x64xf32>
      %145 = vector.shape_cast %144 : vector<1x8x64xf32> to vector<8x64xf32>
      %146 = arith.mulf %145, %137 : vector<8x64xf32>
      %147 = vector.extract_strided_slice %130 {offsets = [1, 0, 0], sizes = [1, 8, 64], strides = [1, 1, 1]} : vector<8x8x64xf32> to vector<1x8x64xf32>
      %148 = vector.shape_cast %147 : vector<1x8x64xf32> to vector<8x64xf32>
      %149 = arith.addf %146, %148 : vector<8x64xf32>
      %150 = vector.extract_strided_slice %131 {offsets = [1, 0, 0], sizes = [1, 8, 1], strides = [1, 1, 1]} : vector<8x8x1xf32> to vector<1x8x1xf32>
      %151 = vector.shape_cast %150 : vector<1x8x1xf32> to vector<8x1xf32>
      %152 = vector.broadcast %151 : vector<8x1xf32> to vector<8x64xf32>
      %153 = arith.mulf %149, %152 : vector<8x64xf32>
      %cst_72 = arith.constant dense<0.000000e+00> : vector<64xf32>
      %154 = vector.multi_reduction <add>, %153, %cst_72 [0] : vector<8x64xf32> to vector<64xf32>
      %155 = vector.shape_cast %154 : vector<64xf32> to vector<1x64xf32>
      %156 = vector.extract_strided_slice %125 {offsets = [2, 0, 0], sizes = [1, 8, 64], strides = [1, 1, 1]} : vector<8x8x64xf32> to vector<1x8x64xf32>
      %157 = vector.shape_cast %156 : vector<1x8x64xf32> to vector<8x64xf32>
      %158 = arith.mulf %157, %149 : vector<8x64xf32>
      %159 = vector.extract_strided_slice %130 {offsets = [2, 0, 0], sizes = [1, 8, 64], strides = [1, 1, 1]} : vector<8x8x64xf32> to vector<1x8x64xf32>
      %160 = vector.shape_cast %159 : vector<1x8x64xf32> to vector<8x64xf32>
      %161 = arith.addf %158, %160 : vector<8x64xf32>
      %162 = vector.extract_strided_slice %131 {offsets = [2, 0, 0], sizes = [1, 8, 1], strides = [1, 1, 1]} : vector<8x8x1xf32> to vector<1x8x1xf32>
      %163 = vector.shape_cast %162 : vector<1x8x1xf32> to vector<8x1xf32>
      %164 = vector.broadcast %163 : vector<8x1xf32> to vector<8x64xf32>
      %165 = arith.mulf %161, %164 : vector<8x64xf32>
      %cst_73 = arith.constant dense<0.000000e+00> : vector<64xf32>
      %166 = vector.multi_reduction <add>, %165, %cst_73 [0] : vector<8x64xf32> to vector<64xf32>
      %167 = vector.shape_cast %166 : vector<64xf32> to vector<1x64xf32>
      %168 = vector.extract_strided_slice %125 {offsets = [3, 0, 0], sizes = [1, 8, 64], strides = [1, 1, 1]} : vector<8x8x64xf32> to vector<1x8x64xf32>
      %169 = vector.shape_cast %168 : vector<1x8x64xf32> to vector<8x64xf32>
      %170 = arith.mulf %169, %161 : vector<8x64xf32>
      %171 = vector.extract_strided_slice %130 {offsets = [3, 0, 0], sizes = [1, 8, 64], strides = [1, 1, 1]} : vector<8x8x64xf32> to vector<1x8x64xf32>
      %172 = vector.shape_cast %171 : vector<1x8x64xf32> to vector<8x64xf32>
      %173 = arith.addf %170, %172 : vector<8x64xf32>
      %174 = vector.extract_strided_slice %131 {offsets = [3, 0, 0], sizes = [1, 8, 1], strides = [1, 1, 1]} : vector<8x8x1xf32> to vector<1x8x1xf32>
      %175 = vector.shape_cast %174 : vector<1x8x1xf32> to vector<8x1xf32>
      %176 = vector.broadcast %175 : vector<8x1xf32> to vector<8x64xf32>
      %177 = arith.mulf %173, %176 : vector<8x64xf32>
      %cst_74 = arith.constant dense<0.000000e+00> : vector<64xf32>
      %178 = vector.multi_reduction <add>, %177, %cst_74 [0] : vector<8x64xf32> to vector<64xf32>
      %179 = vector.shape_cast %178 : vector<64xf32> to vector<1x64xf32>
      %180 = vector.extract_strided_slice %125 {offsets = [4, 0, 0], sizes = [1, 8, 64], strides = [1, 1, 1]} : vector<8x8x64xf32> to vector<1x8x64xf32>
      %181 = vector.shape_cast %180 : vector<1x8x64xf32> to vector<8x64xf32>
      %182 = arith.mulf %181, %173 : vector<8x64xf32>
      %183 = vector.extract_strided_slice %130 {offsets = [4, 0, 0], sizes = [1, 8, 64], strides = [1, 1, 1]} : vector<8x8x64xf32> to vector<1x8x64xf32>
      %184 = vector.shape_cast %183 : vector<1x8x64xf32> to vector<8x64xf32>
      %185 = arith.addf %182, %184 : vector<8x64xf32>
      %186 = vector.extract_strided_slice %131 {offsets = [4, 0, 0], sizes = [1, 8, 1], strides = [1, 1, 1]} : vector<8x8x1xf32> to vector<1x8x1xf32>
      %187 = vector.shape_cast %186 : vector<1x8x1xf32> to vector<8x1xf32>
      %188 = vector.broadcast %187 : vector<8x1xf32> to vector<8x64xf32>
      %189 = arith.mulf %185, %188 : vector<8x64xf32>
      %cst_75 = arith.constant dense<0.000000e+00> : vector<64xf32>
      %190 = vector.multi_reduction <add>, %189, %cst_75 [0] : vector<8x64xf32> to vector<64xf32>
      %191 = vector.shape_cast %190 : vector<64xf32> to vector<1x64xf32>
      %192 = vector.extract_strided_slice %125 {offsets = [5, 0, 0], sizes = [1, 8, 64], strides = [1, 1, 1]} : vector<8x8x64xf32> to vector<1x8x64xf32>
      %193 = vector.shape_cast %192 : vector<1x8x64xf32> to vector<8x64xf32>
      %194 = arith.mulf %193, %185 : vector<8x64xf32>
      %195 = vector.extract_strided_slice %130 {offsets = [5, 0, 0], sizes = [1, 8, 64], strides = [1, 1, 1]} : vector<8x8x64xf32> to vector<1x8x64xf32>
      %196 = vector.shape_cast %195 : vector<1x8x64xf32> to vector<8x64xf32>
      %197 = arith.addf %194, %196 : vector<8x64xf32>
      %198 = vector.extract_strided_slice %131 {offsets = [5, 0, 0], sizes = [1, 8, 1], strides = [1, 1, 1]} : vector<8x8x1xf32> to vector<1x8x1xf32>
      %199 = vector.shape_cast %198 : vector<1x8x1xf32> to vector<8x1xf32>
      %200 = vector.broadcast %199 : vector<8x1xf32> to vector<8x64xf32>
      %201 = arith.mulf %197, %200 : vector<8x64xf32>
      %cst_76 = arith.constant dense<0.000000e+00> : vector<64xf32>
      %202 = vector.multi_reduction <add>, %201, %cst_76 [0] : vector<8x64xf32> to vector<64xf32>
      %203 = vector.shape_cast %202 : vector<64xf32> to vector<1x64xf32>
      %204 = vector.extract_strided_slice %125 {offsets = [6, 0, 0], sizes = [1, 8, 64], strides = [1, 1, 1]} : vector<8x8x64xf32> to vector<1x8x64xf32>
      %205 = vector.shape_cast %204 : vector<1x8x64xf32> to vector<8x64xf32>
      %206 = arith.mulf %205, %197 : vector<8x64xf32>
      %207 = vector.extract_strided_slice %130 {offsets = [6, 0, 0], sizes = [1, 8, 64], strides = [1, 1, 1]} : vector<8x8x64xf32> to vector<1x8x64xf32>
      %208 = vector.shape_cast %207 : vector<1x8x64xf32> to vector<8x64xf32>
      %209 = arith.addf %206, %208 : vector<8x64xf32>
      %210 = vector.extract_strided_slice %131 {offsets = [6, 0, 0], sizes = [1, 8, 1], strides = [1, 1, 1]} : vector<8x8x1xf32> to vector<1x8x1xf32>
      %211 = vector.shape_cast %210 : vector<1x8x1xf32> to vector<8x1xf32>
      %212 = vector.broadcast %211 : vector<8x1xf32> to vector<8x64xf32>
      %213 = arith.mulf %209, %212 : vector<8x64xf32>
      %cst_77 = arith.constant dense<0.000000e+00> : vector<64xf32>
      %214 = vector.multi_reduction <add>, %213, %cst_77 [0] : vector<8x64xf32> to vector<64xf32>
      %215 = vector.shape_cast %214 : vector<64xf32> to vector<1x64xf32>
      %216 = vector.extract_strided_slice %125 {offsets = [7, 0, 0], sizes = [1, 8, 64], strides = [1, 1, 1]} : vector<8x8x64xf32> to vector<1x8x64xf32>
      %217 = vector.shape_cast %216 : vector<1x8x64xf32> to vector<8x64xf32>
      %218 = arith.mulf %217, %209 : vector<8x64xf32>
      %219 = vector.extract_strided_slice %130 {offsets = [7, 0, 0], sizes = [1, 8, 64], strides = [1, 1, 1]} : vector<8x8x64xf32> to vector<1x8x64xf32>
      %220 = vector.shape_cast %219 : vector<1x8x64xf32> to vector<8x64xf32>
      %221 = arith.addf %218, %220 : vector<8x64xf32>
      %222 = vector.extract_strided_slice %131 {offsets = [7, 0, 0], sizes = [1, 8, 1], strides = [1, 1, 1]} : vector<8x8x1xf32> to vector<1x8x1xf32>
      %223 = vector.shape_cast %222 : vector<1x8x1xf32> to vector<8x1xf32>
      %224 = vector.broadcast %223 : vector<8x1xf32> to vector<8x64xf32>
      %225 = arith.mulf %221, %224 : vector<8x64xf32>
      %cst_78 = arith.constant dense<0.000000e+00> : vector<64xf32>
      %226 = vector.multi_reduction <add>, %225, %cst_78 [0] : vector<8x64xf32> to vector<64xf32>
      %227 = vector.shape_cast %226 : vector<64xf32> to vector<1x64xf32>
      %228 = tpu.concatenate %143, %155, %167, %179, %191, %203, %215, %227 in 0 : vector<1x64xf32>, vector<1x64xf32>, vector<1x64xf32>, vector<1x64xf32>, vector<1x64xf32>, vector<1x64xf32>, vector<1x64xf32>, vector<1x64xf32> -> vector<8x64xf32>
      %229 = vector.broadcast %96 : vector<1x64xf32> to vector<8x64xf32>
      %230 = arith.mulf %110, %229 : vector<8x64xf32>
      %231 = arith.addf %228, %230 : vector<8x64xf32>
      %232 = arith.negf %118 : vector<8x64xf32>
      %233 = math.exp %232 : vector<8x64xf32>
      %cst_79 = arith.constant 1.000000e+00 : f32
      %234 = vector.broadcast %cst_79 : f32 to vector<8x64xf32>
      %235 = arith.addf %234, %233 : vector<8x64xf32>
      %236 = arith.divf %234, %235 : vector<8x64xf32>
      %237 = arith.mulf %118, %236 : vector<8x64xf32>
      %238 = arith.mulf %231, %237 : vector<8x64xf32>
      %239 = arith.index_cast %108 : i32 to index
      %c0_80 = arith.constant 0 : index
      %240 = vector.load %arg22[%239, %c0_80] : memref<16x64xf32, #tpu.memory_space<vmem>>, vector<8x64xf32>
      tpu.vector_store %arg22[%239, %c0_80], %238 {strides = array<i32>} : memref<16x64xf32, #tpu.memory_space<vmem>>, vector<8x64xf32>,
      scf.yield %221 : vector<8x64xf32>
    }
    %c2_i32_57 = arith.constant 2 : i32
    %c0_58 = arith.constant 0 : index
    %c0_59 = arith.constant 0 : index
    %100 = vector.load %arg22[%c0_58, %c0_59] : memref<16x64xf32, #tpu.memory_space<vmem>>, vector<16x64xf32>
    %101 = arith.truncf %100 : vector<16x64xf32> to vector<16x64xbf16>
    %c0_60 = arith.constant 0 : index
    %c0_61 = arith.constant 0 : index
    %102 = vector.load %arg14[%c0_60, %c0_61] : memref<64x32xbf16, #tpu.memory_space<vmem>>, vector<64x32xbf16>
    %cst_62 = arith.constant dense<0.000000e+00> : vector<16x32xf32>
    %103 = tpu.matmul %101, %102, %cst_62 {dimension_numbers = #tpu.dot_dimension_numbers<[1], [0], [0], [1], [0, 0, 1, 1], [], []>} : vector<16x64xbf16>, vector<64x32xbf16>, vector<16x32xf32> -> vector<16x32xf32>
    %c0_63 = arith.constant 0 : index
    %c0_64 = arith.constant 0 : index
    %c0_65 = arith.constant 0 : index
    %104 = vector.load %arg15[%c0_63, %c0_64, %c0_65] : memref<1x16x32xf32, #tpu.memory_space<vmem>>, vector<1x16x32xf32>
    %105 = vector.shape_cast %104 : vector<1x16x32xf32> to vector<16x32xf32>
    %106 = vector.shape_cast %103 : vector<16x32xf32> to vector<1x16x32xf32>
    tpu.vector_store %arg15[%c0_63, %c0_64, %c0_65], %106 {strides = array<i32>} : memref<1x16x32xf32, #tpu.memory_space<vmem>>, vector<1x16x32xf32>,
    return
  }
  func.func @transform_0(%arg0: i32) -> (i32, i32, i32) {
    %c0_i32 = arith.constant 0 : i32
    %c0_i32_0 = arith.constant 0 : i32
    %c0_i32_1 = arith.constant 0 : i32
    return %arg0, %c0_i32, %c0_i32_0 : i32, i32, i32
  }
  func.func @transform_1(%arg0: i32) -> (i32, i32) {
    %c0_i32 = arith.constant 0 : i32
    %c0_i32_0 = arith.constant 0 : i32
    %c0_i32_1 = arith.constant 0 : i32
    return %c0_i32, %c0_i32_0 : i32, i32
  }
  func.func @transform_2(%arg0: i32) -> (i32, i32) {
    %c0_i32 = arith.constant 0 : i32
    %c0_i32_0 = arith.constant 0 : i32
    %c0_i32_1 = arith.constant 0 : i32
    return %c0_i32, %c0_i32_0 : i32, i32
  }
  func.func @transform_3(%arg0: i32) -> (i32, i32) {
    %c0_i32 = arith.constant 0 : i32
    %c0_i32_0 = arith.constant 0 : i32
    %c0_i32_1 = arith.constant 0 : i32
    return %c0_i32, %c0_i32_0 : i32, i32
  }
  func.func @transform_4(%arg0: i32) -> (i32, i32) {
    %c0_i32 = arith.constant 0 : i32
    %c0_i32_0 = arith.constant 0 : i32
    %c0_i32_1 = arith.constant 0 : i32
    return %c0_i32, %c0_i32_0 : i32, i32
  }
  func.func @transform_5(%arg0: i32) -> (i32, i32) {
    %c0_i32 = arith.constant 0 : i32
    %c0_i32_0 = arith.constant 0 : i32
    %c0_i32_1 = arith.constant 0 : i32
    return %c0_i32, %c0_i32_0 : i32, i32
  }
  func.func @transform_6(%arg0: i32) -> (i32, i32) {
    %c0_i32 = arith.constant 0 : i32
    %c0_i32_0 = arith.constant 0 : i32
    %c0_i32_1 = arith.constant 0 : i32
    return %c0_i32, %c0_i32_0 : i32, i32
  }
  func.func @transform_7(%arg0: i32) -> (i32, i32) {
    %c0_i32 = arith.constant 0 : i32
    %c0_i32_0 = arith.constant 0 : i32
    %c0_i32_1 = arith.constant 0 : i32
    return %c0_i32, %c0_i32_0 : i32, i32
  }
  func.func @transform_8(%arg0: i32) -> (i32, i32) {
    %c0_i32 = arith.constant 0 : i32
    %c0_i32_0 = arith.constant 0 : i32
    %c0_i32_1 = arith.constant 0 : i32
    return %c0_i32, %c0_i32_0 : i32, i32
  }
  func.func @transform_9(%arg0: i32) -> (i32, i32) {
    %c0_i32 = arith.constant 0 : i32
    %c0_i32_0 = arith.constant 0 : i32
    %c0_i32_1 = arith.constant 0 : i32
    return %c0_i32, %c0_i32_0 : i32, i32
  }
  func.func @transform_10(%arg0: i32) -> (i32, i32) {
    %c0_i32 = arith.constant 0 : i32
    %c0_i32_0 = arith.constant 0 : i32
    %c0_i32_1 = arith.constant 0 : i32
    return %c0_i32, %c0_i32_0 : i32, i32
  }
  func.func @transform_11(%arg0: i32) -> (i32, i32) {
    %c0_i32 = arith.constant 0 : i32
    %c0_i32_0 = arith.constant 0 : i32
    %c0_i32_1 = arith.constant 0 : i32
    return %c0_i32, %c0_i32_0 : i32, i32
  }
  func.func @transform_12(%arg0: i32) -> (i32, i32) {
    %c0_i32 = arith.constant 0 : i32
    %c0_i32_0 = arith.constant 0 : i32
    %c0_i32_1 = arith.constant 0 : i32
    return %c0_i32, %c0_i32_0 : i32, i32
  }
  func.func @transform_13(%arg0: i32) -> (i32, i32) {
    %c0_i32 = arith.constant 0 : i32
    %c0_i32_0 = arith.constant 0 : i32
    %c0_i32_1 = arith.constant 0 : i32
    return %c0_i32, %c0_i32_0 : i32, i32
  }
  func.func @transform_14(%arg0: i32) -> (i32, i32, i32) {
    %c0_i32 = arith.constant 0 : i32
    %c0_i32_0 = arith.constant 0 : i32
    %c0_i32_1 = arith.constant 0 : i32
    return %arg0, %c0_i32, %c0_i32_0 : i32, i32, i32
  }
  func.func @transform_15(%arg0: i32) -> (i32, i32, i32) {
    %c0_i32 = arith.constant 0 : i32
    %c0_i32_0 = arith.constant 0 : i32
    %c0_i32_1 = arith.constant 0 : i32
    return %arg0, %c0_i32, %c0_i32_0 : i32, i32, i32
  }
}

module attributes {stable_mosaic.version = 11 : i64} {
  func.func @_fused_block_kernel(%arg0: i32, %arg1: memref<1x16x32xf32, #tpu.memory_space<vmem>>, %arg2: memref<1x16x32xf32, #tpu.memory_space<vmem>>, %arg3: memref<1x32xf32, #tpu.memory_space<vmem>>, %arg4: memref<1x32xf32, #tpu.memory_space<vmem>>, %arg5: memref<32x64xbf16, #tpu.memory_space<vmem>>, %arg6: memref<32x64xbf16, #tpu.memory_space<vmem>>, %arg7: memref<4x64xf32, #tpu.memory_space<vmem>>, %arg8: memref<1x64xf32, #tpu.memory_space<vmem>>, %arg9: memref<64x8xbf16, #tpu.memory_space<vmem>>, %arg10: memref<64x8xbf16, #tpu.memory_space<vmem>>, %arg11: memref<64x64xbf16, #tpu.memory_space<vmem>>, %arg12: memref<1x64xf32, #tpu.memory_space<vmem>>, %arg13: memref<8x64xf32, #tpu.memory_space<vmem>>, %arg14: memref<1x64xf32, #tpu.memory_space<vmem>>, %arg15: memref<64x32xbf16, #tpu.memory_space<vmem>>, %arg16: memref<1x16x32xf32, #tpu.memory_space<vmem>>, %arg17: memref<1x16x32xf32, #tpu.memory_space<vmem>>, %arg18: memref<16x64xf32, #tpu.memory_space<vmem>>, %arg19: memref<16x64xf32, #tpu.memory_space<vmem>>, %arg20: memref<16x64xf32, #tpu.memory_space<vmem>>, %arg21: memref<16x8xf32, #tpu.memory_space<vmem>>, %arg22: memref<16x8xf32, #tpu.memory_space<vmem>>, %arg23: memref<16x64xf32, #tpu.memory_space<vmem>>) attributes {dimension_semantics = [#tpu.dimension_semantics<parallel>], iteration_bounds = array<i64: 2>, scalar_prefetch = 0 : i64, scratch_operands = 6 : i64, tpu.core_type = #tpu.core_type<tc>, window_params = [{transform_indices = @transform_0, window_bounds = array<i64: 1, 16, 32>}, {transform_indices = @transform_1, window_bounds = array<i64: 1, 16, 32>}, {pipeline_mode = #tpu.pipeline_mode<synchronous>, transform_indices = @transform_2, window_bounds = array<i64: 1, 32>}, {pipeline_mode = #tpu.pipeline_mode<synchronous>, transform_indices = @transform_3, window_bounds = array<i64: 1, 32>}, {pipeline_mode = #tpu.pipeline_mode<synchronous>, transform_indices = @transform_4, window_bounds = array<i64: 32, 64>}, {pipeline_mode = #tpu.pipeline_mode<synchronous>, transform_indices = @transform_5, window_bounds = array<i64: 32, 64>}, {pipeline_mode = #tpu.pipeline_mode<synchronous>, transform_indices = @transform_6, window_bounds = array<i64: 4, 64>}, {pipeline_mode = #tpu.pipeline_mode<synchronous>, transform_indices = @transform_7, window_bounds = array<i64: 1, 64>}, {pipeline_mode = #tpu.pipeline_mode<synchronous>, transform_indices = @transform_8, window_bounds = array<i64: 64, 8>}, {pipeline_mode = #tpu.pipeline_mode<synchronous>, transform_indices = @transform_9, window_bounds = array<i64: 64, 8>}, {pipeline_mode = #tpu.pipeline_mode<synchronous>, transform_indices = @transform_10, window_bounds = array<i64: 64, 64>}, {pipeline_mode = #tpu.pipeline_mode<synchronous>, transform_indices = @transform_11, window_bounds = array<i64: 1, 64>}, {pipeline_mode = #tpu.pipeline_mode<synchronous>, transform_indices = @transform_12, window_bounds = array<i64: 8, 64>}, {pipeline_mode = #tpu.pipeline_mode<synchronous>, transform_indices = @transform_13, window_bounds = array<i64: 1, 64>}, {pipeline_mode = #tpu.pipeline_mode<synchronous>, transform_indices = @transform_14, window_bounds = array<i64: 64, 32>}, {transform_indices = @transform_15, window_bounds = array<i64: 1, 16, 32>}, {transform_indices = @transform_16, window_bounds = array<i64: 1, 16, 32>}]} {
    %c0 = arith.constant 0 : index
    %c0_0 = arith.constant 0 : index
    %c0_1 = arith.constant 0 : index
    %0 = vector.load %arg1[%c0, %c0_0, %c0_1] : memref<1x16x32xf32, #tpu.memory_space<vmem>>, vector<1x16x32xf32>
    %1 = vector.shape_cast %0 : vector<1x16x32xf32> to vector<16x32xf32>
    %c0_2 = arith.constant 0 : index
    %c0_3 = arith.constant 0 : index
    %c0_4 = arith.constant 0 : index
    %2 = vector.load %arg2[%c0_2, %c0_3, %c0_4] : memref<1x16x32xf32, #tpu.memory_space<vmem>>, vector<1x16x32xf32>
    %3 = vector.shape_cast %2 : vector<1x16x32xf32> to vector<16x32xf32>
    %4 = arith.addf %1, %3 : vector<16x32xf32>
    %c0_5 = arith.constant 0 : index
    %c0_6 = arith.constant 0 : index
    %c0_7 = arith.constant 0 : index
    %5 = vector.load %arg17[%c0_5, %c0_6, %c0_7] : memref<1x16x32xf32, #tpu.memory_space<vmem>>, vector<1x16x32xf32>
    %6 = vector.shape_cast %5 : vector<1x16x32xf32> to vector<16x32xf32>
    %7 = vector.shape_cast %4 : vector<16x32xf32> to vector<1x16x32xf32>
    tpu.vector_store %arg17[%c0_5, %c0_6, %c0_7], %7 {strides = array<i32>} : memref<1x16x32xf32, #tpu.memory_space<vmem>>, vector<1x16x32xf32>,
    %cst = arith.constant dense<0.000000e+00> : vector<16xf32>
    %8 = vector.multi_reduction <add>, %4, %cst [1] : vector<16x32xf32> to vector<16xf32>
    %9 = vector.shape_cast %8 : vector<16xf32> to vector<16x1xf32>
    %cst_8 = arith.constant 3.200000e+01 : f32
    %10 = vector.broadcast %cst_8 : f32 to vector<16x1xf32>
    %11 = arith.divf %9, %10 : vector<16x1xf32>
    %12 = vector.broadcast %11 : vector<16x1xf32> to vector<16x32xf32>
    %13 = arith.subf %4, %12 : vector<16x32xf32>
    %14 = arith.mulf %13, %13 : vector<16x32xf32>
    %cst_9 = arith.constant dense<0.000000e+00> : vector<16xf32>
    %15 = vector.multi_reduction <add>, %14, %cst_9 [1] : vector<16x32xf32> to vector<16xf32>
    %16 = vector.shape_cast %15 : vector<16xf32> to vector<16x1xf32>
    %cst_10 = arith.constant 3.200000e+01 : f32
    %17 = vector.broadcast %cst_10 : f32 to vector<16x1xf32>
    %18 = arith.divf %16, %17 : vector<16x1xf32>
    %19 = vector.broadcast %11 : vector<16x1xf32> to vector<16x32xf32>
    %20 = arith.subf %4, %19 : vector<16x32xf32>
    %cst_11 = arith.constant 9.99999974E-6 : f32
    %21 = vector.broadcast %cst_11 : f32 to vector<16x1xf32>
    %22 = arith.addf %18, %21 : vector<16x1xf32>
    %23 = math.rsqrt %22 : vector<16x1xf32>
    %24 = vector.broadcast %23 : vector<16x1xf32> to vector<16x32xf32>
    %25 = arith.mulf %20, %24 : vector<16x32xf32>
    %c0_12 = arith.constant 0 : index
    %c0_13 = arith.constant 0 : index
    %26 = vector.load %arg3[%c0_12, %c0_13] : memref<1x32xf32, #tpu.memory_space<vmem>>, vector<1x32xf32>
    %27 = vector.broadcast %26 : vector<1x32xf32> to vector<16x32xf32>
    %28 = arith.mulf %25, %27 : vector<16x32xf32>
    %c0_14 = arith.constant 0 : index
    %c0_15 = arith.constant 0 : index
    %29 = vector.load %arg4[%c0_14, %c0_15] : memref<1x32xf32, #tpu.memory_space<vmem>>, vector<1x32xf32>
    %30 = vector.broadcast %29 : vector<1x32xf32> to vector<16x32xf32>
    %31 = arith.addf %28, %30 : vector<16x32xf32>
    %32 = arith.truncf %31 : vector<16x32xf32> to vector<16x32xbf16>
    %c0_16 = arith.constant 0 : index
    %c0_17 = arith.constant 0 : index
    %33 = vector.load %arg5[%c0_16, %c0_17] : memref<32x64xbf16, #tpu.memory_space<vmem>>, vector<32x64xbf16>
    %cst_18 = arith.constant dense<0.000000e+00> : vector<16x64xf32>
    %34 = tpu.matmul %32, %33, %cst_18 {dimension_numbers = #tpu.dot_dimension_numbers<[1], [0], [0], [1], [0, 0, 1, 1], [], []>} : vector<16x32xbf16>, vector<32x64xbf16>, vector<16x64xf32> -> vector<16x64xf32>
    %c0_19 = arith.constant 0 : index
    %c0_20 = arith.constant 0 : index
    %35 = vector.load %arg6[%c0_19, %c0_20] : memref<32x64xbf16, #tpu.memory_space<vmem>>, vector<32x64xbf16>
    %cst_21 = arith.constant dense<0.000000e+00> : vector<16x64xf32>
    %36 = tpu.matmul %32, %35, %cst_21 {dimension_numbers = #tpu.dot_dimension_numbers<[1], [0], [0], [1], [0, 0, 1, 1], [], []>} : vector<16x32xbf16>, vector<32x64xbf16>, vector<16x64xf32> -> vector<16x64xf32>
    %c0_22 = arith.constant 0 : index
    %c0_23 = arith.constant 0 : index
    %37 = vector.load %arg20[%c0_22, %c0_23] : memref<16x64xf32, #tpu.memory_space<vmem>>, vector<16x64xf32>
    tpu.vector_store %arg20[%c0_22, %c0_23], %36 {strides = array<i32>} : memref<16x64xf32, #tpu.memory_space<vmem>>, vector<16x64xf32>,
    %cst_24 = arith.constant 0.000000e+00 : f32
    %38 = vector.broadcast %cst_24 : f32 to vector<3x64xf32>
    %39 = tpu.concatenate %38, %34 in 0 : vector<3x64xf32>, vector<16x64xf32> -> vector<19x64xf32>
    %cst_25 = arith.constant 0.000000e+00 : f32
    %40 = vector.broadcast %cst_25 : f32 to vector<16x64xf32>
    %41 = vector.extract_strided_slice %39 {offsets = [0, 0], sizes = [16, 64], strides = [1, 1]} : vector<19x64xf32> to vector<16x64xf32>
    %c0_26 = arith.constant 0 : index
    %c0_27 = arith.constant 0 : index
    %42 = vector.load %arg7[%c0_26, %c0_27] : memref<4x64xf32, #tpu.memory_space<vmem>>, vector<1x64xf32>
    %43 = vector.broadcast %42 : vector<1x64xf32> to vector<16x64xf32>
    %44 = arith.mulf %41, %43 : vector<16x64xf32>
    %45 = arith.addf %40, %44 : vector<16x64xf32>
    %46 = vector.extract_strided_slice %39 {offsets = [1, 0], sizes = [16, 64], strides = [1, 1]} : vector<19x64xf32> to vector<16x64xf32>
    %c1 = arith.constant 1 : index
    %c0_28 = arith.constant 0 : index
    %47 = vector.load %arg7[%c1, %c0_28] : memref<4x64xf32, #tpu.memory_space<vmem>>, vector<1x64xf32>
    %48 = vector.broadcast %47 : vector<1x64xf32> to vector<16x64xf32>
    %49 = arith.mulf %46, %48 : vector<16x64xf32>
    %50 = arith.addf %45, %49 : vector<16x64xf32>
    %51 = vector.extract_strided_slice %39 {offsets = [2, 0], sizes = [16, 64], strides = [1, 1]} : vector<19x64xf32> to vector<16x64xf32>
    %c2 = arith.constant 2 : index
    %c0_29 = arith.constant 0 : index
    %52 = vector.load %arg7[%c2, %c0_29] : memref<4x64xf32, #tpu.memory_space<vmem>>, vector<1x64xf32>
    %53 = vector.broadcast %52 : vector<1x64xf32> to vector<16x64xf32>
    %54 = arith.mulf %51, %53 : vector<16x64xf32>
    %55 = arith.addf %50, %54 : vector<16x64xf32>
    %56 = vector.extract_strided_slice %39 {offsets = [3, 0], sizes = [16, 64], strides = [1, 1]} : vector<19x64xf32> to vector<16x64xf32>
    %c3 = arith.constant 3 : index
    %c0_30 = arith.constant 0 : index
    %57 = vector.load %arg7[%c3, %c0_30] : memref<4x64xf32, #tpu.memory_space<vmem>>, vector<1x64xf32>
    %58 = vector.broadcast %57 : vector<1x64xf32> to vector<16x64xf32>
    %59 = arith.mulf %56, %58 : vector<16x64xf32>
    %60 = arith.addf %55, %59 : vector<16x64xf32>
    %c0_31 = arith.constant 0 : index
    %c0_32 = arith.constant 0 : index
    %61 = vector.load %arg8[%c0_31, %c0_32] : memref<1x64xf32, #tpu.memory_space<vmem>>, vector<1x64xf32>
    %62 = vector.broadcast %61 : vector<1x64xf32> to vector<16x64xf32>
    %63 = arith.addf %60, %62 : vector<16x64xf32>
    %64 = arith.negf %63 : vector<16x64xf32>
    %65 = math.exp %64 : vector<16x64xf32>
    %cst_33 = arith.constant 1.000000e+00 : f32
    %66 = vector.broadcast %cst_33 : f32 to vector<16x64xf32>
    %67 = arith.addf %66, %65 : vector<16x64xf32>
    %68 = arith.divf %66, %67 : vector<16x64xf32>
    %69 = arith.mulf %63, %68 : vector<16x64xf32>
    %c0_34 = arith.constant 0 : index
    %c0_35 = arith.constant 0 : index
    %70 = vector.load %arg18[%c0_34, %c0_35] : memref<16x64xf32, #tpu.memory_space<vmem>>, vector<16x64xf32>
    tpu.vector_store %arg18[%c0_34, %c0_35], %69 {strides = array<i32>} : memref<16x64xf32, #tpu.memory_space<vmem>>, vector<16x64xf32>,
    %71 = arith.truncf %69 : vector<16x64xf32> to vector<16x64xbf16>
    %c0_36 = arith.constant 0 : index
    %c0_37 = arith.constant 0 : index
    %72 = vector.load %arg9[%c0_36, %c0_37] : memref<64x8xbf16, #tpu.memory_space<vmem>>, vector<64x8xbf16>
    %cst_38 = arith.constant dense<0.000000e+00> : vector<16x8xf32>
    %73 = tpu.matmul %71, %72, %cst_38 {dimension_numbers = #tpu.dot_dimension_numbers<[1], [0], [0], [1], [0, 0, 1, 1], [], []>} : vector<16x64xbf16>, vector<64x8xbf16>, vector<16x8xf32> -> vector<16x8xf32>
    %c0_39 = arith.constant 0 : index
    %c0_40 = arith.constant 0 : index
    %74 = vector.load %arg21[%c0_39, %c0_40] : memref<16x8xf32, #tpu.memory_space<vmem>>, vector<16x8xf32>
    tpu.vector_store %arg21[%c0_39, %c0_40], %73 {strides = array<i32>} : memref<16x8xf32, #tpu.memory_space<vmem>>, vector<16x8xf32>,
    %c0_41 = arith.constant 0 : index
    %c0_42 = arith.constant 0 : index
    %75 = vector.load %arg10[%c0_41, %c0_42] : memref<64x8xbf16, #tpu.memory_space<vmem>>, vector<64x8xbf16>
    %cst_43 = arith.constant dense<0.000000e+00> : vector<16x8xf32>
    %76 = tpu.matmul %71, %75, %cst_43 {dimension_numbers = #tpu.dot_dimension_numbers<[1], [0], [0], [1], [0, 0, 1, 1], [], []>} : vector<16x64xbf16>, vector<64x8xbf16>, vector<16x8xf32> -> vector<16x8xf32>
    %c0_44 = arith.constant 0 : index
    %c0_45 = arith.constant 0 : index
    %77 = vector.load %arg22[%c0_44, %c0_45] : memref<16x8xf32, #tpu.memory_space<vmem>>, vector<16x8xf32>
    tpu.vector_store %arg22[%c0_44, %c0_45], %76 {strides = array<i32>} : memref<16x8xf32, #tpu.memory_space<vmem>>, vector<16x8xf32>,
    %c0_46 = arith.constant 0 : index
    %c0_47 = arith.constant 0 : index
    %78 = vector.load %arg11[%c0_46, %c0_47] : memref<64x64xbf16, #tpu.memory_space<vmem>>, vector<64x64xbf16>
    %cst_48 = arith.constant dense<0.000000e+00> : vector<16x64xf32>
    %79 = tpu.matmul %71, %78, %cst_48 {dimension_numbers = #tpu.dot_dimension_numbers<[1], [0], [0], [1], [0, 0, 1, 1], [], []>} : vector<16x64xbf16>, vector<64x64xbf16>, vector<16x64xf32> -> vector<16x64xf32>
    %c0_49 = arith.constant 0 : index
    %c0_50 = arith.constant 0 : index
    %80 = vector.load %arg12[%c0_49, %c0_50] : memref<1x64xf32, #tpu.memory_space<vmem>>, vector<1x64xf32>
    %81 = vector.broadcast %80 : vector<1x64xf32> to vector<16x64xf32>
    %82 = arith.addf %79, %81 : vector<16x64xf32>
    %cst_51 = arith.constant 0.000000e+00 : f32
    %83 = vector.broadcast %cst_51 : f32 to vector<16x64xf32>
    %84 = arith.maximumf %82, %83 : vector<16x64xf32>
    %85 = vector.broadcast %cst_51 : f32 to vector<16x64xf32>
    %86 = arith.subf %82, %85 : vector<16x64xf32>
    %87 = arith.cmpf one, %86, %86 : vector<16x64xf32>
    %88 = vector.broadcast %cst_51 : f32 to vector<16x64xf32>
    %89 = arith.addf %82, %88 : vector<16x64xf32>
    %90 = math.absf %86 : vector<16x64xf32>
    %cst_52 = arith.constant 0.000000e+00 : f32
    %91 = vector.broadcast %cst_52 : f32 to vector<16x64xf32>
    %92 = arith.subf %91, %90 : vector<16x64xf32>
    %93 = math.exp %92 : vector<16x64xf32>
    %94 = math.log1p %93 : vector<16x64xf32>
    %95 = arith.addf %84, %94 : vector<16x64xf32>
    %96 = arith.select %87, %89, %95 : vector<16x64xi1>, vector<16x64xf32>
    %c0_53 = arith.constant 0 : index
    %c0_54 = arith.constant 0 : index
    %97 = vector.load %arg19[%c0_53, %c0_54] : memref<16x64xf32, #tpu.memory_space<vmem>>, vector<16x64xf32>
    tpu.vector_store %arg19[%c0_53, %c0_54], %96 {strides = array<i32>} : memref<16x64xf32, #tpu.memory_space<vmem>>, vector<16x64xf32>,
    %c0_55 = arith.constant 0 : index
    %c0_56 = arith.constant 0 : index
    %98 = vector.load %arg13[%c0_55, %c0_56] : memref<8x64xf32, #tpu.memory_space<vmem>>, vector<8x64xf32>
    %c0_57 = arith.constant 0 : index
    %c0_58 = arith.constant 0 : index
    %99 = vector.load %arg14[%c0_57, %c0_58] : memref<1x64xf32, #tpu.memory_space<vmem>>, vector<1x64xf32>
    %cst_59 = arith.constant 0.000000e+00 : f32
    %100 = vector.broadcast %cst_59 : f32 to vector<8x64xf32>
    %c0_i32 = arith.constant 0 : i32
    %c2_i32 = arith.constant 2 : i32
    %101 = arith.addi %c0_i32, %c2_i32 : i32
    %c1_i32 = arith.constant 1 : i32
    %102 = scf.for %arg24 = %c0_i32 to %101 step %c1_i32 iter_args(%arg25 = %100) -> (vector<8x64xf32>)  : i32 {
      %c8_i32 = arith.constant 8 : i32
      %110 = arith.muli %arg24, %c8_i32 : i32
      %111 = tpu.assume_multiple %110, 8 : i32
      %112 = arith.index_cast %111 : i32 to index
      %c0_69 = arith.constant 0 : index
      %113 = vector.load %arg18[%112, %c0_69] : memref<16x64xf32, #tpu.memory_space<vmem>>, vector<8x64xf32>
      %114 = arith.index_cast %111 : i32 to index
      %c0_70 = arith.constant 0 : index
      %115 = vector.load %arg19[%114, %c0_70] : memref<16x64xf32, #tpu.memory_space<vmem>>, vector<8x64xf32>
      %116 = arith.index_cast %111 : i32 to index
      %c0_71 = arith.constant 0 : index
      %117 = vector.load %arg21[%116, %c0_71] : memref<16x8xf32, #tpu.memory_space<vmem>>, vector<8x8xf32>
      %118 = arith.index_cast %111 : i32 to index
      %c0_72 = arith.constant 0 : index
      %119 = vector.load %arg22[%118, %c0_72] : memref<16x8xf32, #tpu.memory_space<vmem>>, vector<8x8xf32>
      %120 = arith.index_cast %111 : i32 to index
      %c0_73 = arith.constant 0 : index
      %121 = vector.load %arg20[%120, %c0_73] : memref<16x64xf32, #tpu.memory_space<vmem>>, vector<8x64xf32>
      %122 = arith.mulf %115, %113 : vector<8x64xf32>
      %123 = vector.shape_cast %115 : vector<8x64xf32> to vector<8x1x64xf32>
      %124 = vector.shape_cast %98 : vector<8x64xf32> to vector<1x8x64xf32>
      %125 = vector.broadcast %123 : vector<8x1x64xf32> to vector<8x8x64xf32>
      %126 = vector.broadcast %124 : vector<1x8x64xf32> to vector<8x8x64xf32>
      %127 = arith.mulf %125, %126 : vector<8x8x64xf32>
      %128 = math.exp %127 : vector<8x8x64xf32>
      %129 = vector.shape_cast %117 : vector<8x8xf32> to vector<8x8x1xf32>
      %130 = vector.shape_cast %122 : vector<8x64xf32> to vector<8x1x64xf32>
      %131 = vector.broadcast %129 : vector<8x8x1xf32> to vector<8x8x64xf32>
      %132 = vector.broadcast %130 : vector<8x1x64xf32> to vector<8x8x64xf32>
      %133 = arith.mulf %131, %132 : vector<8x8x64xf32>
      %134 = vector.shape_cast %119 : vector<8x8xf32> to vector<8x8x1xf32>
      %135 = vector.extract_strided_slice %128 {offsets = [0, 0, 0], sizes = [1, 8, 64], strides = [1, 1, 1]} : vector<8x8x64xf32> to vector<1x8x64xf32>
      %136 = vector.shape_cast %135 : vector<1x8x64xf32> to vector<8x64xf32>
      %137 = arith.mulf %136, %arg25 : vector<8x64xf32>
      %138 = vector.extract_strided_slice %133 {offsets = [0, 0, 0], sizes = [1, 8, 64], strides = [1, 1, 1]} : vector<8x8x64xf32> to vector<1x8x64xf32>
      %139 = vector.shape_cast %138 : vector<1x8x64xf32> to vector<8x64xf32>
      %140 = arith.addf %137, %139 : vector<8x64xf32>
      %141 = vector.extract_strided_slice %134 {offsets = [0, 0, 0], sizes = [1, 8, 1], strides = [1, 1, 1]} : vector<8x8x1xf32> to vector<1x8x1xf32>
      %142 = vector.shape_cast %141 : vector<1x8x1xf32> to vector<8x1xf32>
      %143 = vector.broadcast %142 : vector<8x1xf32> to vector<8x64xf32>
      %144 = arith.mulf %140, %143 : vector<8x64xf32>
      %cst_74 = arith.constant dense<0.000000e+00> : vector<64xf32>
      %145 = vector.multi_reduction <add>, %144, %cst_74 [0] : vector<8x64xf32> to vector<64xf32>
      %146 = vector.shape_cast %145 : vector<64xf32> to vector<1x64xf32>
      %147 = vector.extract_strided_slice %128 {offsets = [1, 0, 0], sizes = [1, 8, 64], strides = [1, 1, 1]} : vector<8x8x64xf32> to vector<1x8x64xf32>
      %148 = vector.shape_cast %147 : vector<1x8x64xf32> to vector<8x64xf32>
      %149 = arith.mulf %148, %140 : vector<8x64xf32>
      %150 = vector.extract_strided_slice %133 {offsets = [1, 0, 0], sizes = [1, 8, 64], strides = [1, 1, 1]} : vector<8x8x64xf32> to vector<1x8x64xf32>
      %151 = vector.shape_cast %150 : vector<1x8x64xf32> to vector<8x64xf32>
      %152 = arith.addf %149, %151 : vector<8x64xf32>
      %153 = vector.extract_strided_slice %134 {offsets = [1, 0, 0], sizes = [1, 8, 1], strides = [1, 1, 1]} : vector<8x8x1xf32> to vector<1x8x1xf32>
      %154 = vector.shape_cast %153 : vector<1x8x1xf32> to vector<8x1xf32>
      %155 = vector.broadcast %154 : vector<8x1xf32> to vector<8x64xf32>
      %156 = arith.mulf %152, %155 : vector<8x64xf32>
      %cst_75 = arith.constant dense<0.000000e+00> : vector<64xf32>
      %157 = vector.multi_reduction <add>, %156, %cst_75 [0] : vector<8x64xf32> to vector<64xf32>
      %158 = vector.shape_cast %157 : vector<64xf32> to vector<1x64xf32>
      %159 = vector.extract_strided_slice %128 {offsets = [2, 0, 0], sizes = [1, 8, 64], strides = [1, 1, 1]} : vector<8x8x64xf32> to vector<1x8x64xf32>
      %160 = vector.shape_cast %159 : vector<1x8x64xf32> to vector<8x64xf32>
      %161 = arith.mulf %160, %152 : vector<8x64xf32>
      %162 = vector.extract_strided_slice %133 {offsets = [2, 0, 0], sizes = [1, 8, 64], strides = [1, 1, 1]} : vector<8x8x64xf32> to vector<1x8x64xf32>
      %163 = vector.shape_cast %162 : vector<1x8x64xf32> to vector<8x64xf32>
      %164 = arith.addf %161, %163 : vector<8x64xf32>
      %165 = vector.extract_strided_slice %134 {offsets = [2, 0, 0], sizes = [1, 8, 1], strides = [1, 1, 1]} : vector<8x8x1xf32> to vector<1x8x1xf32>
      %166 = vector.shape_cast %165 : vector<1x8x1xf32> to vector<8x1xf32>
      %167 = vector.broadcast %166 : vector<8x1xf32> to vector<8x64xf32>
      %168 = arith.mulf %164, %167 : vector<8x64xf32>
      %cst_76 = arith.constant dense<0.000000e+00> : vector<64xf32>
      %169 = vector.multi_reduction <add>, %168, %cst_76 [0] : vector<8x64xf32> to vector<64xf32>
      %170 = vector.shape_cast %169 : vector<64xf32> to vector<1x64xf32>
      %171 = vector.extract_strided_slice %128 {offsets = [3, 0, 0], sizes = [1, 8, 64], strides = [1, 1, 1]} : vector<8x8x64xf32> to vector<1x8x64xf32>
      %172 = vector.shape_cast %171 : vector<1x8x64xf32> to vector<8x64xf32>
      %173 = arith.mulf %172, %164 : vector<8x64xf32>
      %174 = vector.extract_strided_slice %133 {offsets = [3, 0, 0], sizes = [1, 8, 64], strides = [1, 1, 1]} : vector<8x8x64xf32> to vector<1x8x64xf32>
      %175 = vector.shape_cast %174 : vector<1x8x64xf32> to vector<8x64xf32>
      %176 = arith.addf %173, %175 : vector<8x64xf32>
      %177 = vector.extract_strided_slice %134 {offsets = [3, 0, 0], sizes = [1, 8, 1], strides = [1, 1, 1]} : vector<8x8x1xf32> to vector<1x8x1xf32>
      %178 = vector.shape_cast %177 : vector<1x8x1xf32> to vector<8x1xf32>
      %179 = vector.broadcast %178 : vector<8x1xf32> to vector<8x64xf32>
      %180 = arith.mulf %176, %179 : vector<8x64xf32>
      %cst_77 = arith.constant dense<0.000000e+00> : vector<64xf32>
      %181 = vector.multi_reduction <add>, %180, %cst_77 [0] : vector<8x64xf32> to vector<64xf32>
      %182 = vector.shape_cast %181 : vector<64xf32> to vector<1x64xf32>
      %183 = vector.extract_strided_slice %128 {offsets = [4, 0, 0], sizes = [1, 8, 64], strides = [1, 1, 1]} : vector<8x8x64xf32> to vector<1x8x64xf32>
      %184 = vector.shape_cast %183 : vector<1x8x64xf32> to vector<8x64xf32>
      %185 = arith.mulf %184, %176 : vector<8x64xf32>
      %186 = vector.extract_strided_slice %133 {offsets = [4, 0, 0], sizes = [1, 8, 64], strides = [1, 1, 1]} : vector<8x8x64xf32> to vector<1x8x64xf32>
      %187 = vector.shape_cast %186 : vector<1x8x64xf32> to vector<8x64xf32>
      %188 = arith.addf %185, %187 : vector<8x64xf32>
      %189 = vector.extract_strided_slice %134 {offsets = [4, 0, 0], sizes = [1, 8, 1], strides = [1, 1, 1]} : vector<8x8x1xf32> to vector<1x8x1xf32>
      %190 = vector.shape_cast %189 : vector<1x8x1xf32> to vector<8x1xf32>
      %191 = vector.broadcast %190 : vector<8x1xf32> to vector<8x64xf32>
      %192 = arith.mulf %188, %191 : vector<8x64xf32>
      %cst_78 = arith.constant dense<0.000000e+00> : vector<64xf32>
      %193 = vector.multi_reduction <add>, %192, %cst_78 [0] : vector<8x64xf32> to vector<64xf32>
      %194 = vector.shape_cast %193 : vector<64xf32> to vector<1x64xf32>
      %195 = vector.extract_strided_slice %128 {offsets = [5, 0, 0], sizes = [1, 8, 64], strides = [1, 1, 1]} : vector<8x8x64xf32> to vector<1x8x64xf32>
      %196 = vector.shape_cast %195 : vector<1x8x64xf32> to vector<8x64xf32>
      %197 = arith.mulf %196, %188 : vector<8x64xf32>
      %198 = vector.extract_strided_slice %133 {offsets = [5, 0, 0], sizes = [1, 8, 64], strides = [1, 1, 1]} : vector<8x8x64xf32> to vector<1x8x64xf32>
      %199 = vector.shape_cast %198 : vector<1x8x64xf32> to vector<8x64xf32>
      %200 = arith.addf %197, %199 : vector<8x64xf32>
      %201 = vector.extract_strided_slice %134 {offsets = [5, 0, 0], sizes = [1, 8, 1], strides = [1, 1, 1]} : vector<8x8x1xf32> to vector<1x8x1xf32>
      %202 = vector.shape_cast %201 : vector<1x8x1xf32> to vector<8x1xf32>
      %203 = vector.broadcast %202 : vector<8x1xf32> to vector<8x64xf32>
      %204 = arith.mulf %200, %203 : vector<8x64xf32>
      %cst_79 = arith.constant dense<0.000000e+00> : vector<64xf32>
      %205 = vector.multi_reduction <add>, %204, %cst_79 [0] : vector<8x64xf32> to vector<64xf32>
      %206 = vector.shape_cast %205 : vector<64xf32> to vector<1x64xf32>
      %207 = vector.extract_strided_slice %128 {offsets = [6, 0, 0], sizes = [1, 8, 64], strides = [1, 1, 1]} : vector<8x8x64xf32> to vector<1x8x64xf32>
      %208 = vector.shape_cast %207 : vector<1x8x64xf32> to vector<8x64xf32>
      %209 = arith.mulf %208, %200 : vector<8x64xf32>
      %210 = vector.extract_strided_slice %133 {offsets = [6, 0, 0], sizes = [1, 8, 64], strides = [1, 1, 1]} : vector<8x8x64xf32> to vector<1x8x64xf32>
      %211 = vector.shape_cast %210 : vector<1x8x64xf32> to vector<8x64xf32>
      %212 = arith.addf %209, %211 : vector<8x64xf32>
      %213 = vector.extract_strided_slice %134 {offsets = [6, 0, 0], sizes = [1, 8, 1], strides = [1, 1, 1]} : vector<8x8x1xf32> to vector<1x8x1xf32>
      %214 = vector.shape_cast %213 : vector<1x8x1xf32> to vector<8x1xf32>
      %215 = vector.broadcast %214 : vector<8x1xf32> to vector<8x64xf32>
      %216 = arith.mulf %212, %215 : vector<8x64xf32>
      %cst_80 = arith.constant dense<0.000000e+00> : vector<64xf32>
      %217 = vector.multi_reduction <add>, %216, %cst_80 [0] : vector<8x64xf32> to vector<64xf32>
      %218 = vector.shape_cast %217 : vector<64xf32> to vector<1x64xf32>
      %219 = vector.extract_strided_slice %128 {offsets = [7, 0, 0], sizes = [1, 8, 64], strides = [1, 1, 1]} : vector<8x8x64xf32> to vector<1x8x64xf32>
      %220 = vector.shape_cast %219 : vector<1x8x64xf32> to vector<8x64xf32>
      %221 = arith.mulf %220, %212 : vector<8x64xf32>
      %222 = vector.extract_strided_slice %133 {offsets = [7, 0, 0], sizes = [1, 8, 64], strides = [1, 1, 1]} : vector<8x8x64xf32> to vector<1x8x64xf32>
      %223 = vector.shape_cast %222 : vector<1x8x64xf32> to vector<8x64xf32>
      %224 = arith.addf %221, %223 : vector<8x64xf32>
      %225 = vector.extract_strided_slice %134 {offsets = [7, 0, 0], sizes = [1, 8, 1], strides = [1, 1, 1]} : vector<8x8x1xf32> to vector<1x8x1xf32>
      %226 = vector.shape_cast %225 : vector<1x8x1xf32> to vector<8x1xf32>
      %227 = vector.broadcast %226 : vector<8x1xf32> to vector<8x64xf32>
      %228 = arith.mulf %224, %227 : vector<8x64xf32>
      %cst_81 = arith.constant dense<0.000000e+00> : vector<64xf32>
      %229 = vector.multi_reduction <add>, %228, %cst_81 [0] : vector<8x64xf32> to vector<64xf32>
      %230 = vector.shape_cast %229 : vector<64xf32> to vector<1x64xf32>
      %231 = tpu.concatenate %146, %158, %170, %182, %194, %206, %218, %230 in 0 : vector<1x64xf32>, vector<1x64xf32>, vector<1x64xf32>, vector<1x64xf32>, vector<1x64xf32>, vector<1x64xf32>, vector<1x64xf32>, vector<1x64xf32> -> vector<8x64xf32>
      %232 = vector.broadcast %99 : vector<1x64xf32> to vector<8x64xf32>
      %233 = arith.mulf %113, %232 : vector<8x64xf32>
      %234 = arith.addf %231, %233 : vector<8x64xf32>
      %235 = arith.negf %121 : vector<8x64xf32>
      %236 = math.exp %235 : vector<8x64xf32>
      %cst_82 = arith.constant 1.000000e+00 : f32
      %237 = vector.broadcast %cst_82 : f32 to vector<8x64xf32>
      %238 = arith.addf %237, %236 : vector<8x64xf32>
      %239 = arith.divf %237, %238 : vector<8x64xf32>
      %240 = arith.mulf %121, %239 : vector<8x64xf32>
      %241 = arith.mulf %234, %240 : vector<8x64xf32>
      %242 = arith.index_cast %111 : i32 to index
      %c0_83 = arith.constant 0 : index
      %243 = vector.load %arg23[%242, %c0_83] : memref<16x64xf32, #tpu.memory_space<vmem>>, vector<8x64xf32>
      tpu.vector_store %arg23[%242, %c0_83], %241 {strides = array<i32>} : memref<16x64xf32, #tpu.memory_space<vmem>>, vector<8x64xf32>,
      scf.yield %224 : vector<8x64xf32>
    }
    %c2_i32_60 = arith.constant 2 : i32
    %c0_61 = arith.constant 0 : index
    %c0_62 = arith.constant 0 : index
    %103 = vector.load %arg23[%c0_61, %c0_62] : memref<16x64xf32, #tpu.memory_space<vmem>>, vector<16x64xf32>
    %104 = arith.truncf %103 : vector<16x64xf32> to vector<16x64xbf16>
    %c0_63 = arith.constant 0 : index
    %c0_64 = arith.constant 0 : index
    %105 = vector.load %arg15[%c0_63, %c0_64] : memref<64x32xbf16, #tpu.memory_space<vmem>>, vector<64x32xbf16>
    %cst_65 = arith.constant dense<0.000000e+00> : vector<16x32xf32>
    %106 = tpu.matmul %104, %105, %cst_65 {dimension_numbers = #tpu.dot_dimension_numbers<[1], [0], [0], [1], [0, 0, 1, 1], [], []>} : vector<16x64xbf16>, vector<64x32xbf16>, vector<16x32xf32> -> vector<16x32xf32>
    %c0_66 = arith.constant 0 : index
    %c0_67 = arith.constant 0 : index
    %c0_68 = arith.constant 0 : index
    %107 = vector.load %arg16[%c0_66, %c0_67, %c0_68] : memref<1x16x32xf32, #tpu.memory_space<vmem>>, vector<1x16x32xf32>
    %108 = vector.shape_cast %107 : vector<1x16x32xf32> to vector<16x32xf32>
    %109 = vector.shape_cast %106 : vector<16x32xf32> to vector<1x16x32xf32>
    tpu.vector_store %arg16[%c0_66, %c0_67, %c0_68], %109 {strides = array<i32>} : memref<1x16x32xf32, #tpu.memory_space<vmem>>, vector<1x16x32xf32>,
    return
  }
  func.func @transform_0(%arg0: i32) -> (i32, i32, i32) {
    %c0_i32 = arith.constant 0 : i32
    %c0_i32_0 = arith.constant 0 : i32
    %c0_i32_1 = arith.constant 0 : i32
    return %arg0, %c0_i32, %c0_i32_0 : i32, i32, i32
  }
  func.func @transform_1(%arg0: i32) -> (i32, i32, i32) {
    %c0_i32 = arith.constant 0 : i32
    %c0_i32_0 = arith.constant 0 : i32
    %c0_i32_1 = arith.constant 0 : i32
    return %arg0, %c0_i32, %c0_i32_0 : i32, i32, i32
  }
  func.func @transform_2(%arg0: i32) -> (i32, i32) {
    %c0_i32 = arith.constant 0 : i32
    %c0_i32_0 = arith.constant 0 : i32
    %c0_i32_1 = arith.constant 0 : i32
    return %c0_i32, %c0_i32_0 : i32, i32
  }
  func.func @transform_3(%arg0: i32) -> (i32, i32) {
    %c0_i32 = arith.constant 0 : i32
    %c0_i32_0 = arith.constant 0 : i32
    %c0_i32_1 = arith.constant 0 : i32
    return %c0_i32, %c0_i32_0 : i32, i32
  }
  func.func @transform_4(%arg0: i32) -> (i32, i32) {
    %c0_i32 = arith.constant 0 : i32
    %c0_i32_0 = arith.constant 0 : i32
    %c0_i32_1 = arith.constant 0 : i32
    return %c0_i32, %c0_i32_0 : i32, i32
  }
  func.func @transform_5(%arg0: i32) -> (i32, i32) {
    %c0_i32 = arith.constant 0 : i32
    %c0_i32_0 = arith.constant 0 : i32
    %c0_i32_1 = arith.constant 0 : i32
    return %c0_i32, %c0_i32_0 : i32, i32
  }
  func.func @transform_6(%arg0: i32) -> (i32, i32) {
    %c0_i32 = arith.constant 0 : i32
    %c0_i32_0 = arith.constant 0 : i32
    %c0_i32_1 = arith.constant 0 : i32
    return %c0_i32, %c0_i32_0 : i32, i32
  }
  func.func @transform_7(%arg0: i32) -> (i32, i32) {
    %c0_i32 = arith.constant 0 : i32
    %c0_i32_0 = arith.constant 0 : i32
    %c0_i32_1 = arith.constant 0 : i32
    return %c0_i32, %c0_i32_0 : i32, i32
  }
  func.func @transform_8(%arg0: i32) -> (i32, i32) {
    %c0_i32 = arith.constant 0 : i32
    %c0_i32_0 = arith.constant 0 : i32
    %c0_i32_1 = arith.constant 0 : i32
    return %c0_i32, %c0_i32_0 : i32, i32
  }
  func.func @transform_9(%arg0: i32) -> (i32, i32) {
    %c0_i32 = arith.constant 0 : i32
    %c0_i32_0 = arith.constant 0 : i32
    %c0_i32_1 = arith.constant 0 : i32
    return %c0_i32, %c0_i32_0 : i32, i32
  }
  func.func @transform_10(%arg0: i32) -> (i32, i32) {
    %c0_i32 = arith.constant 0 : i32
    %c0_i32_0 = arith.constant 0 : i32
    %c0_i32_1 = arith.constant 0 : i32
    return %c0_i32, %c0_i32_0 : i32, i32
  }
  func.func @transform_11(%arg0: i32) -> (i32, i32) {
    %c0_i32 = arith.constant 0 : i32
    %c0_i32_0 = arith.constant 0 : i32
    %c0_i32_1 = arith.constant 0 : i32
    return %c0_i32, %c0_i32_0 : i32, i32
  }
  func.func @transform_12(%arg0: i32) -> (i32, i32) {
    %c0_i32 = arith.constant 0 : i32
    %c0_i32_0 = arith.constant 0 : i32
    %c0_i32_1 = arith.constant 0 : i32
    return %c0_i32, %c0_i32_0 : i32, i32
  }
  func.func @transform_13(%arg0: i32) -> (i32, i32) {
    %c0_i32 = arith.constant 0 : i32
    %c0_i32_0 = arith.constant 0 : i32
    %c0_i32_1 = arith.constant 0 : i32
    return %c0_i32, %c0_i32_0 : i32, i32
  }
  func.func @transform_14(%arg0: i32) -> (i32, i32) {
    %c0_i32 = arith.constant 0 : i32
    %c0_i32_0 = arith.constant 0 : i32
    %c0_i32_1 = arith.constant 0 : i32
    return %c0_i32, %c0_i32_0 : i32, i32
  }
  func.func @transform_15(%arg0: i32) -> (i32, i32, i32) {
    %c0_i32 = arith.constant 0 : i32
    %c0_i32_0 = arith.constant 0 : i32
    %c0_i32_1 = arith.constant 0 : i32
    return %arg0, %c0_i32, %c0_i32_0 : i32, i32, i32
  }
  func.func @transform_16(%arg0: i32) -> (i32, i32, i32) {
    %c0_i32 = arith.constant 0 : i32
    %c0_i32_0 = arith.constant 0 : i32
    %c0_i32_1 = arith.constant 0 : i32
    return %arg0, %c0_i32, %c0_i32_0 : i32, i32, i32
  }
}

module attributes {stable_mosaic.version = 11 : i64} {
  func.func @_matmul_bias_kernel(%arg0: memref<2x32xf32, #tpu.memory_space<vmem>>, %arg1: memref<32x10xf32, #tpu.memory_space<vmem>>, %arg2: memref<1x10xf32, #tpu.memory_space<vmem>>, %arg3: memref<2x10xf32, #tpu.memory_space<vmem>>) attributes {dimension_semantics = [], scalar_prefetch = 0 : i64, scratch_operands = 0 : i64, tpu.core_type = #tpu.core_type<tc>} {
    %c0 = arith.constant 0 : index
    %c0_0 = arith.constant 0 : index
    %0 = vector.load %arg0[%c0, %c0_0] : memref<2x32xf32, #tpu.memory_space<vmem>>, vector<2x32xf32>
    %c0_1 = arith.constant 0 : index
    %c0_2 = arith.constant 0 : index
    %1 = vector.load %arg1[%c0_1, %c0_2] : memref<32x10xf32, #tpu.memory_space<vmem>>, vector<32x10xf32>
    %cst = arith.constant dense<0.000000e+00> : vector<2x10xf32>
    %2 = tpu.matmul %0, %1, %cst {dimension_numbers = #tpu.dot_dimension_numbers<[1], [0], [0], [1], [0, 0, 1, 1], [], []>} : vector<2x32xf32>, vector<32x10xf32>, vector<2x10xf32> -> vector<2x10xf32>
    %c0_3 = arith.constant 0 : index
    %c0_4 = arith.constant 0 : index
    %3 = vector.load %arg2[%c0_3, %c0_4] : memref<1x10xf32, #tpu.memory_space<vmem>>, vector<1x10xf32>
    %4 = vector.broadcast %3 : vector<1x10xf32> to vector<2x10xf32>
    %5 = arith.addf %2, %4 : vector<2x10xf32>
    %c0_5 = arith.constant 0 : index
    %c0_6 = arith.constant 0 : index
    %6 = vector.load %arg3[%c0_5, %c0_6] : memref<2x10xf32, #tpu.memory_space<vmem>>, vector<2x10xf32>
    tpu.vector_store %arg3[%c0_5, %c0_6], %5 {strides = array<i32>} : memref<2x10xf32, #tpu.memory_space<vmem>>, vector<2x10xf32>,
    return
  }
}

</mosaic_0001>

<bundles_post_ra>
// kernel: _lambda_.8
= control target key start
LH: loop header
LB: loop body
LE: loop exit
PB: predicated region body
PF: predicated region fallthrough
CT: control target
= control target key end

     0   :  { %s386_s15 = smov 0   ;;  %s415_s0 = inlined_call_operand.vmem [shape: f32[2,16,32], index: 0, kind: input, shape index: {}]   ;;  %s416_s1 = inlined_call_operand.vmem [shape: f32[2,16,32], index: 1, kind: input, shape index: {}]   ;;  %s417_s2 = inlined_call_operand.vmem [shape: f32[1,32], index: 2, kind: input, shape index: {}]   ;;  %s418_s3 = inlined_call_operand.vmem [shape: f32[1,32], index: 3, kind: input, shape index: {}]   ;;  %s419_s4 = inlined_call_operand.vmem [shape: f32[2,1,32], index: 4, kind: output, shape index: {}]  }
   0x1 LB: > { %s326_s16 = sadd.s32 4294967295, %s359_s15   ;;  %p330_p0 = scmp.ge.s32.totalorder %s359_s15, 1  ;;  %s359_s15 = sphi %s386_s15, %s14_s15  }
   0x2   : > { %p174_p1 = scmp.lt.s32.totalorder %s359_s15, 3 }
   0x4   : > { %p175_p2 = pnand %p330_p0, %p174_p1 }
   0x5   : > { %p205_p3 = scmp.lt.s32.totalorder (!%p175_p2), %s326_s16, 1  ;;  %vm223_vm0 = vcmask (!%p175_p2), 261127   ;;  %v337_v13 = vld [vmem:[%s417_s2] ss:$0 sm:$0xff] (!%p175_p2) }
   0x6   : > { %178 = sbr.rel (%p175_p2) target bundleno = 334 (0x14e), region = 36  ;;  %v338_v15 = vld [vmem:[%s418_s3] ss:$0 sm:$0xff] (!%p175_p2) }
   0xd   : > { %s421_s16 = smov (!%p205_p3, %s326_s16), 1 }
   0xe   : > { %s341_s17 = sshll.u32 %s421_s16, 4  ;;  %s219_s30 = scalar_lea.vmem %s419_s4, %s421_s16 }
   0xf   : > { %s291_s20 = scalar_lea.vmem %s415_s0, %s341_s17  ;;  %s295_s23 = scalar_lea.vmem %s416_s1, %s341_s17 }
  0x10   : > { %v335_v0 = vld [vmem:[%s291_s20 + $0x8] sm:$0xff] }
  0x11   : > { %v336_v1 = vld [vmem:[%s295_s23 + $0x8] sm:$0xff] }
  0x12   : > { %v222_v2 = vadd.f32 %v336_v1, %v335_v0 }
  0x14   : > { %v224_v3 = vsel %vm223_vm0, %v222_v2, 0.0 }
  0x15   : > { %225 = vadd.xlane.f32.xlu0 %v224_v3 }
  0xa2   : > { %v226_v4 = vpop.xlane.xlu0 %225 }
  0xa3   : > { %v228_v5 = vmul.f32 0.03125, %v226_v4 }
  0xa5   : > { %v229_v6 = vsub.f32 %v222_v2, %v228_v5 }
  0xa7   : > { %v230_v7 = vmul.f32 %v229_v6, %v229_v6 }
  0xa9   : > { %v231_v8 = vsel %vm223_vm0, %v230_v7, 0.0 }
  0xaa   : > { %232 = vadd.xlane.f32.xlu0 %v231_v8 }
 0x137   : > { %v233_v9 = vpop.xlane.xlu0 %232 }
 0x138   : > { %v234_v10 = vmul.f32 0.03125, %v233_v9 }
 0x13a   : > { %v235_v11 = vadd.f32 1e-05, %v234_v10 }
 0x13c   : > { %351 = vrsqrt.f32 %v235_v11 }
 0x146   : > { %v352_v12 = vpop.eup %351 }
 0x147   : > { %v237_v14 = vmul.f32 %v352_v12, %v229_v6 }
 0x149   : > { %v245_v16 = vmul.f32 %v337_v13, %v237_v14 }
 0x14b   : > { %v253_v17 = vadd.f32 %v338_v15, %v245_v16 }
 0x14d   : > { %254 = vst.msk [vmem:[%s219_s30 - $0x7] sm:$0x80] %vm223_vm0, %v253_v17 }
 0x14e PF: > { %s14_s15 = sadd.s32 1, %s359_s15  }
 0x14f   : > { %p11_p4 = scmp.ge.s32.totalorder %s14_s15, 4  }
 0x151   :  { %13 = sbr.rel (!%p11_p4) target bundleno = 1 (0x1), region = 69 }

// kernel: _lambda_.5
= control target key start
LH: loop header
LB: loop body
LE: loop exit
PB: predicated region body
PF: predicated region fallthrough
CT: control target
= control target key end

     0   :  { %vm31_vm0 = vcmask 392192   ;;  %vm129_vm1 = vcmask 261120   ;;  %s258_s1 = inlined_call_operand.vmem [shape: f32[48,32], index: 1, kind: input, shape index: {}]   ;;  %s259_s0 = inlined_call_operand.vmem [shape: f32[32,48], index: 0, kind: input, shape index: {}]   ;;  %s260_s2 = inlined_call_operand.vmem [shape: f32[1,32], index: 2, kind: input, shape index: {}]   ;;  %s261_s3 = inlined_call_operand.vmem [shape: f32[32,32], index: 3, kind: output, shape index: {}]  }
   0x1   :  { %v18_v0 = vld [vmem:[%s258_s1] sm:$0xff]  ;;  %v19_v1 = vld [vmem:[%s258_s1 + $0x8] sm:$0xff]  ;;  %v20_v2 = vld [vmem:[%s258_s1 + $0x10] sm:$0xff] }
   0x2   :  { %v171_v3 = vpack.c.bf16 %v19_v1, %v18_v0  ;;  %v21_v4 = vld [vmem:[%s258_s1 + $0x18] sm:$0xff]  ;;  %v22_v6 = vld [vmem:[%s258_s1 + $0x20] sm:$0xff]  ;;  %v23_v7 = vld [vmem:[%s258_s1 + $0x28] sm:$0xff] }
   0x3   :  { %v175_v5 = vpack.c.bf16 %v21_v4, %v20_v2  ;;  %v14_v8 = vld [vmem:[%s259_s0] sm:$0xff]  ;;  %v16_v9 = vld [vmem:[%s259_s0 + $0x10] sm:$0xff]  ;;  %v179_v10 = vpack.c.bf16 %v23_v7, %v22_v6  ;;  %v15_v11 = vld [vmem:[%s259_s0 + $0x8] sm:$0xff] }
   0x4   :  { %172 = vmatprep.subr.bf16.mxu0 %v171_v3  ;;  %183 = vmatprep.subr.bf16.mxu1 %v171_v3  ;;  %v17_v12 = vld [vmem:[%s259_s0 + $0x18] sm:$0xff]  ;;  %v138_v13 = vld [vmem:[%s260_s2] ss:$0 sm:$0xff] }
   0x5   :  { %174 = vmatpush3.bf16.msra.mxu0 %v171_v3  ;;  %186 = vmatpush3.bf16.msra.mxu1 %v171_v3 }
   0x6   :  { %176 = vmatprep.subr.bf16.mxu0 %v175_v5  ;;  %184 = vmatprep.subr.bf16.mxu1 %v175_v5 }
   0x7   :  { %165 = vmatprep.mubr.msk.f32.mxu0 %vm31_vm0, %v14_v8  ;;  %168 = vmatprep.mubr.msk.f32.mxu1 %vm31_vm0, %v16_v9 }
   0x9   :  { %178 = vmatpush3.bf16.msra.mxu0 %v175_v5  ;;  %187 = vmatpush3.bf16.msra.mxu1 %v175_v5 }
   0xa   :  { %180 = vmatprep.subr.bf16.mxu0 %v179_v10  ;;  %185 = vmatprep.subr.bf16.mxu1 %v179_v10 }
   0xd   :  { %182 = vmatpush3.bf16.msra.mxu0 %v179_v10  ;;  %188 = vmatpush3.bf16.msra.mxu1 %v179_v10 }
  0x10   :  { %166 = vmatmul.mubr.msk.f32.vlgmr.msra.gmra.mrb[0].mxu0 %vm31_vm0, %v15_v11  ;;  %169 = vmatmul.mubr.msk.f32.vlgmr.msra.gmra.mrb[0].mxu1 %vm31_vm0, %v17_v12 }
  0xe3   :  { %v167_v14 = vpop.f32.mrb[0].mxu0  ;;  %v170_v15 = vpop.f32.mrb[0].mxu1 }
  0xe4   :  { %v116_v16 = vadd.f32 %v167_v14, %v138_v13  ;;  %v126_v17 = vadd.f32 %v170_v15, %v138_v13  ;;  %v110_v18 = vpop.f32.mrb[1].mxu0  ;;  %v120_v19 = vpop.f32.mrb[1].mxu1 }
  0xe5   :  { %v111_v20 = vadd.f32 %v138_v13, %v110_v18  ;;  %v121_v21 = vadd.f32 %v138_v13, %v120_v19 }
  0xe6   :  { %131 = vst.msk [vmem:[%s261_s3 + $0x8] sm:$0xff] %vm129_vm1, %v116_v16  ;;  %133 = vst.msk [vmem:[%s261_s3 + $0x18] sm:$0xff] %vm129_vm1, %v126_v17 }
  0xe7   :  { %130 = vst.msk [vmem:[%s261_s3] sm:$0xff] %vm129_vm1, %v111_v20  ;;  %132 = vst.msk [vmem:[%s261_s3 + $0x10] sm:$0xff] %vm129_vm1, %v121_v21 }

// kernel: _lambda_.9
= control target key start
LH: loop header
LB: loop body
LE: loop exit
PB: predicated region body
PF: predicated region fallthrough
CT: control target
= control target key end

     0   :  { %v169_v3 = vmov 0.0|0.0   ;;  %vm170_vm0 = vmmov 0   ;;  %v171_v6 = vmov 0.0   ;;  %s223_s0 = inlined_call_operand.vmem [shape: f32[2,32], index: 0, kind: input, shape index: {}]   ;;  %s224_s1 = inlined_call_operand.vmem [shape: f32[32,10], index: 1, kind: input, shape index: {}]   ;;  %s225_s2 = inlined_call_operand.vmem [shape: f32[1,10], index: 2, kind: input, shape index: {}]   ;;  %s226_s3 = inlined_call_operand.hbm [shape: f32[2,10], index: 3, kind: output, shape index: {}]  }
   0x1   :  { %v16_v0 = vld [vmem:[%s224_s1] sm:$0xff]  ;;  %v17_v1 = vld [vmem:[%s224_s1 + $0x8] sm:$0xff]  ;;  %v18_v2 = vld [vmem:[%s224_s1 + $0x10] sm:$0xff]  ;;  %135 = vmatprep.subr.bf16.mxu0 %v169_v3  ;;  %132 = vmatprep.mubr.msk.f32.mxu0 %vm170_vm0, %v171_v6 }
   0x2   :  { %v136_v4 = vpack.c.bf16 %v17_v1, %v16_v0  ;;  %v19_v5 = vld [vmem:[%s224_s1 + $0x18] sm:$0xff] }
   0x3   :  { %8 = vsyncpa [#allocation3], 0  ;;  %v139_v7 = vpack.c.bf16 %v19_v5, %v18_v2  ;;  %v15_v8 = vld [vmem:[%s223_s0] sm:$0x3]  ;;  %vm27_vm1 = vcmask 261120   ;;  %s172_s24 = smov [#allocation2]  }
   0x4   :  { %137 = vmatpush3.bf16.msra.mxu0 %v136_v4  ;;  %v117_v9 = vld [vmem:[%s225_s2] ss:$0 sm:$0xff]  ;;  %s109_s1 = sshll.u32 %s172_s24, 4  ;;  %vm101_vm2 = vcmask 74752   ;;  %s110_s1 = int_to_ptr.vmem [resolvable:$true] %s109_s1 }
   0x5   :  { %138 = vmatprep.subr.bf16.mxu0 %v169_v3  ;;  %s145_s25 = scalar_lea.vmem %s110_s1, 32  ;;  %p150_p1 = scmp.lt.s32.totalorder %s110_s1, %s110_s1 }
   0x6   :  { %p146_p0 = scmp.ne.s32.totalorder %s110_s1, %s145_s25  ;;  %p151_p2 = scmp.lt.s32.totalorder %s145_s25, %s145_s25 }
   0x8   :  { %140 = vmatpush3.bf16.msra.mxu0 %v139_v7  ;;  %p152_p3 = por %p151_p2, %p150_p1 }
   0xa   :  { %p153_p4 = pnand %p152_p3, %p146_p0 }
   0xb   :  { %133 = vmatmul.mubr.msk.f32.vlgmr.msra.gmra.mrb[0].mxu0 %vm27_vm1, %v15_v8 }
  0xde   :  { %v97_v10 = vpop.f32.mrb[0].mxu0 }
  0xdf   :  { %v98_v11 = vadd.f32 %v117_v9, %v97_v10  ;;  %v134_v12 = vpop.f32.mrb[1].mxu0 }
  0xe1   :  { %102 = vst.msk [vmem:[#allocation2] sm:$0x3] %vm101_vm2, %v98_v11 }
  0xe2   :  { %156 = shalt.err (!%p153_p4)
}
  0xe3   :  { %s157_s27 = scalar_lea.hbm %s226_s3, 32 }
  0xe4   :  { %p158_p5 = scmp.ne.s32.totalorder %s226_s3, %s157_s27  ;;  %p161_p6 = scmp.lt.u32.totalorder %s157_s27, %s226_s3 }
  0xe6   :  { %p163_p7 = pnand %p161_p6, %p158_p5 }
  0xe8   :  { %166 = shalt.err (!%p163_p7)
}
  0xe9   :  { %112 = dma.vmem_to_hbm [thread:$0]  %s110_s1, 32, %s226_s3, [#allocation3]  }
  0xea   :  { %167 = dma.done.wait [#allocation3], 32  }
  0xeb   :  { %168 = vsyncadd [#allocation3], 4294967264 }
  0xec   :  { %116 = vsyncpa [#allocation3], 1 }

// kernel: _lambda_.6
= control target key start
LH: loop header
LB: loop body
LE: loop exit
PB: predicated region body
PF: predicated region fallthrough
CT: control target
= control target key end

     0   :  { %s2042_s18 = smov 0   ;;  %s2393_s0 = inlined_call_operand.vmem [shape: f32[2,16,32], index: 0, kind: input, shape index: {}]   ;;  %s2394_s1 = inlined_call_operand.vmem [shape: f32[1,32], index: 1, kind: input, shape index: {}]   ;;  %s2395_s2 = inlined_call_operand.vmem [shape: f32[1,32], index: 2, kind: input, shape index: {}]   ;;  %s2396_s3 = inlined_call_operand.vmem [shape: bf16[32,64], index: 3, kind: input, shape index: {}]   ;;  %s2397_s4 = inlined_call_operand.vmem [shape: bf16[32,64], index: 4, kind: input, shape index: {}]   ;;  %s2398_s5 = inlined_call_operand.vmem [shape: f32[4,64], index: 5, kind: input, shape index: {}]   ;;  %s2399_s6 = inlined_call_operand.vmem [shape: f32[1,64], index: 6, kind: input, shape index: {}]   ;;  %s2400_s7 = inlined_call_operand.vmem [shape: bf16[64,8], index: 7, kind: input, shape index: {}]   ;;  %s2401_s8 = inlined_call_operand.vmem [shape: bf16[64,8], index: 8, kind: input, shape index: {}]   ;;  %s2402_s9 = inlined_call_operand.vmem [shape: bf16[64,64], index: 9, kind: input, shape index: {}]   ;;  %s2403_s10 = inlined_call_operand.vmem [shape: f32[1,64], index: 10, kind: input, shape index: {}]   ;;  %s2404_s11 = inlined_call_operand.vmem [shape: f32[8,64], index: 11, kind: input, shape index: {}]   ;;  %s2405_s12 = inlined_call_operand.vmem [shape: f32[1,64], index: 12, kind: input, shape index: {}]   ;;  %s2406_s13 = inlined_call_operand.vmem [shape: bf16[64,32], index: 13, kind: input, shape index: {}]   ;;  %s2407_s14 = inlined_call_operand.vmem [shape: f32[2,16,32], index: 14, kind: output, shape index: {0}]   ;;  %s2408_s15 = inlined_call_operand.vmem [shape: f32[2,16,32], index: 15, kind: output, shape index: {1}]  }
   0x1 LB: > { %s1702_s19 = sadd.s32 4294967295, %s1949_s18   ;;  %p1706_p0 = scmp.ge.s32.totalorder %s1949_s18, 1  ;;  %s1949_s18 = sphi %s2042_s18, %s26_s18  }
   0x2   : > { %p440_p1 = scmp.lt.s32.totalorder %s1949_s18, 3 }
   0x4   : > { %p441_p2 = pnand %p1706_p0, %p440_p1 }
   0x5   : > { %p493_p3 = scmp.lt.s32.totalorder (!%p441_p2), %s1702_s19, 1  ;;  %vm511_vm0 = vcmask (!%p441_p2), 261120   ;;  %v1874_v14 = vld [vmem:[%s2396_s3] sm:$0xff] (!%p441_p2)   ;;  %v1959_v16 = vmov (!%p441_p2), 0.0   ;;  %v1876_v17 = vld [vmem:[%s2396_s3 + $0x8] sm:$0xff] (!%p441_p2)   ;;  %vm1960_vm1 = vmmov (!%p441_p2), 0  }
   0x6   : > { %444 = sbr.rel (%p441_p2) target bundleno = 1266 (0x4f2), region = 76  ;;  %v1875_v15 = vld [vmem:[%s2397_s4] sm:$0xff] (!%p441_p2)   ;;  %1783 = vmatprep.subr.bf16.mxu0 (!%p441_p2), %v1959_v16  ;;  %1791 = vmatprep.subr.bf16.mxu1 (!%p441_p2), %v1959_v16  ;;  %v1877_v18 = vld [vmem:[%s2397_s4 + $0x8] sm:$0xff] (!%p441_p2)   ;;  %v1882_v40 = vld [vmem:[%s2400_s7 + $0x10] sm:$0xff] (!%p441_p2)   ;;  %vm677_vm2 = vcmask (!%p441_p2), 523264   ;;  %vm682_vm3 = vcmask (!%p441_p2), 1042432  }
   0x7   : > { %1784 = vmatpush3.bf16.msra.mxu0 (!%p441_p2), %v1874_v14  ;;  %1792 = vmatpush3.bf16.msra.mxu1 (!%p441_p2), %v1875_v15  ;;  %v1713_v27 = vld [vmem:[%s2394_s1] ss:$0 sm:$0xff] (!%p441_p2)  ;;  %v1880_v38 = vld [vmem:[%s2400_s7 + $0x8] sm:$0xff] (!%p441_p2)   ;;  %v1883_v41 = vld [vmem:[%s2401_s8 + $0x10] sm:$0xff] (!%p441_p2)   ;;  %vm710_vm4 = vcmask (!%p441_p2), 1046528   ;;  %vm731_vm5 = vcmask (!%p441_p2), 1045504  }
   0x8   : > { %1785 = vmatprep.subr.bf16.mxu0 (!%p441_p2), %v1959_v16  ;;  %1793 = vmatprep.subr.bf16.mxu1 (!%p441_p2), %v1959_v16  ;;  %v1714_v31 = vld [vmem:[%s2395_s2] ss:$0 sm:$0xff] (!%p441_p2)  ;;  %v1881_v39 = vld [vmem:[%s2401_s8 + $0x8] sm:$0xff] (!%p441_p2)   ;;  %v1884_v42 = vld [vmem:[%s2400_s7 + $0x18] sm:$0xff] (!%p441_p2)   ;;  %vm752_vm6 = vcmask (!%p441_p2), 1044480   ;;  %vm864_vm7 = vcmask (!%p441_p2), 64512  }
   0x9   : > { %1787 = vmatprep.mubr.msk.bf16.mxu0 (!%p441_p2), %vm1960_vm1, %v1959_v16  ;;  %1795 = vmatprep.mubr.msk.bf16.mxu1 (!%p441_p2), %vm1960_vm1, %v1959_v16  ;;  %v1878_v36 = vld [vmem:[%s2400_s7] sm:$0xff] (!%p441_p2)   ;;  %v1885_v43 = vld [vmem:[%s2401_s8 + $0x18] sm:$0xff] (!%p441_p2)   ;;  %s2196_s30 = smov (!%p441_p2), 0  }
   0xa   : > { %v1879_v37 = vld [vmem:[%s2401_s8] sm:$0xff] (!%p441_p2)  }
   0xb   : > { %1786 = vmatpush3.bf16.msra.mxu0 (!%p441_p2), %v1876_v17  ;;  %1794 = vmatpush3.bf16.msra.mxu1 (!%p441_p2), %v1877_v18  ;;  %v1722_v45 = vld [vmem:[%s2398_s5 + $0x1] ss:$0 sm:$0xff] (!%p441_p2)  ;;  %v1723_v48 = vld [vmem:[%s2398_s5 + $0x2] ss:$0 sm:$0xff] (!%p441_p2)  ;;  %v1724_v51 = vld [vmem:[%s2398_s5 + $0x3] ss:$0 sm:$0xff] (!%p441_p2) }
   0xc   : > { %1799 = vmatprep.subr.bf16.mxu0 (!%p441_p2), %v1959_v16  ;;  %1811 = vmatprep.subr.bf16.mxu1 (!%p441_p2), %v1959_v16 }
   0xd   : > { %s2410_s19 = smov (!%p493_p3, %s1702_s19), 1 }
   0xe   : > { %s1754_s20 = sshll.u32 %s2410_s19, 4 }
   0xf   : > { %s497_s23 = scalar_lea.vmem %s2393_s0, %s1754_s20  ;;  %s2056_s26 = scalar_lea.vmem %s2407_s14, %s1754_s20 }
  0x10   : > { %s507_s29 = scalar_lea.vmem %s2408_s15, %s1754_s20  ;;  %v509_v0 = vld [vmem:[%s497_s23] sm:$0xff]  ;;  %v510_v1 = vld [vmem:[%s497_s23 + $0x8] sm:$0xff] }
  0x11   : > { %v514_v2 = vsel %vm511_vm0, %v509_v0, 0.0  ;;  %512 = vst.msk [vmem:[%s507_s29] sm:$0xff] %vm511_vm0, %v509_v0  ;;  %513 = vst.msk [vmem:[%s507_s29 + $0x8] sm:$0xff] %vm511_vm0, %v510_v1  ;;  %v517_v3 = vsel %vm511_vm0, %v510_v1, 0.0 }
  0x12   : > { %515 = vadd.xlane.f32.xlu0 %v514_v2 }
  0x16   : > { %518 = vadd.xlane.f32.xlu0 %v517_v3 }
  0x9f   : > { %v516_v4 = vpop.xlane.xlu0 %515 }
  0xa0   : > { %v521_v5 = vmul.f32 0.03125, %v516_v4 }
  0xa2   : > { %v523_v6 = vsub.f32 %v509_v0, %v521_v5 }
  0xa3   : > { %v519_v7 = vpop.xlane.xlu0 %518 }
  0xa4   : > { %v522_v8 = vmul.f32 0.03125, %v519_v7  ;;  %v525_v9 = vmul.f32 %v523_v6, %v523_v6 }
  0xa6   : > { %v524_v10 = vsub.f32 %v510_v1, %v522_v8  ;;  %v527_v11 = vsel %vm511_vm0, %v525_v9, 0.0  ;;  %v1721_v1 = vld [vmem:[%s2398_s5] ss:$0 sm:$0xff] }
  0xa7   : > { %528 = vadd.xlane.f32.xlu1 %v527_v11 }
  0xa8   : > { %v526_v12 = vmul.f32 %v524_v10, %v524_v10 }
  0xaa   : > { %v530_v13 = vsel %vm511_vm0, %v526_v12, 0.0 }
  0xab   : > { %531 = vadd.xlane.f32.xlu1 %v530_v13 }
 0x134   : > { %v529_v19 = vpop.xlane.xlu1 %528 }
 0x135   : > { %v533_v20 = vmul.f32 0.03125, %v529_v19 }
 0x137   : > { %v535_v21 = vadd.f32 1e-05, %v533_v20 }
 0x138   : > { %v532_v22 = vpop.xlane.xlu1 %531 }
 0x139   : > { %1890 = vrsqrt.f32 %v535_v21  ;;  %v534_v23 = vmul.f32 0.03125, %v532_v22 }
 0x13b   : > { %v536_v24 = vadd.f32 1e-05, %v534_v23 }
 0x13d   : > { %1892 = vrsqrt.f32 %v536_v24 }
 0x143   : > { %v1891_v25 = vpop.eup %1890 }
 0x144   : > { %v539_v26 = vmul.f32 %v1891_v25, %v523_v6 }
 0x146   : > { %v548_v30 = vmul.f32 %v1713_v27, %v539_v26 }
 0x147   : > { %v1893_v28 = vpop.eup %1892 }
 0x148   : > { %v540_v29 = vmul.f32 %v1893_v28, %v524_v10  ;;  %v557_v33 = vadd.f32 %v1714_v31, %v548_v30 }
 0x14a   : > { %v549_v32 = vmul.f32 %v1713_v27, %v540_v29  ;;  %v1725_v27 = vld [vmem:[%s2399_s6] ss:$0 sm:$0xff] }
 0x14c   : > { %v558_v34 = vadd.f32 %v1714_v31, %v549_v32 }
 0x14e   : > { %v559_v35 = vpack.c.bf16 %v558_v34, %v557_v33 }
 0x150   : > { %1788 = vmatmul.mubr.msk.bf16.vlgmr.msra.gmra.mrb[0].mxu0 %vm511_vm0, %v559_v35  ;;  %1796 = vmatmul.mubr.msk.bf16.vlgmr.msra.gmra.mrb[0].mxu1 %vm511_vm0, %v559_v35 }
 0x151   : > { %1807 = vmatprep.mubr.msk.bf16.mxu0 %vm1960_vm1, %v1959_v16  ;;  %1819 = vmatprep.mubr.msk.bf16.mxu1 %vm1960_vm1, %v1959_v16 }
 0x152   : > { %1800 = vmatpush3.bf16.msra.mxu0 %v1878_v36  ;;  %1812 = vmatpush3.bf16.msra.mxu1 %v1879_v37 }
 0x153   : > { %1801 = vmatprep.subr.bf16.mxu0 %v1959_v16  ;;  %1813 = vmatprep.subr.bf16.mxu1 %v1959_v16 }
 0x156   : > { %1802 = vmatpush3.bf16.msra.mxu0 %v1880_v38  ;;  %1814 = vmatpush3.bf16.msra.mxu1 %v1881_v39 }
 0x157   : > { %1803 = vmatprep.subr.bf16.mxu0 %v1959_v16  ;;  %1815 = vmatprep.subr.bf16.mxu1 %v1959_v16 }
 0x15a   : > { %1804 = vmatpush3.bf16.msra.mxu0 %v1882_v40  ;;  %1816 = vmatpush3.bf16.msra.mxu1 %v1883_v41 }
 0x15b   : > { %1805 = vmatprep.subr.bf16.mxu0 %v1959_v16  ;;  %1817 = vmatprep.subr.bf16.mxu1 %v1959_v16 }
 0x15e   : > { %1806 = vmatpush3.bf16.msra.mxu0 %v1884_v42  ;;  %1818 = vmatpush3.bf16.msra.mxu1 %v1885_v43  ;;  %v1886_v42 = vld [vmem:[%s2402_s9] sm:$0xff]  }
 0x15f   : > { %1823 = vmatprep.subr.bf16.mxu0 %v1959_v16 }
 0x223   : > { %v613_v44 = vpop.f32.mrb[0].mxu0  ;;  %v670_v46 = vpop.f32.mrb[0].mxu1 }
 0x224   : > { %v683_v47 = vrot.slane %v613_v44, 5  ;;  %678 = vst.msk [vmem:[#allocation4] sm:$0xff] %vm677_vm2, %v670_v46  ;;  %v1789_v49 = vpop.f32.mrb[1].mxu0  ;;  %v1797_v50 = vpop.f32.mrb[1].mxu1  ;;  %v1887_v44 = vld [vmem:[%s2402_s9 + $0x8] sm:$0xff]   ;;  %v1889_v46 = vld [vmem:[%s2402_s9 + $0x18] sm:$0xff]  }
 0x225   : > { %v616_v52 = vpop.f32.mrb[2].mxu0  ;;  %v673_v53 = vpop.f32.mrb[2].mxu1 }
 0x226   : > { %v689_v54 = vsel %vm682_vm3, 0.0, %v683_v47  ;;  %v684_v55 = vrot.slane %v616_v52, 5  ;;  %679 = vst.msk [vmem:[#allocation4 + $0x8] sm:$0xff] %vm677_vm2, %v673_v53  ;;  %v1790_v56 = vpop.f32.mrb[3].mxu0  ;;  %v1798_v57 = vpop.f32.mrb[3].mxu1 }
 0x227   : > { %v704_v58 = vmul.f32 %v1722_v45, %v689_v54  ;;  %v725_v59 = vmul.f32 %v1723_v48, %v689_v54  ;;  %v746_v0 = vmul.f32 %v1724_v51, %v689_v54  ;;  %v695_v12 = vmul.f32 %v1721_v1, %v689_v54  ;;  %v1738_v57 = vld [vmem:[%s2403_s10] ss:$0 sm:$0xff] }
 0x228   : > { %v685_v60 = vsel %vm682_vm3, %v683_v47, %v684_v55  ;;  %v706_v61 = vmul.f32 %v1722_v45, %v684_v55  ;;  %v727_v62 = vmul.f32 %v1723_v48, %v684_v55  ;;  %v748_v63 = vmul.f32 %v1724_v51, %v684_v55  ;;  %v2182_v47 = vld [vmem:[%s2404_s11] sm:$0xff] }
 0x229   : > { %v705_v2 = vmul.f32 %v1722_v45, %v685_v60  ;;  %v726_v4 = vmul.f32 %v1723_v48, %v685_v60  ;;  %v747_v6 = vmul.f32 %v1724_v51, %v685_v60  ;;  %v711_v8 = vrot.slane %v704_v58, 1  ;;  %v1888_v45 = vld [vmem:[%s2402_s9 + $0x10] sm:$0xff]   ;;  %v2187_v48 = vld [vmem:[%s2405_s12] ss:$0 sm:$0xff] }
 0x22a   : > { %v714_v3 = vrot.slane %v706_v61, 1  ;;  %v735_v5 = vrot.slane %v727_v62, 2  ;;  %v756_v7 = vrot.slane %v748_v63, 3  ;;  %v732_v9 = vrot.slane %v725_v59, 2 }
 0x22b   : > { %v712_v10 = vrot.slane %v705_v2, 1  ;;  %v733_v11 = vrot.slane %v726_v4, 2  ;;  %v753_v13 = vrot.slane %v746_v0, 3  ;;  %v696_v14 = vmul.f32 %v1721_v1, %v685_v60 }
 0x22c   : > { %v754_v15 = vrot.slane %v747_v6, 3 }
 0x22d   : > { %v713_v17 = vsel %vm710_vm4, %v711_v8, %v712_v10  ;;  %v715_v18 = vsel %vm710_vm4, %v712_v10, %v714_v3  ;;  %v734_v19 = vsel %vm731_vm5, %v732_v9, %v733_v11  ;;  %v736_v20 = vsel %vm731_vm5, %v733_v11, %v735_v5 }
 0x22e   : > { %v718_v21 = vadd.f32 %v713_v17, %v695_v12  ;;  %v719_v22 = vadd.f32 %v715_v18, %v696_v14  ;;  %v755_v23 = vsel %vm752_vm6, %v753_v13, %v754_v15  ;;  %v757_v24 = vsel %vm752_vm6, %v754_v15, %v756_v7 }
 0x230   : > { %v739_v25 = vadd.f32 %v734_v19, %v718_v21  ;;  %v740_v26 = vadd.f32 %v736_v20, %v719_v22 }
 0x232   : > { %v761_v28 = vadd.f32 %v757_v24, %v740_v26  ;;  %v760_v29 = vadd.f32 %v755_v23, %v739_v25 }
 0x234   : > { %v769_v30 = vadd.f32 %v1725_v27, %v760_v29  ;;  %v770_v31 = vadd.f32 %v1725_v27, %v761_v28 }
 0x236   : > { %v1726_v32 = vmul.f32 -1.442695, %v769_v30  ;;  %v1727_v33 = vmul.f32 -1.442695, %v770_v31 }
 0x238   : > { %1894 = vpow2.f32 %v1726_v32 }
 0x239   : > { %1896 = vpow2.f32 %v1727_v33 }
 0x242   : > { %v1895_v34 = vpop.eup %1894 }
 0x243   : > { %v1897_v35 = vpop.eup %1896  ;;  %v777_v36 = vadd.f32 1.0, %v1895_v34 }
 0x244   : > { %v778_v37 = vadd.f32 1.0, %v1897_v35 }
 0x245   : > { %1898 = vrcp.f32 %v777_v36 }
 0x246   : > { %1900 = vrcp.f32 %v778_v37 }
 0x24f   : > { %v1899_v38 = vpop.eup %1898 }
 0x250   : > { %v1901_v39 = vpop.eup %1900  ;;  %v783_v40 = vmul.f32 %v1899_v38, %v769_v30 }
 0x251   : > { %v784_v41 = vmul.f32 %v1901_v39, %v770_v31  ;;  %v2194_v31 = vmov 0.0  }
 0x252   : > { %785 = vst.msk [vmem:[#allocation2] sm:$0xff] %vm677_vm2, %v783_v40 }
 0x253   : > { %786 = vst.msk [vmem:[#allocation2 + $0x8] sm:$0xff] %vm677_vm2, %v784_v41  ;;  %v787_v43 = vpack.c.bf16 %v784_v41, %v783_v40 }
 0x255   : > { %1808 = vmatmul.mubr.msk.bf16.vlgmr.msra.gmra.mrb[4].mxu0 %vm677_vm2, %v787_v43  ;;  %1820 = vmatmul.mubr.msk.bf16.vlgmr.msra.gmra.mrb[4].mxu1 %vm677_vm2, %v787_v43 }
 0x256   : > { %1824 = vmatpush3.bf16.msra.mxu0 %v1886_v42  ;;  %1831 = vmatprep.mubr.msk.bf16.mxu0 %vm1960_vm1, %v1959_v16 }
 0x257   : > { %1825 = vmatprep.subr.bf16.mxu0 %v1959_v16 }
 0x25a   : > { %1826 = vmatpush3.bf16.msra.mxu0 %v1887_v44 }
 0x25b   : > { %1827 = vmatprep.subr.bf16.mxu0 %v1959_v16 }
 0x25e   : > { %1828 = vmatpush3.bf16.msra.mxu0 %v1888_v45 }
 0x25f   : > { %1829 = vmatprep.subr.bf16.mxu0 %v1959_v16 }
 0x262   : > { %1830 = vmatpush3.bf16.msra.mxu0 %v1889_v46 }
 0x265   : > { %1832 = vmatmul.mubr.msk.bf16.vlgmr.msra.gmra.mrb[8].mxu0 %vm677_vm2, %v787_v43 }
 0x328   : > { %v857_v49 = vpop.f32.mrb[4].mxu0  ;;  %v933_v50 = vpop.f32.mrb[4].mxu1 }
 0x329   : > { %865 = vst.msk [vmem:[#allocation5] sm:$0xff] %vm864_vm7, %v857_v49  ;;  %940 = vst.msk [vmem:[#allocation6] sm:$0xff] %vm864_vm7, %v933_v50  ;;  %v1809_v51 = vpop.f32.mrb[5].mxu0  ;;  %v1821_v52 = vpop.f32.mrb[5].mxu1 }
 0x32a   : > { %v860_v53 = vpop.f32.mrb[6].mxu0  ;;  %v936_v54 = vpop.f32.mrb[6].mxu1 }
 0x32b   : > { %866 = vst.msk [vmem:[#allocation5 + $0x8] sm:$0xff] %vm864_vm7, %v860_v53  ;;  %941 = vst.msk [vmem:[#allocation6 + $0x8] sm:$0xff] %vm864_vm7, %v936_v54  ;;  %v1810_v55 = vpop.f32.mrb[7].mxu0  ;;  %v1822_v56 = vpop.f32.mrb[7].mxu1 }
 0x338   : > { %v1015_v58 = vpop.f32.mrb[8].mxu0 }
 0x339   : > { %v1016_v59 = vadd.f32 %v1738_v57, %v1015_v58  ;;  %v1833_v60 = vpop.f32.mrb[9].mxu0 }
 0x33a   : > { %v1018_v61 = vpop.f32.mrb[10].mxu0 }
 0x33b   : > { %v1028_v62 = vand.u32 2147483647, %v1016_v59  ;;  %v1019_v63 = vadd.f32 %v1738_v57, %v1018_v61  ;;  %v1834_v0 = vpop.f32.mrb[11].mxu0  ;;  %v1022_v21 = vmax.f32 %v1016_v59, 0.0  ;;  %vm1024_vm10 = vcmp.ne.f32.partialorder %v1016_v59, %v1016_v59 }
 0x33d   : > { %v1030_v1 = vsub.f32 0.0, %v1028_v62  ;;  %v1029_v2 = vand.u32 2147483647, %v1019_v63  ;;  %v1023_v26 = vmax.f32 %v1019_v63, 0.0  ;;  %vm1025_vm11 = vcmp.ne.f32.partialorder %v1019_v63, %v1019_v63 }
 0x33f   : > { %v1032_v3 = vmul.f32 1.442695, %v1030_v1  ;;  %v1031_v4 = vsub.f32 0.0, %v1029_v2 }
 0x341   : > { %1902 = vpow2.f32 %v1032_v3  ;;  %v1034_v5 = vmul.f32 1.442695, %v1031_v4 }
 0x343   : > { %1904 = vpow2.f32 %v1034_v5 }
 0x34b   : > { %v1903_v6 = vpop.eup %1902 }
 0x34c   : > { %v1036_v7 = vadd.f32 1.0, %v1903_v6  ;;  %v1039_v10 = vmul.f32 -0.5, %v1903_v6  ;;  %v1042_v13 = vand.u32 2147483647, %v1903_v6 }
 0x34d   : > { %v1905_v8 = vpop.eup %1904 }
 0x34e   : > { %1906 = vlog2.f32 %v1036_v7  ;;  %v1045_v9 = vadd.f32 1.0, %v1905_v8  ;;  %v1048_v11 = vmul.f32 -0.5, %v1905_v8  ;;  %v1040_v12 = vadd.f32 1.0, %v1039_v10 }
 0x34f   : > { %v1051_v17 = vand.u32 2147483647, %v1905_v8  ;;  %vm1043_vm8 = vcmp.lt.f32.partialorder %v1042_v13, 0.0004427343 }
 0x350   : > { %1908 = vlog2.f32 %v1045_v9  ;;  %v1049_v14 = vadd.f32 1.0, %v1048_v11  ;;  %v1041_v19 = vmul.f32 %v1903_v6, %v1040_v12 }
 0x351   : > { %vm1052_vm9 = vcmp.lt.f32.partialorder %v1051_v17, 0.0004427343 }
 0x352   : > { %v1050_v24 = vmul.f32 %v1905_v8, %v1049_v14 }
 0x358   : > { %v1907_v15 = vpop.eup %1906 }
 0x359   : > { %v1038_v18 = vmul.f32 0.6931472, %v1907_v15 }
 0x35a   : > { %v1909_v20 = vpop.eup %1908 }
 0x35b   : > { %v1044_v22 = vsel %vm1043_vm8, %v1041_v19, %v1038_v18  ;;  %v1047_v23 = vmul.f32 0.6931472, %v1909_v20 }
 0x35c   : > { %v1054_v25 = vadd.f32 %v1044_v22, %v1022_v21 }
 0x35d   : > { %v1053_v27 = vsel %vm1052_vm9, %v1050_v24, %v1047_v23 }
 0x35e   : > { %v1056_v28 = vsel %vm1024_vm10, %v1016_v59, %v1054_v25  ;;  %v1055_v29 = vadd.f32 %v1053_v27, %v1023_v26 }
 0x35f   : > { %1058 = vst.msk [vmem:[#allocation3] sm:$0xff] %vm677_vm2, %v1056_v28 }
 0x360   : > { %v1057_v30 = vsel %vm1025_vm11, %v1019_v63, %v1055_v29 }
 0x361   : > { %1059 = vst.msk [vmem:[#allocation3 + $0x8] sm:$0xff] %vm677_vm2, %v1057_v30 }
 0x362 LB: >> { %v1086_v32 = vlaneseq  ;;  %s2205_s16 = sshll.u32 %s1957_s30, 3  ;;  %v1961_v34 = vmov 1966171168   ;;  %vm1485_vm12 = vcmask 1040384   ;;  %vm1487_vm13 = vcmask 1041408   ;;  %s1067_s30 = sadd.s32 1, %s1957_s30   ;;  %s1957_s30 = sphi %s2196_s30, %s1067_s30   ;;  %v1953_v31 = vphi %v2194_v31, %v1476_v31  }
 0x363   : >> { %v1084_v35 = vunpack.c.l.s4 %v1961_v34  ;;  %s1074_s17 = scalar_lea.vmem [#allocation5], %s2205_s16  ;;  %s1070_s19 = scalar_lea.vmem [#allocation2], %s2205_s16  ;;  %vm1490_vm14 = vcmask 1043456  }
 0x364   : >> { %v2207_v33 = vshrl.u32 %v1086_v32, 7  ;;  %v2210_v36 = vld [vmem:[%s1074_s17] sm:$0xff]  ;;  %s1072_s20 = scalar_lea.vmem [#allocation3], %s2205_s16  ;;  %s1076_s21 = scalar_lea.vmem [#allocation6], %s2205_s16 }
 0x365   : >> { %v1085_v43 = vunpack.c.0.s8 %v1084_v35  ;;  %v2224_v46 = vld [vmem:[%s1070_s19] sm:$0xff]  ;;  %s1078_s22 = scalar_lea.vmem [#allocation4], %s2205_s16  ;;  %s1511_s23 = scalar_lea.vmem [#allocation7], %s2205_s16 }
 0x366   : >> { %v2213_v37 = vsub.s32 0, %v2207_v33  ;;  %v1211_v38 = vsub.s32 2, %v2207_v33  ;;  %v1218_v39 = vsub.s32 3, %v2207_v33  ;;  %v1204_v40 = vsub.s32 1, %v2207_v33  ;;  %v2232_v52 = vld [vmem:[%s1076_s21] sm:$0xff]  ;;  %p1064_p4 = scmp.ge.s32.totalorder %s1067_s30, 2  }
 0x367   : >> { %v1232_v44 = vsub.s32 5, %v2207_v33  ;;  %v1225_v45 = vsub.s32 4, %v2207_v33  ;;  %v1239_v53 = vsub.s32 6, %v2207_v33  ;;  %v1088_v54 = vsub.s32 %v1085_v43, %v2207_v33  ;;  %1835 = vmatprep.subr.bf16.mxu1 (%p1064_p4), %v1959_v16  ;;  %1843 = vmatprep.mubr.msk.bf16.mxu1 (%p1064_p4), %vm1960_vm1, %v1959_v16 }
 0x368   : >> { %v1212_v41 = vrot.slane %v2210_v36, %v1211_v38  ;;  %v1198_v42 = vrot.slane %v2210_v36, %v2213_v37  ;;  %v1219_v49 = vrot.slane %v2210_v36, %v1218_v39  ;;  %v1205_v50 = vrot.slane %v2210_v36, %v1204_v40  ;;  %v1073_v51 = vld [vmem:[%s1072_s20] sm:$0xff] }
 0x369   : >> { %v1080_v55 = vmul.f32 %v1073_v51, %v2224_v46  ;;  %v1082_v56 = vcombine.high %v1073_v51, %v1073_v51  ;;  %v1233_v57 = vrot.slane %v2210_v36, %v1232_v44  ;;  %v1226_v58 = vrot.slane %v2210_v36, %v1225_v45 }
 0x36a   : >> { %1214 = vbcast.lane.b32.xlu1 %v1212_v41, 256  ;;  %1200 = vbcast.lane.b32.xlu0 %v1198_v42, 256  ;;  %v1089_v59 = vrot.slane %v1073_v51, %v1088_v54  ;;  %v1352_v62 = vrot.slane %v2232_v52, %v2213_v37  ;;  %v1240_v0 = vrot.slane %v2210_v36, %v1239_v53  ;;  %v1246_v24 = vsub.s32 7, %v2207_v33 }
 0x36b   : >> { %v1096_v60 = vrot.slane %v1082_v56, %v1088_v54  ;;  %v1259_v61 = vrot.slane %v1080_v55, %v1088_v54  ;;  %v1252_v63 = vcombine.high %v1080_v55, %v1080_v55  ;;  %v1366_v4 = vrot.slane %v2232_v52, %v1211_v38 }
 0x36c   : >> { %v1097_v1 = vcombine.high %v1089_v59, %v1089_v59  ;;  %v1105_v2 = vrot.slane %v1089_v59, %v1088_v54  ;;  %v1359_v15 = vrot.slane %v2232_v52, %v1204_v40  ;;  %v1373_v38 = vrot.slane %v2232_v52, %v1218_v39 }
 0x36d   : >> { %v2248_v3 = vrot.slane %v1259_v61, %v1088_v54  ;;  %v1267_v5 = vcombine.high %v1259_v61, %v1259_v61  ;;  %v1266_v6 = vrot.slane %v1252_v63, %v1088_v54  ;;  %v2251_v7 = vrot.slane %v1096_v60, %v1088_v54 }
 0x36e   : >> { %1221 = vbcast.lane.b32.xlu1 %v1219_v49, 256  ;;  %1207 = vbcast.lane.b32.xlu0 %v1205_v50, 256  ;;  %v1119_v8 = vrot.slane %v1097_v1, %v1088_v54  ;;  %v1134_v10 = vrot.slane %v1105_v2, %v2213_v37  ;;  %v1127_v13 = vcombine.high %v1105_v2, %v1105_v2 }
 0x36f   : >> { %v1297_v9 = vcombine.high %v2248_v3, %v2248_v3  ;;  %v1304_v11 = vrot.slane %v2248_v3, %v2213_v37  ;;  %v2258_v12 = vrot.slane %v1267_v5, %v1088_v54  ;;  %v1268_v14 = vcombine.high %v1266_v6, %v1266_v6 }
 0x370   : >> { %v1129_v17 = vcombine.high %v1119_v8, %v1119_v8  ;;  %v1138_v19 = vrot.slane %v1119_v8, %v2213_v37  ;;  %v1142_v21 = vrot.slane %v1127_v13, %v2213_v37  ;;  %v1098_v25 = vcombine.high %v1096_v60, %v1096_v60 }
 0x371   : >> { %v2262_v18 = vrot.slane %v1297_v9, %v2213_v37  ;;  %v1299_v20 = vcombine.high %v2258_v12, %v2258_v12  ;;  %v1308_v22 = vrot.slane %v2258_v12, %v2213_v37  ;;  %v2270_v23 = vrot.slane %v1268_v14, %v1088_v54 }
 0x372   : >> { %1235 = vbcast.lane.b32.xlu1 %v1233_v57, 256  ;;  %1228 = vbcast.lane.b32.xlu0 %v1226_v58, 256  ;;  %v1146_v26 = vrot.slane %v1129_v17, %v2213_v37  ;;  %v1150_v27 = vrot.slane %v2251_v7, %v2213_v37  ;;  %v2281_v30 = vrot.slane %v1266_v6, %v1088_v54  ;;  %v2329_v17 = vld [vmem:[%s1078_s22] sm:$0xff] }
 0x373   : >> { %v2277_v28 = vrot.slane %v1299_v20, %v2213_v37  ;;  %v1324_v29 = vrot.slane %v2270_v23, %v2213_v37  ;;  %v1300_v35 = vcombine.high %v2270_v23, %v2270_v23  ;;  %v1247_v40 = vrot.slane %v2210_v36, %v1246_v24 }
 0x374   : >> { %v1320_v32 = vrot.slane %v2281_v30, %v2213_v37  ;;  %v1298_v34 = vcombine.high %v2281_v30, %v2281_v30  ;;  %v1126_v41 = vrot.slane %v1098_v25, %v1088_v54  ;;  %v1128_v50 = vcombine.high %v2251_v7, %v2251_v7 }
 0x375   : >> { %v2297_v43 = vrot.slane %v1300_v35, %v2213_v37  ;;  %v1387_v39 = vrot.slane %v2232_v52, %v1232_v44  ;;  %v1380_v36 = vrot.slane %v2232_v52, %v1225_v45  ;;  %v1394_v56 = vrot.slane %v2232_v52, %v1239_v53 }
 0x376   : >> { %1354 = vbcast.lane.b32.xlu1 %v1352_v62, 256  ;;  %1242 = vbcast.lane.b32.xlu0 %v1240_v0, 256  ;;  %v2294_v42 = vrot.slane %v1298_v34, %v2213_v37  ;;  %v1154_v49 = vrot.slane %v1126_v41, %v2213_v37  ;;  %v1130_v51 = vcombine.high %v1126_v41, %v1126_v41 }
 0x377   : >> { %v1158_v54 = vrot.slane %v1128_v50, %v2213_v37  ;;  %v1401_v57 = vrot.slane %v2232_v52, %v1246_v24  ;;  %v1171_v44 = vmul.f32 %v1134_v10, %v2182_v47  ;;  %v1172_v59 = vmul.f32 %v1138_v19, %v2182_v47 }
 0x378   : >> { %v1162_v55 = vrot.slane %v1130_v51, %v2213_v37  ;;  %v1173_v45 = vmul.f32 %v1142_v21, %v2182_v47  ;;  %v1174_v62 = vmul.f32 %v1146_v26, %v2182_v47  ;;  %v1175_v53 = vmul.f32 %v1150_v27, %v2182_v47 }
 0x379   : >> { %v1179_v58 = vmul.f32 1.442695, %v1171_v44  ;;  %v1181_v60 = vmul.f32 1.442695, %v1172_v59  ;;  %v1177_v13 = vmul.f32 %v1158_v54, %v2182_v47  ;;  %v1746_v26 = vmul.f32 -1.442695, %v2329_v17 }
 0x37a   : >> { %1368 = vbcast.lane.b32.xlu1 %v1366_v4, 256  ;;  %1361 = vbcast.lane.b32.xlu0 %v1359_v15, 256  ;;  %v1183_v61 = vmul.f32 1.442695, %v1173_v45  ;;  %v1185_v52 = vmul.f32 1.442695, %v1174_v62  ;;  %v1176_v4 = vmul.f32 %v1154_v49, %v2182_v47  ;;  %v1178_v21 = vmul.f32 %v1162_v55, %v2182_v47 }
 0x37b   : >> { %1911 = vpow2.f32 %v1179_v58  ;;  %v1187_v2 = vmul.f32 1.442695, %v1175_v53  ;;  %v1191_v20 = vmul.f32 1.442695, %v1177_v13  ;;  %v1933_v47 = vld [vmem:[%s2406_s13 + $0x10] sm:$0xff] (%p1064_p4)  }
 0x37c   : >> { %1913 = vpow2.f32 %v1181_v60  ;;  %v1189_v10 = vmul.f32 1.442695, %v1176_v4  ;;  %v1193_v35 = vmul.f32 1.442695, %v1178_v21 }
 0x37d   : >> { %1915 = vpow2.f32 %v1183_v61 }
 0x37e   : >> { %1375 = vbcast.lane.b32.xlu1 %v1373_v38, 256  ;;  %1249 = vbcast.lane.b32.xlu0 %v1247_v40, 256  ;;  %1917 = vpow2.f32 %v1185_v52 }
 0x37f   : >> { %1919 = vpow2.f32 %v1187_v2 }
 0x380   : >> { %1921 = vpow2.f32 %v1189_v10 }
 0x381   : >> { %1923 = vpow2.f32 %v1191_v20 }
 0x382   : >> { %1389 = vbcast.lane.b32.xlu1 %v1387_v39, 256  ;;  %1382 = vbcast.lane.b32.xlu0 %v1380_v36, 256  ;;  %1925 = vpow2.f32 %v1746_v26 }
 0x383   : >> { %1927 = vpow2.f32 %v1193_v35 }
 0x385   : >> { %v1912_v33 = vpop.eup %1911 }
 0x386   : >> { %1396 = vbcast.lane.b32.xlu0 %v1394_v56, 256  ;;  %1403 = vbcast.lane.b32.xlu1 %v1401_v57, 256  ;;  %v1405_v63 = vmul.f32 %v1953_v31, %v1912_v33  ;;  %v1914_v6 = vpop.eup %1913 }
 0x387   : >> { %v1916_v15 = vpop.eup %1915 }
 0x388   : >> { %v1918_v27 = vpop.eup %1917 }
 0x389   : >> { %v1920_v49 = vpop.eup %1919 }
 0x38a   : >> { %v1922_v44 = vpop.eup %1921 }
 0x3dc   : >> { %v1215_v0 = vpop.permute.xlu1 %1214  ;;  %v1201_v1 = vpop.permute.xlu0 %1200 }
 0x3dd   : >> { %v1341_v5 = vmul.f32 %v1304_v11, %v1201_v1  ;;  %v1343_v24 = vmul.f32 %v2262_v18, %v1215_v0 }
 0x3df   : >> { %v1406_v7 = vadd.f32 %v1405_v63, %v1341_v5  ;;  %v1924_v63 = vpop.eup %1923 }
 0x3e0   : >> { %v1222_v8 = vpop.permute.xlu1 %1221  ;;  %v1208_v9 = vpop.permute.xlu0 %1207 }
 0x3e1   : >> { %v1342_v31 = vmul.f32 %v1308_v22, %v1208_v9  ;;  %v1415_v14 = vmul.f32 %v1914_v6, %v1406_v7  ;;  %v1344_v38 = vmul.f32 %v2277_v28, %v1222_v8  ;;  %v1926_v4 = vpop.eup %1925 }
 0x3e2   : >> { %v1506_v20 = vadd.f32 1.0, %v1926_v4 }
 0x3e3   : >> { %v1416_v19 = vadd.f32 %v1415_v14, %v1342_v31 }
 0x3e4   : >> { %v1236_v3 = vpop.permute.xlu1 %1235  ;;  %v1229_v11 = vpop.permute.xlu0 %1228  ;;  %1929 = vrcp.f32 %v1506_v20 }
 0x3e5   : >> { %v1425_v25 = vmul.f32 %v1916_v15, %v1416_v19  ;;  %v1345_v54 = vmul.f32 %v1320_v32, %v1229_v11  ;;  %v1346_v30 = vmul.f32 %v1324_v29, %v1236_v3  ;;  %v1928_v15 = vpop.eup %1927 }
 0x3e7   : >> { %v1426_v12 = vadd.f32 %v1425_v25, %v1343_v24 }
 0x3e8   : >> { %v1355_v22 = vpop.permute.xlu1 %1354  ;;  %v1243_v34 = vpop.permute.xlu0 %1242 }
 0x3e9   : >> { %v1435_v40 = vmul.f32 %v1918_v27, %v1426_v12  ;;  %v1407_v41 = vmul.f32 %v1406_v7, %v1355_v22  ;;  %v1347_v7 = vmul.f32 %v2294_v42, %v1243_v34 }
 0x3eb   : >> { %v1436_v50 = vadd.f32 %v1435_v40, %v1344_v38  ;;  %v1408_v51 = vsel %vm677_vm2, %v1407_v41, 0.0 }
 0x3ec   : >> { %v1409_v39 = vrot.slane %v1408_v51, 4  ;;  %v1369_v18 = vpop.permute.xlu1 %1368  ;;  %v1362_v36 = vpop.permute.xlu0 %1361 }
 0x3ed   : >> { %v1445_v55 = vmul.f32 %v1920_v49, %v1436_v50  ;;  %v1427_v56 = vmul.f32 %v1426_v12, %v1369_v18  ;;  %v1417_v57 = vmul.f32 %v1416_v19, %v1362_v36 }
 0x3ee   : >> { %v1410_v28 = vadd.f32 %v1409_v39, %v1408_v51 }
 0x3ef   : >> { %v1446_v58 = vadd.f32 %v1445_v55, %v1345_v54  ;;  %v1428_v59 = vsel %vm677_vm2, %v1427_v56, 0.0  ;;  %v1418_v45 = vsel %vm677_vm2, %v1417_v57, 0.0 }
 0x3f0   : >> { %v1411_v60 = vrot.slane %v1410_v28, 2  ;;  %v1429_v61 = vrot.slane %v1428_v59, 4  ;;  %v1419_v62 = vrot.slane %v1418_v45, 4  ;;  %v1376_v33 = vpop.permute.xlu1 %1375  ;;  %v1250_v53 = vpop.permute.xlu0 %1249 }
 0x3f1   : >> { %v1437_v32 = vmul.f32 %v1436_v50, %v1376_v33  ;;  %v1455_v52 = vmul.f32 %v1922_v44, %v1446_v58  ;;  %v1348_v21 = vmul.f32 %v2297_v43, %v1250_v53 }
 0x3f2   : >> { %v1412_v0 = vadd.f32 %v1411_v60, %v1410_v28  ;;  %v1430_v1 = vadd.f32 %v1429_v61, %v1428_v59  ;;  %v1420_v2 = vadd.f32 %v1419_v62, %v1418_v45 }
 0x3f3   : >> { %v1438_v5 = vsel %vm677_vm2, %v1437_v32, 0.0  ;;  %v1456_v6 = vadd.f32 %v1455_v52, %v1346_v30 }
 0x3f4   : >> { %v1431_v8 = vrot.slane %v1430_v1, 2  ;;  %v1421_v9 = vrot.slane %v1420_v2, 2  ;;  %v1439_v10 = vrot.slane %v1438_v5, 4  ;;  %v1390_v13 = vpop.permute.xlu1 %1389  ;;  %v1383_v37 = vpop.permute.xlu0 %1382  ;;  %v1413_v23 = vrot.slane %v1412_v0, 1 }
 0x3f5   : >> { %v1457_v29 = vmul.f32 %v1456_v6, %v1390_v13  ;;  %v1447_v31 = vmul.f32 %v1446_v58, %v1383_v37  ;;  %v1465_v14 = vmul.f32 %v1924_v63, %v1456_v6 }
 0x3f6   : >> { %v1432_v19 = vadd.f32 %v1431_v8, %v1430_v1  ;;  %v1422_v3 = vadd.f32 %v1421_v9, %v1420_v2  ;;  %v1440_v11 = vadd.f32 %v1439_v10, %v1438_v5  ;;  %v1414_v35 = vadd.f32 %v1413_v23, %v1412_v0  ;;  %v1930_v10 = vpop.eup %1929 }
 0x3f7   : >> { %v1458_v24 = vsel %vm677_vm2, %v1457_v29, 0.0  ;;  %v1448_v42 = vsel %vm677_vm2, %v1447_v31, 0.0  ;;  %v1466_v25 = vadd.f32 %v1465_v14, %v1347_v7  ;;  %v1501_v23 = vmul.f32 %v2187_v48, %v2224_v46  ;;  %v1931_v46 = vld [vmem:[%s2406_s13] sm:$0xff] (%p1064_p4)   ;;  %v1934_v48 = vld [vmem:[%s2406_s13 + $0x18] sm:$0xff] (%p1064_p4)  }
 0x3f8   : >> { %v1433_v26 = vrot.slane %v1432_v19, 1  ;;  %v1423_v27 = vrot.slane %v1422_v3, 1  ;;  %v1441_v12 = vrot.slane %v1440_v11, 2  ;;  %v1459_v22 = vrot.slane %v1458_v24, 4  ;;  %v1397_v34 = vpop.permute.xlu0 %1396  ;;  %v1404_v18 = vpop.permute.xlu1 %1403  ;;  %1836 = vmatpush3.bf16.msra.mxu1 (%p1064_p4), %v1931_v46 }
 0x3f9   : >> { %v1449_v38 = vrot.slane %v1448_v42, 4  ;;  %v1467_v40 = vmul.f32 %v1466_v25, %v1397_v34  ;;  %v1475_v41 = vmul.f32 %v1928_v15, %v1466_v25  ;;  %v1509_v14 = vmul.f32 %v1930_v10, %v2329_v17  ;;  %v1932_v17 = vld [vmem:[%s2406_s13 + $0x8] sm:$0xff] (%p1064_p4)   ;;  %1837 = vmatprep.subr.bf16.mxu1 (%p1064_p4), %v1959_v16 }
 0x3fa   : >> { %v1434_v49 = vadd.f32 %v1433_v26, %v1432_v19  ;;  %v1424_v50 = vadd.f32 %v1423_v27, %v1422_v3  ;;  %v1442_v51 = vadd.f32 %v1441_v12, %v1440_v11  ;;  %v1460_v39 = vadd.f32 %v1459_v22, %v1458_v24 }
 0x3fb   : >> { %v1450_v43 = vadd.f32 %v1449_v38, %v1448_v42  ;;  %v1468_v36 = vsel %vm677_vm2, %v1467_v40, 0.0  ;;  %v1476_v31 = vadd.f32 %v1475_v41, %v1348_v21  }
 0x3fc   : >> { %v1486_v54 = vsel %vm1485_vm12, %v1414_v35, %v1424_v50  ;;  %v1443_v55 = vrot.slane %v1442_v51, 1  ;;  %v1461_v56 = vrot.slane %v1460_v39, 2  ;;  %v1469_v57 = vrot.slane %v1468_v36, 4  ;;  %1838 = vmatpush3.bf16.msra.mxu1 (%p1064_p4), %v1932_v17 }
 0x3fd   : >> { %v1488_v44 = vsel %vm1487_vm13, %v1486_v54, %v1434_v49  ;;  %v1451_v28 = vrot.slane %v1450_v43, 2  ;;  %v1477_v58 = vmul.f32 %v1476_v31, %v1404_v18  ;;  %1839 = vmatprep.subr.bf16.mxu1 (%p1064_p4), %v1959_v16 }
 0x3fe   : >> { %v1444_v59 = vadd.f32 %v1443_v55, %v1442_v51  ;;  %v1462_v45 = vadd.f32 %v1461_v56, %v1460_v39  ;;  %v1470_v60 = vadd.f32 %v1469_v57, %v1468_v36 }
 0x3ff   : >> { %v1452_v61 = vadd.f32 %v1451_v28, %v1450_v43  ;;  %v1478_v62 = vsel %vm677_vm2, %v1477_v58, 0.0 }
 0x400   : >> { %v1489_v33 = vsel %vm682_vm3, %v1488_v44, %v1444_v59  ;;  %v1463_v53 = vrot.slane %v1462_v45, 1  ;;  %v1471_v30 = vrot.slane %v1470_v60, 2  ;;  %v1479_v32 = vrot.slane %v1478_v62, 4  ;;  %1840 = vmatpush3.bf16.msra.mxu1 (%p1064_p4), %v1933_v47 }
 0x401   : >> { %v1453_v52 = vrot.slane %v1452_v61, 1  ;;  %1841 = vmatprep.subr.bf16.mxu1 (%p1064_p4), %v1959_v16 }
 0x402   : >> { %v1464_v63 = vadd.f32 %v1463_v53, %v1462_v45  ;;  %v1472_v0 = vadd.f32 %v1471_v30, %v1470_v60  ;;  %v1480_v1 = vadd.f32 %v1479_v32, %v1478_v62 }
 0x403   : >> { %v1454_v2 = vadd.f32 %v1453_v52, %v1452_v61 }
 0x404   : >> { %v1473_v4 = vrot.slane %v1472_v0, 1  ;;  %v1481_v5 = vrot.slane %v1480_v1, 2  ;;  %1842 = vmatpush3.bf16.msra.mxu1 (%p1064_p4), %v1934_v48 }
 0x405   : >> { %v1491_v6 = vsel %vm1490_vm14, %v1489_v33, %v1454_v2 }
 0x406   : >> { %v1474_v7 = vadd.f32 %v1473_v4, %v1472_v0  ;;  %v1492_v8 = vsel %vm752_vm6, %v1491_v6, %v1464_v63  ;;  %v1482_v9 = vadd.f32 %v1481_v5, %v1480_v1 }
 0x408   : >> { %v1493_v13 = vsel %vm731_vm5, %v1492_v8, %v1474_v7  ;;  %v1483_v37 = vrot.slane %v1482_v9, 1 }
 0x40a   : >> { %v1484_v29 = vadd.f32 %v1483_v37, %v1482_v9 }
 0x40b   : > { %1066 = sbr.rel (!%p1064_p4) target bundleno = 866 (0x362), region = 131 }
 0x40c   : >> { %v1494_v15 = vsel %vm710_vm4, %v1493_v13, %v1484_v29 }
 0x40d   : >> { %v1502_v19 = vadd.f32 %v1501_v23, %v1494_v15 }
 0x40f   : >> { %v1510_v3 = vmul.f32 %v1509_v14, %v1502_v19 }
 0x411   : >> { %1512 = vst.msk [vmem:[%s1511_s23] sm:$0xff] %vm677_vm2, %v1510_v3 }
 0x418   : > { %v1513_v31 = vld [vmem:[#allocation7] sm:$0xff]  ;;  %v1514_v11 = vld [vmem:[#allocation7 + $0x8] sm:$0xff] }
 0x419   : > { %v1515_v20 = vpack.c.bf16 %v1514_v11, %v1513_v31 }
 0x41b   : > { %1844 = vmatmul.mubr.msk.bf16.vlgmr.msra.gmra.mrb[8].mxu1 %vm677_vm2, %v1515_v20 }
 0x4ee   : > { %v1585_v21 = vpop.f32.mrb[8].mxu1 }
 0x4ef   : > { %1592 = vst.msk [vmem:[%s2056_s26] sm:$0xff] %vm511_vm0, %v1585_v21  ;;  %v1845_v24 = vpop.f32.mrb[9].mxu1 }
 0x4f0   : > { %v1588_v42 = vpop.f32.mrb[10].mxu1 }
 0x4f1   : > { %1593 = vst.msk [vmem:[%s2056_s26 + $0x8] sm:$0xff] %vm511_vm0, %v1588_v42  ;;  %v1846_v25 = vpop.f32.mrb[11].mxu1 }
 0x4f2 PF: > { %s26_s18 = sadd.s32 1, %s1949_s18  }
 0x4f3   : > { %p23_p5 = scmp.ge.s32.totalorder %s26_s18, 4  }
 0x4f5   :  { %25 = sbr.rel (!%p23_p5) target bundleno = 1 (0x1), region = 142 }

// kernel: _lambda_.7
= control target key start
LH: loop header
LB: loop body
LE: loop exit
PB: predicated region body
PF: predicated region fallthrough
CT: control target
= control target key end

     0   :  { %s2113_s21 = smov 0   ;;  %s2467_s0 = inlined_call_operand.vmem [shape: f32[2,16,32], index: 0, kind: input, shape index: {}]   ;;  %s2468_s1 = inlined_call_operand.vmem [shape: f32[2,16,32], index: 1, kind: input, shape index: {}]   ;;  %s2469_s2 = inlined_call_operand.vmem [shape: f32[1,32], index: 2, kind: input, shape index: {}]   ;;  %s2470_s3 = inlined_call_operand.vmem [shape: f32[1,32], index: 3, kind: input, shape index: {}]   ;;  %s2471_s4 = inlined_call_operand.vmem [shape: bf16[32,64], index: 4, kind: input, shape index: {}]   ;;  %s2472_s5 = inlined_call_operand.vmem [shape: bf16[32,64], index: 5, kind: input, shape index: {}]   ;;  %s2473_s6 = inlined_call_operand.vmem [shape: f32[4,64], index: 6, kind: input, shape index: {}]   ;;  %s2474_s7 = inlined_call_operand.vmem [shape: f32[1,64], index: 7, kind: input, shape index: {}]   ;;  %s2475_s8 = inlined_call_operand.vmem [shape: bf16[64,8], index: 8, kind: input, shape index: {}]   ;;  %s2476_s9 = inlined_call_operand.vmem [shape: bf16[64,8], index: 9, kind: input, shape index: {}]   ;;  %s2477_s10 = inlined_call_operand.vmem [shape: bf16[64,64], index: 10, kind: input, shape index: {}]   ;;  %s2478_s11 = inlined_call_operand.vmem [shape: f32[1,64], index: 11, kind: input, shape index: {}]   ;;  %s2479_s12 = inlined_call_operand.vmem [shape: f32[8,64], index: 12, kind: input, shape index: {}]   ;;  %s2480_s13 = inlined_call_operand.vmem [shape: f32[1,64], index: 13, kind: input, shape index: {}]   ;;  %s2481_s14 = inlined_call_operand.vmem [shape: bf16[64,32], index: 14, kind: input, shape index: {}]   ;;  %s2482_s15 = inlined_call_operand.vmem [shape: f32[2,16,32], index: 15, kind: output, shape index: {0}]   ;;  %s2483_s16 = inlined_call_operand.vmem [shape: f32[2,16,32], index: 16, kind: output, shape index: {1}]  }
   0x1   :  { %2485 = sst [smem:[#allocation9_spill]] %s2467_s0 }
   0x2 LB: > { %2486 = sst [smem:[#allocation8_spill]] %s2015_s21  ;;  %s1765_s22 = sadd.s32 4294967295, %s2015_s21   ;;  %s2015_s21 = sphi %s2113_s21, %s27_s21  }
   0x3   : > { %p1769_p0 = scmp.ge.s32.totalorder %s2015_s21, 1  ;;  %p475_p1 = scmp.lt.s32.totalorder %s2015_s21, 3 }
   0x5   : > { %p476_p2 = pnand %p1769_p0, %p475_p1 }
   0x6   : > { %p535_p3 = scmp.lt.s32.totalorder (!%p476_p2), %s1765_s22, 1  ;;  %s2487_s26 = sld [smem:[#allocation9_spill]] (!%p476_p2)  ;;  %vm562_vm0 = vcmask (!%p476_p2), 261120   ;;  %v1940_v18 = vld [vmem:[%s2471_s4] sm:$0xff] (!%p476_p2)   ;;  %v2025_v20 = vmov (!%p476_p2), 0.0   ;;  %v1942_v21 = vld [vmem:[%s2471_s4 + $0x8] sm:$0xff] (!%p476_p2)  }
   0x7   : > { %479 = sbr.rel (%p476_p2) target bundleno = 1270 (0x4f6), region = 80  ;;  %v1941_v19 = vld [vmem:[%s2472_s5] sm:$0xff] (!%p476_p2)   ;;  %1849 = vmatprep.subr.bf16.mxu0 (!%p476_p2), %v2025_v20  ;;  %1857 = vmatprep.subr.bf16.mxu1 (!%p476_p2), %v2025_v20  ;;  %v1943_v22 = vld [vmem:[%s2472_s5 + $0x8] sm:$0xff] (!%p476_p2)   ;;  %vm2026_vm1 = vmmov (!%p476_p2), 0   ;;  %v1948_v44 = vld [vmem:[%s2475_s8 + $0x10] sm:$0xff] (!%p476_p2)   ;;  %vm728_vm2 = vcmask (!%p476_p2), 523264  }
   0x8   : > { %1850 = vmatpush3.bf16.msra.mxu0 (!%p476_p2), %v1940_v18  ;;  %1858 = vmatpush3.bf16.msra.mxu1 (!%p476_p2), %v1941_v19  ;;  %v1778_v31 = vld [vmem:[%s2469_s2] ss:$0 sm:$0xff] (!%p476_p2)  ;;  %v1946_v42 = vld [vmem:[%s2475_s8 + $0x8] sm:$0xff] (!%p476_p2)   ;;  %v1949_v45 = vld [vmem:[%s2476_s9 + $0x10] sm:$0xff] (!%p476_p2)   ;;  %vm733_vm3 = vcmask (!%p476_p2), 1042432   ;;  %vm761_vm4 = vcmask (!%p476_p2), 1046528  }
   0x9   : > { %1851 = vmatprep.subr.bf16.mxu0 (!%p476_p2), %v2025_v20  ;;  %1859 = vmatprep.subr.bf16.mxu1 (!%p476_p2), %v2025_v20  ;;  %v1779_v35 = vld [vmem:[%s2470_s3] ss:$0 sm:$0xff] (!%p476_p2)  ;;  %v1947_v43 = vld [vmem:[%s2476_s9 + $0x8] sm:$0xff] (!%p476_p2)   ;;  %v1950_v46 = vld [vmem:[%s2475_s8 + $0x18] sm:$0xff] (!%p476_p2)   ;;  %vm782_vm5 = vcmask (!%p476_p2), 1045504   ;;  %vm803_vm6 = vcmask (!%p476_p2), 1044480  }
   0xa   : > { %1853 = vmatprep.mubr.msk.bf16.mxu0 (!%p476_p2), %vm2026_vm1, %v2025_v20  ;;  %1861 = vmatprep.mubr.msk.bf16.mxu1 (!%p476_p2), %vm2026_vm1, %v2025_v20  ;;  %v1944_v40 = vld [vmem:[%s2475_s8] sm:$0xff] (!%p476_p2)   ;;  %v1951_v47 = vld [vmem:[%s2476_s9 + $0x18] sm:$0xff] (!%p476_p2)   ;;  %vm915_vm7 = vcmask (!%p476_p2), 64512   ;;  %s2270_s0 = smov (!%p476_p2), 0  }
   0xb   : > { %v1945_v41 = vld [vmem:[%s2476_s9] sm:$0xff] (!%p476_p2)  }
   0xc   : > { %1852 = vmatpush3.bf16.msra.mxu0 (!%p476_p2), %v1942_v21  ;;  %1860 = vmatpush3.bf16.msra.mxu1 (!%p476_p2), %v1943_v22  ;;  %v1787_v49 = vld [vmem:[%s2473_s6 + $0x1] ss:$0 sm:$0xff] (!%p476_p2)  ;;  %v1788_v52 = vld [vmem:[%s2473_s6 + $0x2] ss:$0 sm:$0xff] (!%p476_p2)  ;;  %v1789_v55 = vld [vmem:[%s2473_s6 + $0x3] ss:$0 sm:$0xff] (!%p476_p2) }
   0xd   : > { %1865 = vmatprep.subr.bf16.mxu0 (!%p476_p2), %v2025_v20  ;;  %1877 = vmatprep.subr.bf16.mxu1 (!%p476_p2), %v2025_v20 }
   0xe   : > { %s2490_s22 = smov (!%p535_p3, %s1765_s22), 1 }
   0xf   : > { %s1819_s23 = sshll.u32 %s2490_s22, 4 }
  0x10   : > { %s539_s27 = scalar_lea.vmem %s2487_s26, %s1819_s23  ;;  %s544_s30 = scalar_lea.vmem %s2468_s1, %s1819_s23 }
  0x11   : > { %s2130_s18 = scalar_lea.vmem %s2482_s15, %s1819_s23  ;;  %s554_s21 = scalar_lea.vmem %s2483_s16, %s1819_s23  ;;  %v556_v0 = vld [vmem:[%s539_s27] sm:$0xff]  ;;  %v557_v2 = vld [vmem:[%s539_s27 + $0x8] sm:$0xff] }
  0x12   : > { %v558_v1 = vld [vmem:[%s544_s30] sm:$0xff]  ;;  %v559_v4 = vld [vmem:[%s544_s30 + $0x8] sm:$0xff] }
  0x13   : > { %v560_v3 = vadd.f32 %v558_v1, %v556_v0  ;;  %v561_v5 = vadd.f32 %v559_v4, %v557_v2 }
  0x15   : > { %v565_v6 = vsel %vm562_vm0, %v560_v3, 0.0  ;;  %563 = vst.msk [vmem:[%s554_s21] sm:$0xff] %vm562_vm0, %v560_v3  ;;  %564 = vst.msk [vmem:[%s554_s21 + $0x8] sm:$0xff] %vm562_vm0, %v561_v5  ;;  %v568_v7 = vsel %vm562_vm0, %v561_v5, 0.0 }
  0x16   : > { %566 = vadd.xlane.f32.xlu0 %v565_v6 }
  0x1a   : > { %569 = vadd.xlane.f32.xlu0 %v568_v7 }
  0xa3   : > { %v567_v8 = vpop.xlane.xlu0 %566 }
  0xa4   : > { %v572_v9 = vmul.f32 0.03125, %v567_v8 }
  0xa6   : > { %v574_v10 = vsub.f32 %v560_v3, %v572_v9 }
  0xa7   : > { %v570_v11 = vpop.xlane.xlu0 %569 }
  0xa8   : > { %v573_v12 = vmul.f32 0.03125, %v570_v11  ;;  %v576_v13 = vmul.f32 %v574_v10, %v574_v10 }
  0xaa   : > { %v575_v14 = vsub.f32 %v561_v5, %v573_v12  ;;  %v578_v15 = vsel %vm562_vm0, %v576_v13, 0.0  ;;  %v1786_v5 = vld [vmem:[%s2473_s6] ss:$0 sm:$0xff] }
  0xab   : > { %579 = vadd.xlane.f32.xlu1 %v578_v15 }
  0xac   : > { %v577_v16 = vmul.f32 %v575_v14, %v575_v14 }
  0xae   : > { %v581_v17 = vsel %vm562_vm0, %v577_v16, 0.0 }
  0xaf   : > { %582 = vadd.xlane.f32.xlu1 %v581_v17 }
 0x138   : > { %v580_v23 = vpop.xlane.xlu1 %579 }
 0x139   : > { %v584_v24 = vmul.f32 0.03125, %v580_v23 }
 0x13b   : > { %v586_v25 = vadd.f32 1e-05, %v584_v24 }
 0x13c   : > { %v583_v26 = vpop.xlane.xlu1 %582 }
 0x13d   : > { %1956 = vrsqrt.f32 %v586_v25  ;;  %v585_v27 = vmul.f32 0.03125, %v583_v26 }
 0x13f   : > { %v587_v28 = vadd.f32 1e-05, %v585_v27 }
 0x141   : > { %1958 = vrsqrt.f32 %v587_v28 }
 0x147   : > { %v1957_v29 = vpop.eup %1956 }
 0x148   : > { %v590_v30 = vmul.f32 %v1957_v29, %v574_v10 }
 0x14a   : > { %v599_v34 = vmul.f32 %v1778_v31, %v590_v30 }
 0x14b   : > { %v1959_v32 = vpop.eup %1958 }
 0x14c   : > { %v591_v33 = vmul.f32 %v1959_v32, %v575_v14  ;;  %v608_v37 = vadd.f32 %v1779_v35, %v599_v34 }
 0x14e   : > { %v600_v36 = vmul.f32 %v1778_v31, %v591_v33  ;;  %v1790_v31 = vld [vmem:[%s2474_s7] ss:$0 sm:$0xff] }
 0x150   : > { %v609_v38 = vadd.f32 %v1779_v35, %v600_v36 }
 0x152   : > { %v610_v39 = vpack.c.bf16 %v609_v38, %v608_v37 }
 0x154   : > { %1854 = vmatmul.mubr.msk.bf16.vlgmr.msra.gmra.mrb[0].mxu0 %vm562_vm0, %v610_v39  ;;  %1862 = vmatmul.mubr.msk.bf16.vlgmr.msra.gmra.mrb[0].mxu1 %vm562_vm0, %v610_v39 }
 0x155   : > { %1873 = vmatprep.mubr.msk.bf16.mxu0 %vm2026_vm1, %v2025_v20  ;;  %1885 = vmatprep.mubr.msk.bf16.mxu1 %vm2026_vm1, %v2025_v20 }
 0x156   : > { %1866 = vmatpush3.bf16.msra.mxu0 %v1944_v40  ;;  %1878 = vmatpush3.bf16.msra.mxu1 %v1945_v41 }
 0x157   : > { %1867 = vmatprep.subr.bf16.mxu0 %v2025_v20  ;;  %1879 = vmatprep.subr.bf16.mxu1 %v2025_v20 }
 0x15a   : > { %1868 = vmatpush3.bf16.msra.mxu0 %v1946_v42  ;;  %1880 = vmatpush3.bf16.msra.mxu1 %v1947_v43 }
 0x15b   : > { %1869 = vmatprep.subr.bf16.mxu0 %v2025_v20  ;;  %1881 = vmatprep.subr.bf16.mxu1 %v2025_v20 }
 0x15e   : > { %1870 = vmatpush3.bf16.msra.mxu0 %v1948_v44  ;;  %1882 = vmatpush3.bf16.msra.mxu1 %v1949_v45 }
 0x15f   : > { %1871 = vmatprep.subr.bf16.mxu0 %v2025_v20  ;;  %1883 = vmatprep.subr.bf16.mxu1 %v2025_v20 }
 0x162   : > { %1872 = vmatpush3.bf16.msra.mxu0 %v1950_v46  ;;  %1884 = vmatpush3.bf16.msra.mxu1 %v1951_v47  ;;  %v1952_v46 = vld [vmem:[%s2477_s10] sm:$0xff]  }
 0x163   : > { %1889 = vmatprep.subr.bf16.mxu0 %v2025_v20 }
 0x227   : > { %v664_v48 = vpop.f32.mrb[0].mxu0  ;;  %v721_v50 = vpop.f32.mrb[0].mxu1 }
 0x228   : > { %v734_v51 = vrot.slane %v664_v48, 5  ;;  %729 = vst.msk [vmem:[#allocation4] sm:$0xff] %vm728_vm2, %v721_v50  ;;  %v1855_v53 = vpop.f32.mrb[1].mxu0  ;;  %v1863_v54 = vpop.f32.mrb[1].mxu1  ;;  %v1953_v48 = vld [vmem:[%s2477_s10 + $0x8] sm:$0xff]   ;;  %v1955_v50 = vld [vmem:[%s2477_s10 + $0x18] sm:$0xff]  }
 0x229   : > { %v667_v56 = vpop.f32.mrb[2].mxu0  ;;  %v724_v57 = vpop.f32.mrb[2].mxu1 }
 0x22a   : > { %v740_v58 = vsel %vm733_vm3, 0.0, %v734_v51  ;;  %v735_v59 = vrot.slane %v667_v56, 5  ;;  %730 = vst.msk [vmem:[#allocation4 + $0x8] sm:$0xff] %vm728_vm2, %v724_v57  ;;  %v1856_v60 = vpop.f32.mrb[3].mxu0  ;;  %v1864_v61 = vpop.f32.mrb[3].mxu1 }
 0x22b   : > { %v755_v62 = vmul.f32 %v1787_v49, %v740_v58  ;;  %v776_v63 = vmul.f32 %v1788_v52, %v740_v58  ;;  %v797_v4 = vmul.f32 %v1789_v55, %v740_v58  ;;  %v746_v16 = vmul.f32 %v1786_v5, %v740_v58  ;;  %v1803_v61 = vld [vmem:[%s2478_s11] ss:$0 sm:$0xff] }
 0x22c   : > { %v736_v0 = vsel %vm733_vm3, %v734_v51, %v735_v59  ;;  %v757_v1 = vmul.f32 %v1787_v49, %v735_v59  ;;  %v778_v2 = vmul.f32 %v1788_v52, %v735_v59  ;;  %v799_v3 = vmul.f32 %v1789_v55, %v735_v59  ;;  %v2256_v51 = vld [vmem:[%s2479_s12] sm:$0xff] }
 0x22d   : > { %v756_v6 = vmul.f32 %v1787_v49, %v736_v0  ;;  %v777_v8 = vmul.f32 %v1788_v52, %v736_v0  ;;  %v798_v10 = vmul.f32 %v1789_v55, %v736_v0  ;;  %v762_v12 = vrot.slane %v755_v62, 1  ;;  %v1954_v49 = vld [vmem:[%s2477_s10 + $0x10] sm:$0xff]   ;;  %v2261_v52 = vld [vmem:[%s2480_s13] ss:$0 sm:$0xff] }
 0x22e   : > { %v765_v7 = vrot.slane %v757_v1, 1  ;;  %v786_v9 = vrot.slane %v778_v2, 2  ;;  %v807_v11 = vrot.slane %v799_v3, 3  ;;  %v783_v13 = vrot.slane %v776_v63, 2 }
 0x22f   : > { %v763_v14 = vrot.slane %v756_v6, 1  ;;  %v784_v15 = vrot.slane %v777_v8, 2  ;;  %v804_v17 = vrot.slane %v797_v4, 3  ;;  %v747_v18 = vmul.f32 %v1786_v5, %v736_v0 }
 0x230   : > { %v805_v19 = vrot.slane %v798_v10, 3 }
 0x231   : > { %v764_v21 = vsel %vm761_vm4, %v762_v12, %v763_v14  ;;  %v766_v22 = vsel %vm761_vm4, %v763_v14, %v765_v7  ;;  %v785_v23 = vsel %vm782_vm5, %v783_v13, %v784_v15  ;;  %v787_v24 = vsel %vm782_vm5, %v784_v15, %v786_v9 }
 0x232   : > { %v769_v25 = vadd.f32 %v764_v21, %v746_v16  ;;  %v770_v26 = vadd.f32 %v766_v22, %v747_v18  ;;  %v806_v27 = vsel %vm803_vm6, %v804_v17, %v805_v19  ;;  %v808_v28 = vsel %vm803_vm6, %v805_v19, %v807_v11 }
 0x234   : > { %v790_v29 = vadd.f32 %v785_v23, %v769_v25  ;;  %v791_v30 = vadd.f32 %v787_v24, %v770_v26 }
 0x236   : > { %v812_v32 = vadd.f32 %v808_v28, %v791_v30  ;;  %v811_v33 = vadd.f32 %v806_v27, %v790_v29 }
 0x238   : > { %v820_v34 = vadd.f32 %v1790_v31, %v811_v33  ;;  %v821_v35 = vadd.f32 %v1790_v31, %v812_v32 }
 0x23a   : > { %v1791_v36 = vmul.f32 -1.442695, %v820_v34  ;;  %v1792_v37 = vmul.f32 -1.442695, %v821_v35 }
 0x23c   : > { %1960 = vpow2.f32 %v1791_v36 }
 0x23d   : > { %1962 = vpow2.f32 %v1792_v37 }
 0x246   : > { %v1961_v38 = vpop.eup %1960 }
 0x247   : > { %v1963_v39 = vpop.eup %1962  ;;  %v828_v40 = vadd.f32 1.0, %v1961_v38 }
 0x248   : > { %v829_v41 = vadd.f32 1.0, %v1963_v39 }
 0x249   : > { %1964 = vrcp.f32 %v828_v40 }
 0x24a   : > { %1966 = vrcp.f32 %v829_v41 }
 0x253   : > { %v1965_v42 = vpop.eup %1964 }
 0x254   : > { %v1967_v43 = vpop.eup %1966  ;;  %v834_v44 = vmul.f32 %v1965_v42, %v820_v34 }
 0x255   : > { %v835_v45 = vmul.f32 %v1967_v43, %v821_v35  ;;  %v2268_v35 = vmov 0.0  }
 0x256   : > { %836 = vst.msk [vmem:[#allocation2] sm:$0xff] %vm728_vm2, %v834_v44 }
 0x257   : > { %837 = vst.msk [vmem:[#allocation2 + $0x8] sm:$0xff] %vm728_vm2, %v835_v45  ;;  %v838_v47 = vpack.c.bf16 %v835_v45, %v834_v44 }
 0x259   : > { %1874 = vmatmul.mubr.msk.bf16.vlgmr.msra.gmra.mrb[4].mxu0 %vm728_vm2, %v838_v47  ;;  %1886 = vmatmul.mubr.msk.bf16.vlgmr.msra.gmra.mrb[4].mxu1 %vm728_vm2, %v838_v47 }
 0x25a   : > { %1890 = vmatpush3.bf16.msra.mxu0 %v1952_v46  ;;  %1897 = vmatprep.mubr.msk.bf16.mxu0 %vm2026_vm1, %v2025_v20 }
 0x25b   : > { %1891 = vmatprep.subr.bf16.mxu0 %v2025_v20 }
 0x25e   : > { %1892 = vmatpush3.bf16.msra.mxu0 %v1953_v48 }
 0x25f   : > { %1893 = vmatprep.subr.bf16.mxu0 %v2025_v20 }
 0x262   : > { %1894 = vmatpush3.bf16.msra.mxu0 %v1954_v49 }
 0x263   : > { %1895 = vmatprep.subr.bf16.mxu0 %v2025_v20 }
 0x266   : > { %1896 = vmatpush3.bf16.msra.mxu0 %v1955_v50 }
 0x269   : > { %1898 = vmatmul.mubr.msk.bf16.vlgmr.msra.gmra.mrb[8].mxu0 %vm728_vm2, %v838_v47 }
 0x32c   : > { %v908_v53 = vpop.f32.mrb[4].mxu0  ;;  %v984_v54 = vpop.f32.mrb[4].mxu1 }
 0x32d   : > { %916 = vst.msk [vmem:[#allocation5] sm:$0xff] %vm915_vm7, %v908_v53  ;;  %991 = vst.msk [vmem:[#allocation6] sm:$0xff] %vm915_vm7, %v984_v54  ;;  %v1875_v55 = vpop.f32.mrb[5].mxu0  ;;  %v1887_v56 = vpop.f32.mrb[5].mxu1 }
 0x32e   : > { %v911_v57 = vpop.f32.mrb[6].mxu0  ;;  %v987_v58 = vpop.f32.mrb[6].mxu1 }
 0x32f   : > { %917 = vst.msk [vmem:[#allocation5 + $0x8] sm:$0xff] %vm915_vm7, %v911_v57  ;;  %992 = vst.msk [vmem:[#allocation6 + $0x8] sm:$0xff] %vm915_vm7, %v987_v58  ;;  %v1876_v59 = vpop.f32.mrb[7].mxu0  ;;  %v1888_v60 = vpop.f32.mrb[7].mxu1 }
 0x33c   : > { %v1066_v62 = vpop.f32.mrb[8].mxu0 }
 0x33d   : > { %v1067_v63 = vadd.f32 %v1803_v61, %v1066_v62  ;;  %v1899_v0 = vpop.f32.mrb[9].mxu0 }
 0x33e   : > { %v1069_v1 = vpop.f32.mrb[10].mxu0 }
 0x33f   : > { %v1079_v2 = vand.u32 2147483647, %v1067_v63  ;;  %v1070_v3 = vadd.f32 %v1803_v61, %v1069_v1  ;;  %v1900_v4 = vpop.f32.mrb[11].mxu0  ;;  %v1073_v25 = vmax.f32 %v1067_v63, 0.0  ;;  %vm1075_vm10 = vcmp.ne.f32.partialorder %v1067_v63, %v1067_v63 }
 0x341   : > { %v1081_v5 = vsub.f32 0.0, %v1079_v2  ;;  %v1080_v6 = vand.u32 2147483647, %v1070_v3  ;;  %v1074_v30 = vmax.f32 %v1070_v3, 0.0  ;;  %vm1076_vm11 = vcmp.ne.f32.partialorder %v1070_v3, %v1070_v3 }
 0x343   : > { %v1083_v7 = vmul.f32 1.442695, %v1081_v5  ;;  %v1082_v8 = vsub.f32 0.0, %v1080_v6 }
 0x345   : > { %1968 = vpow2.f32 %v1083_v7  ;;  %v1085_v9 = vmul.f32 1.442695, %v1082_v8 }
 0x347   : > { %1970 = vpow2.f32 %v1085_v9 }
 0x34f   : > { %v1969_v10 = vpop.eup %1968 }
 0x350   : > { %v1087_v11 = vadd.f32 1.0, %v1969_v10  ;;  %v1090_v14 = vmul.f32 -0.5, %v1969_v10  ;;  %v1093_v17 = vand.u32 2147483647, %v1969_v10 }
 0x351   : > { %v1971_v12 = vpop.eup %1970 }
 0x352   : > { %1972 = vlog2.f32 %v1087_v11  ;;  %v1096_v13 = vadd.f32 1.0, %v1971_v12  ;;  %v1099_v15 = vmul.f32 -0.5, %v1971_v12  ;;  %v1091_v16 = vadd.f32 1.0, %v1090_v14 }
 0x353   : > { %v1102_v21 = vand.u32 2147483647, %v1971_v12  ;;  %vm1094_vm8 = vcmp.lt.f32.partialorder %v1093_v17, 0.0004427343 }
 0x354   : > { %1974 = vlog2.f32 %v1096_v13  ;;  %v1100_v18 = vadd.f32 1.0, %v1099_v15  ;;  %v1092_v23 = vmul.f32 %v1969_v10, %v1091_v16 }
 0x355   : > { %vm1103_vm9 = vcmp.lt.f32.partialorder %v1102_v21, 0.0004427343 }
 0x356   : > { %v1101_v28 = vmul.f32 %v1971_v12, %v1100_v18 }
 0x35c   : > { %v1973_v19 = vpop.eup %1972 }
 0x35d   : > { %v1089_v22 = vmul.f32 0.6931472, %v1973_v19 }
 0x35e   : > { %v1975_v24 = vpop.eup %1974 }
 0x35f   : > { %v1095_v26 = vsel %vm1094_vm8, %v1092_v23, %v1089_v22  ;;  %v1098_v27 = vmul.f32 0.6931472, %v1975_v24 }
 0x360   : > { %v1105_v29 = vadd.f32 %v1095_v26, %v1073_v25 }
 0x361   : > { %v1104_v31 = vsel %vm1103_vm9, %v1101_v28, %v1098_v27 }
 0x362   : > { %v1107_v32 = vsel %vm1075_vm10, %v1067_v63, %v1105_v29  ;;  %v1106_v33 = vadd.f32 %v1104_v31, %v1074_v30 }
 0x363   : > { %1109 = vst.msk [vmem:[#allocation3] sm:$0xff] %vm728_vm2, %v1107_v32 }
 0x364   : > { %v1108_v34 = vsel %vm1076_vm11, %v1070_v3, %v1106_v33 }
 0x365   : > { %1110 = vst.msk [vmem:[#allocation3 + $0x8] sm:$0xff] %vm728_vm2, %v1108_v34 }
 0x366 LB: >> { %v1137_v36 = vlaneseq  ;;  %s2279_s17 = sshll.u32 %s2023_s0, 3  ;;  %v2027_v38 = vmov 1966171168   ;;  %vm1536_vm12 = vcmask 1040384   ;;  %vm1538_vm13 = vcmask 1041408   ;;  %s1118_s0 = sadd.s32 1, %s2023_s0   ;;  %s2023_s0 = sphi %s2270_s0, %s1118_s0   ;;  %v2019_v35 = vphi %v2268_v35, %v1527_v35  }
 0x367   : >> { %v1135_v39 = vunpack.c.l.s4 %v2027_v38  ;;  %s1125_s19 = scalar_lea.vmem [#allocation5], %s2279_s17  ;;  %s1121_s20 = scalar_lea.vmem [#allocation2], %s2279_s17  ;;  %vm1541_vm14 = vcmask 1043456  }
 0x368   : >> { %v2281_v37 = vshrl.u32 %v1137_v36, 7  ;;  %v2284_v40 = vld [vmem:[%s1125_s19] sm:$0xff]  ;;  %s1123_s22 = scalar_lea.vmem [#allocation3], %s2279_s17  ;;  %s1127_s23 = scalar_lea.vmem [#allocation6], %s2279_s17 }
 0x369   : >> { %v1136_v47 = vunpack.c.0.s8 %v1135_v39  ;;  %v2298_v50 = vld [vmem:[%s1121_s20] sm:$0xff]  ;;  %s1129_s21 = scalar_lea.vmem [#allocation4], %s2279_s17  ;;  %s1562_s24 = scalar_lea.vmem [#allocation7], %s2279_s17 }
 0x36a   : >> { %v2287_v41 = vsub.s32 0, %v2281_v37  ;;  %v1262_v42 = vsub.s32 2, %v2281_v37  ;;  %v1269_v43 = vsub.s32 3, %v2281_v37  ;;  %v1255_v44 = vsub.s32 1, %v2281_v37  ;;  %v2306_v56 = vld [vmem:[%s1127_s23] sm:$0xff]  ;;  %p1115_p4 = scmp.ge.s32.totalorder %s1118_s0, 2  }
 0x36b   : >> { %v1283_v48 = vsub.s32 5, %v2281_v37  ;;  %v1276_v49 = vsub.s32 4, %v2281_v37  ;;  %v1290_v57 = vsub.s32 6, %v2281_v37  ;;  %v1139_v58 = vsub.s32 %v1136_v47, %v2281_v37  ;;  %1901 = vmatprep.subr.bf16.mxu1 (%p1115_p4), %v2025_v20  ;;  %1909 = vmatprep.mubr.msk.bf16.mxu1 (%p1115_p4), %vm2026_vm1, %v2025_v20 }
 0x36c   : >> { %v1263_v45 = vrot.slane %v2284_v40, %v1262_v42  ;;  %v1249_v46 = vrot.slane %v2284_v40, %v2287_v41  ;;  %v1270_v53 = vrot.slane %v2284_v40, %v1269_v43  ;;  %v1256_v54 = vrot.slane %v2284_v40, %v1255_v44  ;;  %v1124_v55 = vld [vmem:[%s1123_s22] sm:$0xff] }
 0x36d   : >> { %v1131_v59 = vmul.f32 %v1124_v55, %v2298_v50  ;;  %v1133_v60 = vcombine.high %v1124_v55, %v1124_v55  ;;  %v1284_v61 = vrot.slane %v2284_v40, %v1283_v48  ;;  %v1277_v62 = vrot.slane %v2284_v40, %v1276_v49 }
 0x36e   : >> { %1265 = vbcast.lane.b32.xlu1 %v1263_v45, 256  ;;  %1251 = vbcast.lane.b32.xlu0 %v1249_v46, 256  ;;  %v1140_v63 = vrot.slane %v1124_v55, %v1139_v58  ;;  %v1403_v2 = vrot.slane %v2306_v56, %v2287_v41  ;;  %v1291_v4 = vrot.slane %v2284_v40, %v1290_v57  ;;  %v1297_v28 = vsub.s32 7, %v2281_v37 }
 0x36f   : >> { %v1147_v0 = vrot.slane %v1133_v60, %v1139_v58  ;;  %v1310_v1 = vrot.slane %v1131_v59, %v1139_v58  ;;  %v1303_v3 = vcombine.high %v1131_v59, %v1131_v59  ;;  %v1417_v8 = vrot.slane %v2306_v56, %v1262_v42 }
 0x370   : >> { %v1148_v5 = vcombine.high %v1140_v63, %v1140_v63  ;;  %v1156_v6 = vrot.slane %v1140_v63, %v1139_v58  ;;  %v1410_v19 = vrot.slane %v2306_v56, %v1255_v44  ;;  %v1424_v42 = vrot.slane %v2306_v56, %v1269_v43 }
 0x371   : >> { %v2322_v7 = vrot.slane %v1310_v1, %v1139_v58  ;;  %v1318_v9 = vcombine.high %v1310_v1, %v1310_v1  ;;  %v1317_v10 = vrot.slane %v1303_v3, %v1139_v58  ;;  %v2325_v11 = vrot.slane %v1147_v0, %v1139_v58 }
 0x372   : >> { %1272 = vbcast.lane.b32.xlu1 %v1270_v53, 256  ;;  %1258 = vbcast.lane.b32.xlu0 %v1256_v54, 256  ;;  %v1170_v12 = vrot.slane %v1148_v5, %v1139_v58  ;;  %v1185_v14 = vrot.slane %v1156_v6, %v2287_v41  ;;  %v1178_v17 = vcombine.high %v1156_v6, %v1156_v6 }
 0x373   : >> { %v1348_v13 = vcombine.high %v2322_v7, %v2322_v7  ;;  %v1355_v15 = vrot.slane %v2322_v7, %v2287_v41  ;;  %v2332_v16 = vrot.slane %v1318_v9, %v1139_v58  ;;  %v1319_v18 = vcombine.high %v1317_v10, %v1317_v10 }
 0x374   : >> { %v1180_v21 = vcombine.high %v1170_v12, %v1170_v12  ;;  %v1189_v23 = vrot.slane %v1170_v12, %v2287_v41  ;;  %v1193_v25 = vrot.slane %v1178_v17, %v2287_v41  ;;  %v1149_v29 = vcombine.high %v1147_v0, %v1147_v0 }
 0x375   : >> { %v2336_v22 = vrot.slane %v1348_v13, %v2287_v41  ;;  %v1350_v24 = vcombine.high %v2332_v16, %v2332_v16  ;;  %v1359_v26 = vrot.slane %v2332_v16, %v2287_v41  ;;  %v2344_v27 = vrot.slane %v1319_v18, %v1139_v58 }
 0x376   : >> { %1286 = vbcast.lane.b32.xlu1 %v1284_v61, 256  ;;  %1279 = vbcast.lane.b32.xlu0 %v1277_v62, 256  ;;  %v1197_v30 = vrot.slane %v1180_v21, %v2287_v41  ;;  %v1201_v31 = vrot.slane %v2325_v11, %v2287_v41  ;;  %v2355_v34 = vrot.slane %v1317_v10, %v1139_v58  ;;  %v2403_v21 = vld [vmem:[%s1129_s21] sm:$0xff] }
 0x377   : >> { %v2351_v32 = vrot.slane %v1350_v24, %v2287_v41  ;;  %v1375_v33 = vrot.slane %v2344_v27, %v2287_v41  ;;  %v1351_v39 = vcombine.high %v2344_v27, %v2344_v27  ;;  %v1298_v44 = vrot.slane %v2284_v40, %v1297_v28 }
 0x378   : >> { %v1371_v36 = vrot.slane %v2355_v34, %v2287_v41  ;;  %v1349_v38 = vcombine.high %v2355_v34, %v2355_v34  ;;  %v1177_v45 = vrot.slane %v1149_v29, %v1139_v58  ;;  %v1179_v54 = vcombine.high %v2325_v11, %v2325_v11 }
 0x379   : >> { %v2371_v47 = vrot.slane %v1351_v39, %v2287_v41  ;;  %v1438_v43 = vrot.slane %v2306_v56, %v1283_v48  ;;  %v1431_v40 = vrot.slane %v2306_v56, %v1276_v49  ;;  %v1445_v60 = vrot.slane %v2306_v56, %v1290_v57 }
 0x37a   : >> { %1405 = vbcast.lane.b32.xlu1 %v1403_v2, 256  ;;  %1293 = vbcast.lane.b32.xlu0 %v1291_v4, 256  ;;  %v2368_v46 = vrot.slane %v1349_v38, %v2287_v41  ;;  %v1205_v53 = vrot.slane %v1177_v45, %v2287_v41  ;;  %v1181_v55 = vcombine.high %v1177_v45, %v1177_v45 }
 0x37b   : >> { %v1209_v58 = vrot.slane %v1179_v54, %v2287_v41  ;;  %v1452_v61 = vrot.slane %v2306_v56, %v1297_v28  ;;  %v1222_v48 = vmul.f32 %v1185_v14, %v2256_v51  ;;  %v1223_v63 = vmul.f32 %v1189_v23, %v2256_v51 }
 0x37c   : >> { %v1213_v59 = vrot.slane %v1181_v55, %v2287_v41  ;;  %v1224_v49 = vmul.f32 %v1193_v25, %v2256_v51  ;;  %v1225_v2 = vmul.f32 %v1197_v30, %v2256_v51  ;;  %v1226_v57 = vmul.f32 %v1201_v31, %v2256_v51 }
 0x37d   : >> { %v1230_v62 = vmul.f32 1.442695, %v1222_v48  ;;  %v1232_v0 = vmul.f32 1.442695, %v1223_v63  ;;  %v1228_v17 = vmul.f32 %v1209_v58, %v2256_v51  ;;  %v1811_v30 = vmul.f32 -1.442695, %v2403_v21 }
 0x37e   : >> { %1419 = vbcast.lane.b32.xlu1 %v1417_v8, 256  ;;  %1412 = vbcast.lane.b32.xlu0 %v1410_v19, 256  ;;  %v1234_v1 = vmul.f32 1.442695, %v1224_v49  ;;  %v1236_v56 = vmul.f32 1.442695, %v1225_v2  ;;  %v1227_v8 = vmul.f32 %v1205_v53, %v2256_v51  ;;  %v1229_v25 = vmul.f32 %v1213_v59, %v2256_v51 }
 0x37f   : >> { %1977 = vpow2.f32 %v1230_v62  ;;  %v1238_v6 = vmul.f32 1.442695, %v1226_v57  ;;  %v1242_v24 = vmul.f32 1.442695, %v1228_v17  ;;  %v1999_v51 = vld [vmem:[%s2481_s14 + $0x10] sm:$0xff] (%p1115_p4)  }
 0x380   : >> { %1979 = vpow2.f32 %v1232_v0  ;;  %v1240_v14 = vmul.f32 1.442695, %v1227_v8  ;;  %v1244_v39 = vmul.f32 1.442695, %v1229_v25 }
 0x381   : >> { %1981 = vpow2.f32 %v1234_v1 }
 0x382   : >> { %1426 = vbcast.lane.b32.xlu1 %v1424_v42, 256  ;;  %1300 = vbcast.lane.b32.xlu0 %v1298_v44, 256  ;;  %1983 = vpow2.f32 %v1236_v56 }
 0x383   : >> { %1985 = vpow2.f32 %v1238_v6 }
 0x384   : >> { %1987 = vpow2.f32 %v1240_v14 }
 0x385   : >> { %1989 = vpow2.f32 %v1242_v24 }
 0x386   : >> { %1440 = vbcast.lane.b32.xlu1 %v1438_v43, 256  ;;  %1433 = vbcast.lane.b32.xlu0 %v1431_v40, 256  ;;  %1991 = vpow2.f32 %v1811_v30 }
 0x387   : >> { %1993 = vpow2.f32 %v1244_v39 }
 0x389   : >> { %v1978_v37 = vpop.eup %1977 }
 0x38a   : >> { %1447 = vbcast.lane.b32.xlu0 %v1445_v60, 256  ;;  %1454 = vbcast.lane.b32.xlu1 %v1452_v61, 256  ;;  %v1456_v3 = vmul.f32 %v2019_v35, %v1978_v37  ;;  %v1980_v10 = vpop.eup %1979 }
 0x38b   : >> { %v1982_v19 = vpop.eup %1981 }
 0x38c   : >> { %v1984_v31 = vpop.eup %1983 }
 0x38d   : >> { %v1986_v53 = vpop.eup %1985 }
 0x38e   : >> { %v1988_v48 = vpop.eup %1987 }
 0x3e0   : >> { %v1266_v4 = vpop.permute.xlu1 %1265  ;;  %v1252_v5 = vpop.permute.xlu0 %1251 }
 0x3e1   : >> { %v1392_v9 = vmul.f32 %v1355_v15, %v1252_v5  ;;  %v1394_v28 = vmul.f32 %v2336_v22, %v1266_v4 }
 0x3e3   : >> { %v1457_v11 = vadd.f32 %v1456_v3, %v1392_v9  ;;  %v1990_v3 = vpop.eup %1989 }
 0x3e4   : >> { %v1273_v12 = vpop.permute.xlu1 %1272  ;;  %v1259_v13 = vpop.permute.xlu0 %1258 }
 0x3e5   : >> { %v1393_v35 = vmul.f32 %v1359_v26, %v1259_v13  ;;  %v1466_v18 = vmul.f32 %v1980_v10, %v1457_v11  ;;  %v1395_v42 = vmul.f32 %v2351_v32, %v1273_v12  ;;  %v1992_v8 = vpop.eup %1991 }
 0x3e6   : >> { %v1557_v24 = vadd.f32 1.0, %v1992_v8 }
 0x3e7   : >> { %v1467_v23 = vadd.f32 %v1466_v18, %v1393_v35 }
 0x3e8   : >> { %v1287_v7 = vpop.permute.xlu1 %1286  ;;  %v1280_v15 = vpop.permute.xlu0 %1279  ;;  %1995 = vrcp.f32 %v1557_v24 }
 0x3e9   : >> { %v1476_v29 = vmul.f32 %v1982_v19, %v1467_v23  ;;  %v1396_v58 = vmul.f32 %v1371_v36, %v1280_v15  ;;  %v1397_v34 = vmul.f32 %v1375_v33, %v1287_v7  ;;  %v1994_v19 = vpop.eup %1993 }
 0x3eb   : >> { %v1477_v16 = vadd.f32 %v1476_v29, %v1394_v28 }
 0x3ec   : >> { %v1406_v26 = vpop.permute.xlu1 %1405  ;;  %v1294_v38 = vpop.permute.xlu0 %1293 }
 0x3ed   : >> { %v1486_v44 = vmul.f32 %v1984_v31, %v1477_v16  ;;  %v1458_v45 = vmul.f32 %v1457_v11, %v1406_v26  ;;  %v1398_v11 = vmul.f32 %v2368_v46, %v1294_v38 }
 0x3ef   : >> { %v1487_v54 = vadd.f32 %v1486_v44, %v1395_v42  ;;  %v1459_v55 = vsel %vm728_vm2, %v1458_v45, 0.0 }
 0x3f0   : >> { %v1460_v43 = vrot.slane %v1459_v55, 4  ;;  %v1420_v22 = vpop.permute.xlu1 %1419  ;;  %v1413_v40 = vpop.permute.xlu0 %1412 }
 0x3f1   : >> { %v1496_v59 = vmul.f32 %v1986_v53, %v1487_v54  ;;  %v1478_v60 = vmul.f32 %v1477_v16, %v1420_v22  ;;  %v1468_v61 = vmul.f32 %v1467_v23, %v1413_v40 }
 0x3f2   : >> { %v1461_v32 = vadd.f32 %v1460_v43, %v1459_v55 }
 0x3f3   : >> { %v1497_v62 = vadd.f32 %v1496_v59, %v1396_v58  ;;  %v1479_v63 = vsel %vm728_vm2, %v1478_v60, 0.0  ;;  %v1469_v49 = vsel %vm728_vm2, %v1468_v61, 0.0 }
 0x3f4   : >> { %v1462_v0 = vrot.slane %v1461_v32, 2  ;;  %v1480_v1 = vrot.slane %v1479_v63, 4  ;;  %v1470_v2 = vrot.slane %v1469_v49, 4  ;;  %v1427_v37 = vpop.permute.xlu1 %1426  ;;  %v1301_v57 = vpop.permute.xlu0 %1300 }
 0x3f5   : >> { %v1488_v36 = vmul.f32 %v1487_v54, %v1427_v37  ;;  %v1506_v56 = vmul.f32 %v1988_v48, %v1497_v62  ;;  %v1399_v25 = vmul.f32 %v2371_v47, %v1301_v57 }
 0x3f6   : >> { %v1463_v4 = vadd.f32 %v1462_v0, %v1461_v32  ;;  %v1481_v5 = vadd.f32 %v1480_v1, %v1479_v63  ;;  %v1471_v6 = vadd.f32 %v1470_v2, %v1469_v49 }
 0x3f7   : >> { %v1489_v9 = vsel %vm728_vm2, %v1488_v36, 0.0  ;;  %v1507_v10 = vadd.f32 %v1506_v56, %v1397_v34 }
 0x3f8   : >> { %v1482_v12 = vrot.slane %v1481_v5, 2  ;;  %v1472_v13 = vrot.slane %v1471_v6, 2  ;;  %v1490_v14 = vrot.slane %v1489_v9, 4  ;;  %v1441_v17 = vpop.permute.xlu1 %1440  ;;  %v1434_v41 = vpop.permute.xlu0 %1433  ;;  %v1464_v27 = vrot.slane %v1463_v4, 1 }
 0x3f9   : >> { %v1508_v33 = vmul.f32 %v1507_v10, %v1441_v17  ;;  %v1498_v35 = vmul.f32 %v1497_v62, %v1434_v41  ;;  %v1516_v18 = vmul.f32 %v1990_v3, %v1507_v10 }
 0x3fa   : >> { %v1483_v23 = vadd.f32 %v1482_v12, %v1481_v5  ;;  %v1473_v7 = vadd.f32 %v1472_v13, %v1471_v6  ;;  %v1491_v15 = vadd.f32 %v1490_v14, %v1489_v9  ;;  %v1465_v39 = vadd.f32 %v1464_v27, %v1463_v4  ;;  %v1996_v14 = vpop.eup %1995 }
 0x3fb   : >> { %v1509_v28 = vsel %vm728_vm2, %v1508_v33, 0.0  ;;  %v1499_v46 = vsel %vm728_vm2, %v1498_v35, 0.0  ;;  %v1517_v29 = vadd.f32 %v1516_v18, %v1398_v11  ;;  %v1552_v27 = vmul.f32 %v2261_v52, %v2298_v50  ;;  %v1997_v50 = vld [vmem:[%s2481_s14] sm:$0xff] (%p1115_p4)   ;;  %v2000_v52 = vld [vmem:[%s2481_s14 + $0x18] sm:$0xff] (%p1115_p4)  }
 0x3fc   : >> { %v1484_v30 = vrot.slane %v1483_v23, 1  ;;  %v1474_v31 = vrot.slane %v1473_v7, 1  ;;  %v1492_v16 = vrot.slane %v1491_v15, 2  ;;  %v1510_v26 = vrot.slane %v1509_v28, 4  ;;  %v1448_v38 = vpop.permute.xlu0 %1447  ;;  %v1455_v22 = vpop.permute.xlu1 %1454  ;;  %1902 = vmatpush3.bf16.msra.mxu1 (%p1115_p4), %v1997_v50 }
 0x3fd   : >> { %v1500_v42 = vrot.slane %v1499_v46, 4  ;;  %v1518_v44 = vmul.f32 %v1517_v29, %v1448_v38  ;;  %v1526_v45 = vmul.f32 %v1994_v19, %v1517_v29  ;;  %v1560_v18 = vmul.f32 %v1996_v14, %v2403_v21  ;;  %v1998_v21 = vld [vmem:[%s2481_s14 + $0x8] sm:$0xff] (%p1115_p4)   ;;  %1903 = vmatprep.subr.bf16.mxu1 (%p1115_p4), %v2025_v20 }
 0x3fe   : >> { %v1485_v53 = vadd.f32 %v1484_v30, %v1483_v23  ;;  %v1475_v54 = vadd.f32 %v1474_v31, %v1473_v7  ;;  %v1493_v55 = vadd.f32 %v1492_v16, %v1491_v15  ;;  %v1511_v43 = vadd.f32 %v1510_v26, %v1509_v28 }
 0x3ff   : >> { %v1501_v47 = vadd.f32 %v1500_v42, %v1499_v46  ;;  %v1519_v40 = vsel %vm728_vm2, %v1518_v44, 0.0  ;;  %v1527_v35 = vadd.f32 %v1526_v45, %v1399_v25  }
 0x400   : >> { %v1537_v58 = vsel %vm1536_vm12, %v1465_v39, %v1475_v54  ;;  %v1494_v59 = vrot.slane %v1493_v55, 1  ;;  %v1512_v60 = vrot.slane %v1511_v43, 2  ;;  %v1520_v61 = vrot.slane %v1519_v40, 4  ;;  %1904 = vmatpush3.bf16.msra.mxu1 (%p1115_p4), %v1998_v21 }
 0x401   : >> { %v1539_v48 = vsel %vm1538_vm13, %v1537_v58, %v1485_v53  ;;  %v1502_v32 = vrot.slane %v1501_v47, 2  ;;  %v1528_v62 = vmul.f32 %v1527_v35, %v1455_v22  ;;  %1905 = vmatprep.subr.bf16.mxu1 (%p1115_p4), %v2025_v20 }
 0x402   : >> { %v1495_v63 = vadd.f32 %v1494_v59, %v1493_v55  ;;  %v1513_v49 = vadd.f32 %v1512_v60, %v1511_v43  ;;  %v1521_v0 = vadd.f32 %v1520_v61, %v1519_v40 }
 0x403   : >> { %v1503_v1 = vadd.f32 %v1502_v32, %v1501_v47  ;;  %v1529_v2 = vsel %vm728_vm2, %v1528_v62, 0.0 }
 0x404   : >> { %v1540_v37 = vsel %vm733_vm3, %v1539_v48, %v1495_v63  ;;  %v1514_v57 = vrot.slane %v1513_v49, 1  ;;  %v1522_v34 = vrot.slane %v1521_v0, 2  ;;  %v1530_v36 = vrot.slane %v1529_v2, 4  ;;  %1906 = vmatpush3.bf16.msra.mxu1 (%p1115_p4), %v1999_v51 }
 0x405   : >> { %v1504_v56 = vrot.slane %v1503_v1, 1  ;;  %1907 = vmatprep.subr.bf16.mxu1 (%p1115_p4), %v2025_v20 }
 0x406   : >> { %v1515_v3 = vadd.f32 %v1514_v57, %v1513_v49  ;;  %v1523_v4 = vadd.f32 %v1522_v34, %v1521_v0  ;;  %v1531_v5 = vadd.f32 %v1530_v36, %v1529_v2 }
 0x407   : >> { %v1505_v6 = vadd.f32 %v1504_v56, %v1503_v1 }
 0x408   : >> { %v1524_v8 = vrot.slane %v1523_v4, 1  ;;  %v1532_v9 = vrot.slane %v1531_v5, 2  ;;  %1908 = vmatpush3.bf16.msra.mxu1 (%p1115_p4), %v2000_v52 }
 0x409   : >> { %v1542_v10 = vsel %vm1541_vm14, %v1540_v37, %v1505_v6 }
 0x40a   : >> { %v1525_v11 = vadd.f32 %v1524_v8, %v1523_v4  ;;  %v1543_v12 = vsel %vm803_vm6, %v1542_v10, %v1515_v3  ;;  %v1533_v13 = vadd.f32 %v1532_v9, %v1531_v5 }
 0x40c   : >> { %v1544_v17 = vsel %vm782_vm5, %v1543_v12, %v1525_v11  ;;  %v1534_v41 = vrot.slane %v1533_v13, 1 }
 0x40e   : >> { %v1535_v33 = vadd.f32 %v1534_v41, %v1533_v13 }
 0x40f   : > { %1117 = sbr.rel (!%p1115_p4) target bundleno = 870 (0x366), region = 138 }
 0x410   : >> { %v1545_v19 = vsel %vm761_vm4, %v1544_v17, %v1535_v33 }
 0x411   : >> { %v1553_v23 = vadd.f32 %v1552_v27, %v1545_v19 }
 0x413   : >> { %v1561_v7 = vmul.f32 %v1560_v18, %v1553_v23 }
 0x415   : >> { %1563 = vst.msk [vmem:[%s1562_s24] sm:$0xff] %vm728_vm2, %v1561_v7 }
 0x41c   : > { %v1564_v35 = vld [vmem:[#allocation7] sm:$0xff]  ;;  %v1565_v15 = vld [vmem:[#allocation7 + $0x8] sm:$0xff] }
 0x41d   : > { %v1566_v24 = vpack.c.bf16 %v1565_v15, %v1564_v35 }
 0x41f   : > { %1910 = vmatmul.mubr.msk.bf16.vlgmr.msra.gmra.mrb[8].mxu1 %vm728_vm2, %v1566_v24 }
 0x4f2   : > { %v1636_v25 = vpop.f32.mrb[8].mxu1 }
 0x4f3   : > { %1643 = vst.msk [vmem:[%s2130_s18] sm:$0xff] %vm562_vm0, %v1636_v25  ;;  %v1911_v28 = vpop.f32.mrb[9].mxu1 }
 0x4f4   : > { %v1639_v46 = vpop.f32.mrb[10].mxu1 }
 0x4f5   : > { %1644 = vst.msk [vmem:[%s2130_s18 + $0x8] sm:$0xff] %vm562_vm0, %v1639_v46  ;;  %v1912_v29 = vpop.f32.mrb[11].mxu1 }
 0x4f6 PF: > { %s2488_s19 = sld [smem:[#allocation8_spill]] }
 0x4fc   : > { %s27_s21 = sadd.s32 1, %s2488_s19  }
 0x4fd   : > { %p24_p5 = scmp.ge.s32.totalorder %s27_s21, 4  }
 0x4ff   :  { %26 = sbr.rel (!%p24_p5) target bundleno = 2 (0x2), region = 149 }

</bundles_post_ra>
